<compile_context>
chip_gen: v6e
topology: v6e:2x2x1
jax: 0.10.0
libtpu: 0.0.40
codegen_flags: <defaults>
</compile_context>

<pallas_src>
import functools

import jax
import jax.numpy as jnp
from jax.experimental import pallas as pl
from jax.experimental.pallas import tpu as pltpu

_LANES = 128


def _leaky_relu(x, slope=0.2):
    return jnp.where(x > 0, x, slope * x)


def _round_up(n, m):
    return (n + m - 1) // m * m


# ---------------------------------------------------------------------------
# Kernel
# ---------------------------------------------------------------------------
def discriminator_kernel(x_ref, w1_ref, b1_ref, w2_ref, b2_ref,
                         w3_ref, b3_ref, w4_ref, b4_ref, o_ref):
    # Fused 4-layer MLP on one batch tile.  Matmul operands are bf16,
    # accumulation is f32 on the MXU; bias add + LeakyReLU stay in f32
    # (v5e has no bf16 VALU), then re-cast to bf16 for the next matmul.
    x = x_ref[...].astype(jnp.bfloat16)                        # (tile_b, F)

    h = jnp.dot(x, w1_ref[...], preferred_element_type=jnp.float32) + b1_ref[...]
    h = _leaky_relu(h).astype(jnp.bfloat16)   # Dropout(0.3): identity in eval mode

    h = jnp.dot(h, w2_ref[...], preferred_element_type=jnp.float32) + b2_ref[...]
    h = _leaky_relu(h).astype(jnp.bfloat16)

    h = jnp.dot(h, w3_ref[...], preferred_element_type=jnp.float32) + b3_ref[...]
    h = _leaky_relu(h).astype(jnp.bfloat16)

    z = jnp.dot(h, w4_ref[...], preferred_element_type=jnp.float32) + b4_ref[...]
    # Sigmoid: exp on the EUP; exact reciprocal (negligible cost at this size,
    # better parity with PyTorch near 0/1).
    o_ref[...] = pl.reciprocal(1.0 + jnp.exp(-z), approx=False).astype(o_ref.dtype)


# ---------------------------------------------------------------------------
# One-time parameter preparation (do NOT call this per forward pass)
# ---------------------------------------------------------------------------
def prepare_params(params):
    """Cast weights to bf16, pad the output layer to 128 lanes, reshape biases.

    Returns a flat tuple of device arrays that `discriminator_forward` consumes
    directly, so no weight padding/casting happens inside the jitted forward.
    """
    w4 = params["w4"]
    b4 = params["b4"]
    n_out = w4.shape[1]
    Np = _round_up(n_out, _LANES)

    w4p = jnp.zeros((w4.shape[0], Np), jnp.float32).at[:, :n_out].set(w4)
    b4p = jnp.zeros((Np,), jnp.float32).at[:n_out].set(b4)

    prepped = (
        params["w1"].astype(jnp.bfloat16), params["b1"].reshape(1, -1).astype(jnp.float32),
        params["w2"].astype(jnp.bfloat16), params["b2"].reshape(1, -1).astype(jnp.float32),
        params["w3"].astype(jnp.bfloat16), params["b3"].reshape(1, -1).astype(jnp.float32),
        w4p.astype(jnp.bfloat16), b4p.reshape(1, -1),
    )
    return jax.device_put(prepped)


# ---------------------------------------------------------------------------
# Forward
# ---------------------------------------------------------------------------
def _pick_tile_b(batch):
    # Fill the MXU M dimension (up to 256 for v6e/v7x's 2x256x256 MXU) while
    # keeping >= 2 grid steps whenever the batch allows it, so both v7x
    # TensorCores get work under dimension_semantics=("parallel",).
    if batch <= 8:
        return 8
    half = _round_up((batch + 1) // 2, 8)
    return min(256, half)


@functools.partial(jax.jit, static_argnames=("tile_b", "n_out"))
def _discriminator_forward(x, w1, b1, w2, b2, w3, b3, w4, b4, *, tile_b, n_out):
    B, F = x.shape
    Np = w4.shape[1]
    Bp = _round_up(B, tile_b)

    # Only the batch dim is padded (and only when ragged); x stays f32 at its
    # native feature width and is cast to bf16 inside the kernel.
    xp = x if Bp == B else jnp.pad(x, ((0, Bp - B), (0, 0)))

    grid = (Bp // tile_b,)

    def resident(shape):
        # Weights / biases: same block at every grid step (stay VMEM-resident).
        return pl.BlockSpec(shape, lambda i: (0, 0))

    flops = 2 * Bp * (F * 1024 + 1024 * 512 + 512 * 256 + 256 * Np)
    bytes_accessed = (
        xp.size * 4
        + (w1.size + w2.size + w3.size + w4.size) * 2
        + (b1.size + b2.size + b3.size + b4.size) * 4
        + Bp * Np * 4
    )

    out = pl.pallas_call(
        discriminator_kernel,
        out_shape=jax.ShapeDtypeStruct((Bp, Np), jnp.float32),
        grid_spec=pltpu.PrefetchScalarGridSpec(
            num_scalar_prefetch=0,
            grid=grid,
            in_specs=[
                pl.BlockSpec((tile_b, F), lambda i: (i, 0)),    # x batch tile
                resident(w1.shape), resident(b1.shape),
                resident(w2.shape), resident(b2.shape),
                resident(w3.shape), resident(b3.shape),
                resident(w4.shape), resident(b4.shape),
            ],
            out_specs=pl.BlockSpec((tile_b, Np), lambda i: (i, 0)),
        ),
        compiler_params=pltpu.CompilerParams(
            dimension_semantics=("parallel",),
        ),
        cost_estimate=pl.CostEstimate(
            flops=flops,
            transcendentals=Bp * Np,
            bytes_accessed=bytes_accessed,
        ),
    )(xp, w1, b1, w2, b2, w3, b3, w4, b4)

    return out[:B, :n_out]


def discriminator_forward(x, prepped_params, n_output, tile_b=None):
    """x: (B, n_features) f32. prepped_params: output of prepare_params.

    Returns (B, n_output) f32 sigmoid probabilities.
    """
    if tile_b is None:
        tile_b = _pick_tile_b(x.shape[0])
    return _discriminator_forward(x, *prepped_params, tile_b=tile_b, n_out=n_output)


# ---------------------------------------------------------------------------
# Init + references
# ---------------------------------------------------------------------------
def init_params(key, n_features, n_output):
    """Deterministic init matching nn.Linear shapes (U[-1/sqrt(fan_in), 1/sqrt(fan_in)])."""
    dims = [n_features, 1024, 512, 256, n_output]
    params = {}
    keys = jax.random.split(key, 2 * (len(dims) - 1))
    for li, (fan_in, fan_out) in enumerate(zip(dims[:-1], dims[1:]), start=1):
        bound = 1.0 / jnp.sqrt(jnp.float32(fan_in))
        kw, kb = keys[2 * (li - 1)], keys[2 * (li - 1) + 1]
        params[f"w{li}"] = jax.random.uniform(
            kw, (fan_in, fan_out), jnp.float32, -bound, bound)
        params[f"b{li}"] = jax.random.uniform(
            kb, (fan_out,), jnp.float32, -bound, bound)
    return params


def reference_forward_f32(x, params):
    """Pure-JAX f32 reference (eval-mode dropout)."""
    h = _leaky_relu(x @ params["w1"] + params["b1"])
    h = _leaky_relu(h @ params["w2"] + params["b2"])
    h = _leaky_relu(h @ params["w3"] + params["b3"])
    return jax.nn.sigmoid(h @ params["w4"] + params["b4"])


def reference_forward_bf16(x, params):
    """Pure-JAX reference mimicking the kernel's bf16-operand / f32-acc numerics."""
    bf16 = jnp.bfloat16

    def lin(h, w, b):
        return jnp.dot(h.astype(bf16), w.astype(bf16),
                       preferred_element_type=jnp.float32) + b

    h = _leaky_relu(lin(x, params["w1"], params["b1"]))
    h = _leaky_relu(lin(h, params["w2"], params["b2"]))
    h = _leaky_relu(lin(h, params["w3"], params["b3"]))
    return jax.nn.sigmoid(lin(h, params["w4"], params["b4"]))


if __name__ == "__main__":
    key = jax.random.PRNGKey(0)
    k_param, k_x = jax.random.split(key)

    B = 20             # deliberately not a multiple of the tile: exercises batch padding
    n_features = 784   # MNIST image size, as the module implies
    n_output = 1

    raw_params = init_params(k_param, n_features, n_output)
    prepped = prepare_params(raw_params)   # one-time weight prep (outside jit)
    x = jax.random.normal(k_x, (B, n_features), jnp.float32)

    out = discriminator_forward(x, prepped, n_output)
    out = jax.block_until_ready(out)
    assert out.shape == (B, n_output)

    ref_bf16 = reference_forward_bf16(x, raw_params)   # same numerics as the kernel
    ref_f32 = reference_forward_f32(x, raw_params)     # full-precision semantics
    assert jnp.allclose(out, ref_bf16, atol=5e-3, rtol=0), "mismatch vs bf16 reference"
    assert jnp.allclose(out, ref_f32, atol=3e-2, rtol=0), "mismatch vs f32 reference"

    print("KERNEL_OK")
</pallas_src>

<mosaic_0001>
module attributes {stable_mosaic.version = 11 : i64} {
  func.func @discriminator_kernel(%arg0: i32, %arg1: memref<16x784xf32, #tpu.memory_space<vmem>>, %arg2: memref<784x1024xbf16, #tpu.memory_space<vmem>>, %arg3: memref<1x1024xf32, #tpu.memory_space<vmem>>, %arg4: memref<1024x512xbf16, #tpu.memory_space<vmem>>, %arg5: memref<1x512xf32, #tpu.memory_space<vmem>>, %arg6: memref<512x256xbf16, #tpu.memory_space<vmem>>, %arg7: memref<1x256xf32, #tpu.memory_space<vmem>>, %arg8: memref<256x128xbf16, #tpu.memory_space<vmem>>, %arg9: memref<1x128xf32, #tpu.memory_space<vmem>>, %arg10: memref<16x128xf32, #tpu.memory_space<vmem>>) attributes {dimension_semantics = [#tpu.dimension_semantics<parallel>], iteration_bounds = array<i64: 2>, scalar_prefetch = 0 : i64, scratch_operands = 0 : i64, tpu.core_type = #tpu.core_type<tc>, window_params = [{transform_indices = @transform_0, window_bounds = array<i64: 16, 784>}, {pipeline_mode = #tpu.pipeline_mode<synchronous>, transform_indices = @transform_1, window_bounds = array<i64: 784, 1024>}, {pipeline_mode = #tpu.pipeline_mode<synchronous>, transform_indices = @transform_2, window_bounds = array<i64: 1, 1024>}, {pipeline_mode = #tpu.pipeline_mode<synchronous>, transform_indices = @transform_3, window_bounds = array<i64: 1024, 512>}, {pipeline_mode = #tpu.pipeline_mode<synchronous>, transform_indices = @transform_4, window_bounds = array<i64: 1, 512>}, {pipeline_mode = #tpu.pipeline_mode<synchronous>, transform_indices = @transform_5, window_bounds = array<i64: 512, 256>}, {pipeline_mode = #tpu.pipeline_mode<synchronous>, transform_indices = @transform_6, window_bounds = array<i64: 1, 256>}, {pipeline_mode = #tpu.pipeline_mode<synchronous>, transform_indices = @transform_7, window_bounds = array<i64: 256, 128>}, {pipeline_mode = #tpu.pipeline_mode<synchronous>, transform_indices = @transform_8, window_bounds = array<i64: 1, 128>}, {transform_indices = @transform_9, window_bounds = array<i64: 16, 128>}]} {
    %c0 = arith.constant 0 : index
    %c0_0 = arith.constant 0 : index
    %0 = vector.load %arg1[%c0, %c0_0] : memref<16x784xf32, #tpu.memory_space<vmem>>, vector<16x784xf32>
    %1 = arith.truncf %0 : vector<16x784xf32> to vector<16x784xbf16>
    %c0_1 = arith.constant 0 : index
    %c0_2 = arith.constant 0 : index
    %2 = vector.load %arg2[%c0_1, %c0_2] : memref<784x1024xbf16, #tpu.memory_space<vmem>>, vector<784x1024xbf16>
    %cst = arith.constant dense<0.000000e+00> : vector<16x1024xf32>
    %3 = tpu.matmul %1, %2, %cst {dimension_numbers = #tpu.dot_dimension_numbers<[1], [0], [0], [1], [0, 0, 1, 1], [], []>} : vector<16x784xbf16>, vector<784x1024xbf16>, vector<16x1024xf32> -> vector<16x1024xf32>
    %c0_3 = arith.constant 0 : index
    %c0_4 = arith.constant 0 : index
    %4 = vector.load %arg3[%c0_3, %c0_4] : memref<1x1024xf32, #tpu.memory_space<vmem>>, vector<1x1024xf32>
    %5 = vector.broadcast %4 : vector<1x1024xf32> to vector<16x1024xf32>
    %6 = arith.addf %3, %5 : vector<16x1024xf32>
    %cst_5 = arith.constant 0.000000e+00 : f32
    %7 = vector.broadcast %cst_5 : f32 to vector<16x1024xf32>
    %8 = arith.cmpf ogt, %6, %7 : vector<16x1024xf32>
    %cst_6 = arith.constant 2.000000e-01 : f32
    %9 = vector.broadcast %cst_6 : f32 to vector<16x1024xf32>
    %10 = arith.mulf %9, %6 : vector<16x1024xf32>
    %11 = arith.select %8, %6, %10 : vector<16x1024xi1>, vector<16x1024xf32>
    %12 = arith.truncf %11 : vector<16x1024xf32> to vector<16x1024xbf16>
    %c0_7 = arith.constant 0 : index
    %c0_8 = arith.constant 0 : index
    %13 = vector.load %arg4[%c0_7, %c0_8] : memref<1024x512xbf16, #tpu.memory_space<vmem>>, vector<1024x512xbf16>
    %cst_9 = arith.constant dense<0.000000e+00> : vector<16x512xf32>
    %14 = tpu.matmul %12, %13, %cst_9 {dimension_numbers = #tpu.dot_dimension_numbers<[1], [0], [0], [1], [0, 0, 1, 1], [], []>} : vector<16x1024xbf16>, vector<1024x512xbf16>, vector<16x512xf32> -> vector<16x512xf32>
    %c0_10 = arith.constant 0 : index
    %c0_11 = arith.constant 0 : index
    %15 = vector.load %arg5[%c0_10, %c0_11] : memref<1x512xf32, #tpu.memory_space<vmem>>, vector<1x512xf32>
    %16 = vector.broadcast %15 : vector<1x512xf32> to vector<16x512xf32>
    %17 = arith.addf %14, %16 : vector<16x512xf32>
    %cst_12 = arith.constant 0.000000e+00 : f32
    %18 = vector.broadcast %cst_12 : f32 to vector<16x512xf32>
    %19 = arith.cmpf ogt, %17, %18 : vector<16x512xf32>
    %cst_13 = arith.constant 2.000000e-01 : f32
    %20 = vector.broadcast %cst_13 : f32 to vector<16x512xf32>
    %21 = arith.mulf %20, %17 : vector<16x512xf32>
    %22 = arith.select %19, %17, %21 : vector<16x512xi1>, vector<16x512xf32>
    %23 = arith.truncf %22 : vector<16x512xf32> to vector<16x512xbf16>
    %c0_14 = arith.constant 0 : index
    %c0_15 = arith.constant 0 : index
    %24 = vector.load %arg6[%c0_14, %c0_15] : memref<512x256xbf16, #tpu.memory_space<vmem>>, vector<512x256xbf16>
    %cst_16 = arith.constant dense<0.000000e+00> : vector<16x256xf32>
    %25 = tpu.matmul %23, %24, %cst_16 {dimension_numbers = #tpu.dot_dimension_numbers<[1], [0], [0], [1], [0, 0, 1, 1], [], []>} : vector<16x512xbf16>, vector<512x256xbf16>, vector<16x256xf32> -> vector<16x256xf32>
    %c0_17 = arith.constant 0 : index
    %c0_18 = arith.constant 0 : index
    %26 = vector.load %arg7[%c0_17, %c0_18] : memref<1x256xf32, #tpu.memory_space<vmem>>, vector<1x256xf32>
    %27 = vector.broadcast %26 : vector<1x256xf32> to vector<16x256xf32>
    %28 = arith.addf %25, %27 : vector<16x256xf32>
    %cst_19 = arith.constant 0.000000e+00 : f32
    %29 = vector.broadcast %cst_19 : f32 to vector<16x256xf32>
    %30 = arith.cmpf ogt, %28, %29 : vector<16x256xf32>
    %cst_20 = arith.constant 2.000000e-01 : f32
    %31 = vector.broadcast %cst_20 : f32 to vector<16x256xf32>
    %32 = arith.mulf %31, %28 : vector<16x256xf32>
    %33 = arith.select %30, %28, %32 : vector<16x256xi1>, vector<16x256xf32>
    %34 = arith.truncf %33 : vector<16x256xf32> to vector<16x256xbf16>
    %c0_21 = arith.constant 0 : index
    %c0_22 = arith.constant 0 : index
    %35 = vector.load %arg8[%c0_21, %c0_22] : memref<256x128xbf16, #tpu.memory_space<vmem>>, vector<256x128xbf16>
    %cst_23 = arith.constant dense<0.000000e+00> : vector<16x128xf32>
    %36 = tpu.matmul %34, %35, %cst_23 {dimension_numbers = #tpu.dot_dimension_numbers<[1], [0], [0], [1], [0, 0, 1, 1], [], []>} : vector<16x256xbf16>, vector<256x128xbf16>, vector<16x128xf32> -> vector<16x128xf32>
    %c0_24 = arith.constant 0 : index
    %c0_25 = arith.constant 0 : index
    %37 = vector.load %arg9[%c0_24, %c0_25] : memref<1x128xf32, #tpu.memory_space<vmem>>, vector<1x128xf32>
    %38 = vector.broadcast %37 : vector<1x128xf32> to vector<16x128xf32>
    %39 = arith.addf %36, %38 : vector<16x128xf32>
    %cst_26 = arith.constant 0.000000e+00 : f32
    %40 = vector.broadcast %cst_26 : f32 to vector<16x128xf32>
    %41 = arith.subf %40, %39 : vector<16x128xf32>
    %42 = math.exp %41 : vector<16x128xf32>
    %cst_27 = arith.constant 1.000000e+00 : f32
    %43 = vector.broadcast %cst_27 : f32 to vector<16x128xf32>
    %44 = arith.addf %43, %42 : vector<16x128xf32>
    %45 = tpu.reciprocal %44 : vector<16x128xf32> -> vector<16x128xf32>
    %c0_28 = arith.constant 0 : index
    %c0_29 = arith.constant 0 : index
    %46 = vector.load %arg10[%c0_28, %c0_29] : memref<16x128xf32, #tpu.memory_space<vmem>>, vector<16x128xf32>
    tpu.vector_store %arg10[%c0_28, %c0_29], %45 {strides = array<i32>} : memref<16x128xf32, #tpu.memory_space<vmem>>, vector<16x128xf32>,
    return
  }
  func.func @transform_0(%arg0: i32) -> (i32, i32) {
    %c0_i32 = arith.constant 0 : i32
    %c0_i32_0 = arith.constant 0 : i32
    return %arg0, %c0_i32 : i32, i32
  }
  func.func @transform_1(%arg0: i32) -> (i32, i32) {
    %c0_i32 = arith.constant 0 : i32
    %c0_i32_0 = arith.constant 0 : i32
    %c0_i32_1 = arith.constant 0 : i32
    return %c0_i32, %c0_i32_0 : i32, i32
  }
  func.func @transform_2(%arg0: i32) -> (i32, i32) {
    %c0_i32 = arith.constant 0 : i32
    %c0_i32_0 = arith.constant 0 : i32
    %c0_i32_1 = arith.constant 0 : i32
    return %c0_i32, %c0_i32_0 : i32, i32
  }
  func.func @transform_3(%arg0: i32) -> (i32, i32) {
    %c0_i32 = arith.constant 0 : i32
    %c0_i32_0 = arith.constant 0 : i32
    %c0_i32_1 = arith.constant 0 : i32
    return %c0_i32, %c0_i32_0 : i32, i32
  }
  func.func @transform_4(%arg0: i32) -> (i32, i32) {
    %c0_i32 = arith.constant 0 : i32
    %c0_i32_0 = arith.constant 0 : i32
    %c0_i32_1 = arith.constant 0 : i32
    return %c0_i32, %c0_i32_0 : i32, i32
  }
  func.func @transform_5(%arg0: i32) -> (i32, i32) {
    %c0_i32 = arith.constant 0 : i32
    %c0_i32_0 = arith.constant 0 : i32
    %c0_i32_1 = arith.constant 0 : i32
    return %c0_i32, %c0_i32_0 : i32, i32
  }
  func.func @transform_6(%arg0: i32) -> (i32, i32) {
    %c0_i32 = arith.constant 0 : i32
    %c0_i32_0 = arith.constant 0 : i32
    %c0_i32_1 = arith.constant 0 : i32
    return %c0_i32, %c0_i32_0 : i32, i32
  }
  func.func @transform_7(%arg0: i32) -> (i32, i32) {
    %c0_i32 = arith.constant 0 : i32
    %c0_i32_0 = arith.constant 0 : i32
    %c0_i32_1 = arith.constant 0 : i32
    return %c0_i32, %c0_i32_0 : i32, i32
  }
  func.func @transform_8(%arg0: i32) -> (i32, i32) {
    %c0_i32 = arith.constant 0 : i32
    %c0_i32_0 = arith.constant 0 : i32
    %c0_i32_1 = arith.constant 0 : i32
    return %c0_i32, %c0_i32_0 : i32, i32
  }
  func.func @transform_9(%arg0: i32) -> (i32, i32) {
    %c0_i32 = arith.constant 0 : i32
    %c0_i32_0 = arith.constant 0 : i32
    return %arg0, %c0_i32 : i32, i32
  }
}

</mosaic_0001>

<bundles_post_ra>
// kernel: _discriminator_forward.1
= control target key start
LH: loop header
LB: loop body
LE: loop exit
PB: predicated region body
PF: predicated region fallthrough
CT: control target
= control target key end

     0   :  { %14 = vsyncpa [#allocation3], 0  ;;  %s8360_s0 = inlined_call_operand.vmem [shape: f32[32,784], index: 0, kind: input, shape index: {}]   ;;  %s8361_s1 = inlined_call_operand.hbm [shape: bf16[784,1024], index: 1, kind: input, shape index: {}]   ;;  %s8362_s2 = inlined_call_operand.hbm [shape: f32[1,1024], index: 2, kind: input, shape index: {}]   ;;  %s8363_s3 = inlined_call_operand.hbm [shape: bf16[1024,512], index: 3, kind: input, shape index: {}]   ;;  %s8364_s4 = inlined_call_operand.hbm [shape: f32[1,512], index: 4, kind: input, shape index: {}]   ;;  %s8365_s5 = inlined_call_operand.hbm [shape: bf16[512,256], index: 5, kind: input, shape index: {}]   ;;  %s8366_s6 = inlined_call_operand.hbm [shape: f32[1,256], index: 6, kind: input, shape index: {}]   ;;  %s8367_s7 = inlined_call_operand.hbm [shape: bf16[256,128], index: 7, kind: input, shape index: {}]   ;;  %s8368_s8 = inlined_call_operand.hbm [shape: f32[1,128], index: 8, kind: input, shape index: {}]   ;;  %s8369_s9 = inlined_call_operand.vmem [shape: f32[32,128], index: 9, kind: output, shape index: {}]  }
   0x1   :  { %15 = vsyncpa [#allocation5], 0 }
   0x2   :  { %16 = vsyncpa [#allocation8], 0 }
   0x3   :  { %17 = vsyncpa [#allocation11], 0 }
   0x4   :  { %18 = vsyncpa [#allocation14], 0  ;;  %s8050_s30 = smov 0  }
   0x5 LB: > { %s7983_s10 = smov [#allocation4]   ;;  %s6361_s12 = sadd.s32 4294967295, %s7981_s30   ;;  %s7981_s30 = sphi %s8050_s30, %s24_s30  }
   0x6   : > { %s275_s11 = sshll.u32 %s7983_s10, 4  ;;  %p6363_p0 = scmp.ge.s32.totalorder %s7981_s30, 1  ;;  %s276_s11 = int_to_ptr.vmem [resolvable:$true] %s275_s11 }
   0x7   : > { %p249_p1 = scmp.lt.s32.totalorder %s7981_s30, 3  ;;  %p8060_p2 = scmp.eq.s32.totalorder %s6361_s12, 0 }
   0x8   : > { %s7984_s15 = smov [#allocation7]   ;;  %s7985_s17 = smov [#allocation10]  }
   0x9   : > { %s8373_s13 = scalar_select %p8060_p2, 1, 0 }
   0xa   : > { %p8064_p3 = pnand %p6363_p0, %p249_p1  ;;  %s299_s16 = sshll.u32 %s7984_s15, 4  ;;  %s300_s16 = int_to_ptr.vmem [resolvable:$true] %s299_s16 }
   0xb   : > { %s323_s18 = sshll.u32 %s7985_s17, 4  ;;  %s7986_s20 = smov [#allocation2]   ;;  %s8076_s18 = int_to_ptr.vmem [resolvable:$true] %s323_s18 }
   0xc   : > { %s8374_s14 = scalar_select %p8064_p3, 1, 0 }
   0xd   : > { %p7176_p4 = pneg %p8064_p3  ;;  %s261_s21 = sshll.u32 %s7986_s20, 4  ;;  %s8078_s21 = int_to_ptr.vmem [resolvable:$true] %s261_s21 }
   0xe   : > { %s7758_s23 = scalar_lea.vmem %s276_s11, 128  ;;  %p7766_p10 = scmp.lt.s32.totalorder %s276_s11, %s276_s11 }
   0xf   : > { %p8072_p5 = pnand %p8060_p2, %p7176_p4  ;;  %p7759_p7 = scmp.ne.s32.totalorder %s276_s11, %s7758_s23 }
  0x10   : > { %p7767_p11 = scmp.lt.s32.totalorder %s7758_s23, %s7758_s23 }
  0x11   : > { %p8082_p6 = pneg %p8072_p5 }
  0x12   : > { %p7768_p12 = por %p7767_p11, %p7766_p10 }
  0x13   : > { %p7761_p8 = pnand %p7759_p7, %p8082_p6 }
  0x15   : > { %p7762_p9 = pneg %p7761_p8 }
  0x17   : > { %p7769_p13 = pnand %p7768_p12, %p7762_p9 }
  0x19   : > { %7772 = shalt.err (!%p7769_p13)
}
  0x1a   : > { %7182 = dma.hbm_to_vmem [thread:$0]  (!%p8072_p5), %s8362_s2, 128, %s276_s11, [#allocation5]  }
  0x1b   : > { %s7784_s26 = scalar_lea.vmem %s300_s16, 64  ;;  %p7792_p2 = scmp.lt.s32.totalorder %s300_s16, %s300_s16 }
  0x1c   : > { %p7785_p0 = scmp.ne.s32.totalorder %s300_s16, %s7784_s26  ;;  %p7793_p7 = scmp.lt.s32.totalorder %s7784_s26, %s7784_s26 }
  0x1e   : > { %p7787_p1 = pnand %p7785_p0, %p8082_p6  ;;  %p7794_p8 = por %p7793_p7, %p7792_p2 }
  0x20   : > { %p7788_p4 = pneg %p7787_p1 }
  0x22   : > { %p7795_p3 = pnand %p7794_p8, %p7788_p4 }
  0x24   : > { %7798 = shalt.err (!%p7795_p3)
}
  0x25   : > { %7188 = dma.hbm_to_vmem [thread:$0]  (!%p8072_p5), %s8364_s4, 64, %s300_s16, [#allocation8]  }
  0x26   : > { %s7810_s29 = scalar_lea.vmem %s8076_s18, 32  ;;  %p7818_p12 = scmp.lt.s32.totalorder %s8076_s18, %s8076_s18 }
  0x27   : > { %p7811_p9 = scmp.ne.s32.totalorder %s8076_s18, %s7810_s29  ;;  %p7819_p2 = scmp.lt.s32.totalorder %s7810_s29, %s7810_s29 }
  0x29   : > { %p7813_p10 = pnand %p7811_p9, %p8082_p6  ;;  %p7820_p13 = por %p7819_p2, %p7818_p12 }
  0x2b   : > { %p7814_p11 = pneg %p7813_p10 }
  0x2d   : > { %p7821_p3 = pnand %p7820_p13, %p7814_p11 }
  0x2f   : > { %7824 = shalt.err (!%p7821_p3)
}
  0x30   : > { %7194 = dma.hbm_to_vmem [thread:$0]  (!%p8072_p5), %s8366_s6, 32, %s8076_s18, [#allocation11]  }
  0x31   : > { %s7836_s15 = scalar_lea.vmem %s8078_s21, 50176  ;;  %p7844_p7 = scmp.lt.s32.totalorder %s8078_s21, %s8078_s21 }
  0x32   : > { %p7837_p0 = scmp.ne.s32.totalorder %s8078_s21, %s7836_s15  ;;  %p7845_p8 = scmp.lt.s32.totalorder %s7836_s15, %s7836_s15 }
  0x34   : > { %p7839_p1 = pnand %p7837_p0, %p8082_p6  ;;  %p7846_p9 = por %p7845_p8, %p7844_p7 }
  0x36   : > { %p7840_p4 = pneg %p7839_p1 }
  0x38   : > { %p7847_p10 = pnand %p7846_p9, %p7840_p4 }
  0x3a   : > { %7850 = shalt.err (!%p7847_p10)
}
  0x3b   : > { %s7987_s16 = smov 512   ;;  %s7988_s17 = smov 32  }
  0x3c   : > { %7179 = dma.hbm_to_vmem [thread:$0]  (!%p8072_p5), %s8361_s1, 50176, %s8078_s21, [#allocation3], %s7987_s16, %s7987_s16, %s7988_s17  }
  0x3d   : > { %s7989_s18 = smov [#allocation6]  }
  0x3e   : > { %s285_s24 = sshll.u32 %s7989_s18, 4  ;;  %s286_s24 = int_to_ptr.vmem [resolvable:$true] %s285_s24 }
  0x3f   : > { %s7862_s25 = scalar_lea.vmem %s286_s24, 32768  ;;  %p7870_p13 = scmp.lt.s32.totalorder %s286_s24, %s286_s24 }
  0x40   : > { %p7863_p11 = scmp.ne.s32.totalorder %s286_s24, %s7862_s25  ;;  %p7871_p3 = scmp.lt.s32.totalorder %s7862_s25, %s7862_s25 }
  0x42   : > { %p7865_p12 = pnand %p7863_p11, %p8082_p6  ;;  %p7872_p0 = por %p7871_p3, %p7870_p13 }
  0x44   : > { %p7866_p2 = pneg %p7865_p12 }
  0x46   : > { %p7873_p1 = pnand %p7872_p0, %p7866_p2 }
  0x48   : > { %7876 = shalt.err (!%p7873_p1)
}
  0x49   : > { %s7990_s26 = smov 256   ;;  %s7991_s27 = smov 16  }
  0x4a   : > { %7185 = dma.hbm_to_vmem [thread:$0]  (!%p8072_p5), %s8363_s3, 32768, %s286_s24, [#allocation5], %s7990_s26, %s7990_s26, %s7991_s27  }
  0x4b   : > { %s7992_s29 = smov [#allocation9]  }
  0x4c   : > { %s309_s10 = sshll.u32 %s7992_s29, 4  ;;  %s310_s10 = int_to_ptr.vmem [resolvable:$true] %s309_s10 }
  0x4d   : > { %s7888_s11 = scalar_lea.vmem %s310_s10, 8192  ;;  %p7896_p9 = scmp.lt.s32.totalorder %s310_s10, %s310_s10 }
  0x4e   : > { %p7889_p4 = scmp.ne.s32.totalorder %s310_s10, %s7888_s11  ;;  %p7897_p10 = scmp.lt.s32.totalorder %s7888_s11, %s7888_s11 }
  0x50   : > { %p7891_p7 = pnand %p7889_p4, %p8082_p6  ;;  %p7898_p11 = por %p7897_p10, %p7896_p9 }
  0x52   : > { %p7892_p8 = pneg %p7891_p7 }
  0x54   : > { %p7899_p12 = pnand %p7898_p11, %p7892_p8 }
  0x56   : > { %7902 = shalt.err (!%p7899_p12)
}
  0x57   : > { %s7993_s15 = smov 128   ;;  %s7994_s16 = smov 8  }
  0x58   : > { %7191 = dma.hbm_to_vmem [thread:$0]  (!%p8072_p5), %s8365_s5, 8192, %s310_s10, [#allocation8], %s7993_s15, %s7993_s15, %s7994_s16  }
  0x59   : > { %s7995_s23 = smov [#allocation12]  }
  0x5a   : > { %s333_s18 = sshll.u32 %s7995_s23, 4  ;;  %s334_s18 = int_to_ptr.vmem [resolvable:$true] %s333_s18 }
  0x5b   : > { %s7914_s24 = scalar_lea.vmem %s334_s18, 2048  ;;  %p7922_p0 = scmp.lt.s32.totalorder %s334_s18, %s334_s18 }
  0x5c   : > { %p7915_p2 = scmp.ne.s32.totalorder %s334_s18, %s7914_s24  ;;  %p7923_p1 = scmp.lt.s32.totalorder %s7914_s24, %s7914_s24 }
  0x5e   : > { %p7917_p13 = pnand %p7915_p2, %p8082_p6  ;;  %p7924_p4 = por %p7923_p1, %p7922_p0 }
  0x60   : > { %p7918_p3 = pneg %p7917_p13 }
  0x62   : > { %p7925_p7 = pnand %p7924_p4, %p7918_p3 }
  0x64   : > { %7928 = shalt.err (!%p7925_p7)
}
  0x65   : > { %s7996_s25 = smov 64   ;;  %s7997_s26 = smov 4  }
  0x66   : > { %7197 = dma.hbm_to_vmem [thread:$0]  (!%p8072_p5), %s8367_s7, 2048, %s334_s18, [#allocation11], %s7996_s25, %s7996_s25, %s7997_s26  }
  0x67   : > { %s7998_s21 = smov [#allocation13]  }
  0x68   : > { %s347_s29 = sshll.u32 %s7998_s21, 4  ;;  %s348_s29 = int_to_ptr.vmem [resolvable:$true] %s347_s29 }
  0x69   : > { %s7940_s10 = scalar_lea.vmem %s348_s29, 16  ;;  %s7947_s11 = scalar_lea.vmem %s348_s29, 32 }
  0x6a   : > { %p7941_p8 = scmp.ne.s32.totalorder %s348_s29, %s7940_s10  ;;  %p7948_p11 = scmp.lt.s32.totalorder %s348_s29, %s348_s29 }
  0x6b   : > { %p7949_p12 = scmp.lt.s32.totalorder %s7947_s11, %s7940_s10 }
  0x6c   : > { %p7943_p9 = pnand %p7941_p8, %p8082_p6 }
  0x6d   : > { %p7950_p2 = por %p7949_p12, %p7948_p11 }
  0x6e   : > { %p7944_p10 = pneg %p7943_p9 }
  0x70   : > { %p7951_p13 = pnand %p7950_p2, %p7944_p10 }
  0x72   : > { %7954 = shalt.err (!%p7951_p13)
}
  0x73   : > { %7200 = dma.hbm_to_vmem [thread:$0]  (!%p8072_p5), %s8368_s8, 16, %s348_s29, [#allocation14]  }
  0x74   : > { %p8377_p3 = scmp.ne.s32.totalorder %s8374_s14, 0 }
  0x75   : > { %p8378_p0 = scmp.ne.s32.totalorder (!%p8377_p3), %s8373_s13, 0 }
  0x76   : > { %370 = sbr.rel (%p8377_p3) target bundleno = 1542 (0x606), region = 56 }
  0x7b   : > { %7960 = dma.done.wait (%p8378_p0), [#allocation3], 50176  }
  0x7c   : > { %7962 = vsyncadd (%p8378_p0), [#allocation3], 4294917120 }
  0x7d   : > { %7964 = dma.done.wait (%p8378_p0), [#allocation5], 32896  }
  0x7e   : > { %7966 = vsyncadd (%p8378_p0), [#allocation5], 4294934400 }
  0x7f   : > { %7968 = dma.done.wait (%p8378_p0), [#allocation8], 8256  }
  0x80   : > { %7970 = vsyncadd (%p8378_p0), [#allocation8], 4294959040 }
  0x81   : > { %7972 = dma.done.wait (%p8378_p0), [#allocation11], 2080  }
  0x82   : > { %7974 = vsyncadd (%p8378_p0), [#allocation11], 4294965216 }
  0x83   : > { %7976 = dma.done.wait (%p8378_p0), [#allocation14], 16  }
  0x84   : > { %7978 = vsyncadd (%p8378_p0), [#allocation14], 4294967280  ;;  %v526_v0 = vld [vmem:[#allocation2 + $0x1c0] sm:$0xff]  ;;  %s6382_s13 = sshll.u32 %s6361_s12, 1  ;;  %vm2864_vm0 = vcmask 130048  }
  0x85   : > { %v530_v1 = vld [vmem:[#allocation2 + $0x1e0] sm:$0xff]  ;;  %p436_p5 = scmp.lt.s32.totalorder %s6382_s13, 3 }
  0x86   : > { %v654_v2 = vld [vmem:[#allocation2 + $0x5c0] sm:$0xff]  ;;  %v6443_v3 = vcombine.high %v526_v0, %v530_v1  ;;  %v6442_v5 = vcombine.low %v526_v0, %v530_v1 }
  0x87   : > { %v658_v4 = vld [vmem:[#allocation2 + $0x5e0] sm:$0xff]  ;;  %s8380_s13 = smov (!%p436_p5, %s6382_s13), 3 }
  0x88   : > { %v518_v6 = vld [vmem:[#allocation2 + $0x180] sm:$0xff]  ;;  %v6571_v8 = vcombine.high %v654_v2, %v658_v4  ;;  %v6570_v9 = vcombine.low %v654_v2, %v658_v4  ;;  %2868 = vmatprep.subr.bf16.mxu0 %v6443_v3  ;;  %s7143_s12 = smul.u32 56, %s8380_s13  ;;  %s6385_s17 = sshll.u32 %s8380_s13, 3 }
  0x89   : > { %v522_v7 = vld [vmem:[#allocation2 + $0x1a0] sm:$0xff]  ;;  %2869 = vmatpush1.bf16.msra.mxu0 %v6442_v5  ;;  %s446_s18 = scalar_lea.vmem %s8369_s9, %s6385_s17 }
  0x8a   : > { %v6435_v10 = vcombine.high %v518_v6, %v522_v7  ;;  %v646_v11 = vld [vmem:[#allocation2 + $0x580] sm:$0xff]  ;;  %2911 = vmatprep.subr.bf16.mxu1 %v6571_v8  ;;  %v6434_v18 = vcombine.low %v518_v6, %v522_v7  ;;  %s8182_s22 = scalar_lea.vmem %s8360_s0, %s7143_s12 }
  0x8b   : > { %v650_v12 = vld [vmem:[#allocation2 + $0x5a0] sm:$0xff]  ;;  %2912 = vmatpush1.bf16.msra.mxu1 %v6570_v9  ;;  %v450_v54 = vld [vmem:[%s8182_s22 + $0x8] sm:$0xff]  ;;  %v452_v59 = vld [vmem:[%s8182_s22 + $0x18] sm:$0xff] }
  0x8c   : > { %v510_v13 = vld [vmem:[#allocation2 + $0x140] sm:$0xff]  ;;  %v6563_v14 = vcombine.high %v646_v11, %v650_v12  ;;  %2870 = vmatprep.subr.bf16.mxu0 %v6435_v10  ;;  %v6562_v19 = vcombine.low %v646_v11, %v650_v12  ;;  %v459_v60 = vld [vmem:[%s8182_s22 + $0x50] sm:$0xff] }
  0x8d   : > { %v514_v15 = vld [vmem:[#allocation2 + $0x160] sm:$0xff]  ;;  %2871 = vmatpush1.bf16.msra.mxu0 %v6434_v18  ;;  %v8190_v63 = vpack.c.bf16 %v459_v60, %v452_v59 }
  0x8e   : > { %v638_v16 = vld [vmem:[#allocation2 + $0x540] sm:$0xff]  ;;  %v6427_v20 = vcombine.high %v510_v13, %v514_v15  ;;  %2913 = vmatprep.subr.bf16.mxu1 %v6563_v14  ;;  %v6426_v26 = vcombine.low %v510_v13, %v514_v15 }
  0x8f   : > { %v642_v17 = vld [vmem:[#allocation2 + $0x560] sm:$0xff]  ;;  %2914 = vmatpush1.bf16.msra.mxu1 %v6562_v19  ;;  %2943 = vmatprep.mubr.bf16.mxu1 %v8190_v63 }
  0x90   : > { %v6555_v21 = vcombine.high %v638_v16, %v642_v17  ;;  %v502_v22 = vld [vmem:[#allocation2 + $0x100] sm:$0xff]  ;;  %2872 = vmatprep.subr.bf16.mxu0 %v6427_v20  ;;  %v6554_v27 = vcombine.low %v638_v16, %v642_v17 }
  0x91   : > { %v506_v23 = vld [vmem:[#allocation2 + $0x120] sm:$0xff]  ;;  %2873 = vmatpush1.bf16.msra.mxu0 %v6426_v26 }
  0x92   : > { %v630_v24 = vld [vmem:[#allocation2 + $0x500] sm:$0xff]  ;;  %v6419_v28 = vcombine.high %v502_v22, %v506_v23  ;;  %2915 = vmatprep.subr.bf16.mxu1 %v6555_v21  ;;  %v6418_v34 = vcombine.low %v502_v22, %v506_v23 }
  0x93   : > { %v634_v25 = vld [vmem:[#allocation2 + $0x520] sm:$0xff]  ;;  %2916 = vmatpush1.bf16.msra.mxu1 %v6554_v27 }
  0x94   : > { %v6547_v29 = vcombine.high %v630_v24, %v634_v25  ;;  %v494_v30 = vld [vmem:[#allocation2 + $0xc0] sm:$0xff]  ;;  %2874 = vmatprep.subr.bf16.mxu0 %v6419_v28  ;;  %v6546_v35 = vcombine.low %v630_v24, %v634_v25 }
  0x95   : > { %v498_v31 = vld [vmem:[#allocation2 + $0xe0] sm:$0xff]  ;;  %2875 = vmatpush1.bf16.msra.mxu0 %v6418_v34 }
  0x96   : > { %v622_v32 = vld [vmem:[#allocation2 + $0x4c0] sm:$0xff]  ;;  %v6411_v36 = vcombine.high %v494_v30, %v498_v31  ;;  %2917 = vmatprep.subr.bf16.mxu1 %v6547_v29  ;;  %v6410_v42 = vcombine.low %v494_v30, %v498_v31 }
  0x97   : > { %v626_v33 = vld [vmem:[#allocation2 + $0x4e0] sm:$0xff]  ;;  %2918 = vmatpush1.bf16.msra.mxu1 %v6546_v35 }
  0x98   : > { %v6539_v37 = vcombine.high %v622_v32, %v626_v33  ;;  %v486_v38 = vld [vmem:[#allocation2 + $0x80] sm:$0xff]  ;;  %2876 = vmatprep.subr.bf16.mxu0 %v6411_v36  ;;  %v6538_v43 = vcombine.low %v622_v32, %v626_v33 }
  0x99   : > { %v490_v39 = vld [vmem:[#allocation2 + $0xa0] sm:$0xff]  ;;  %2877 = vmatpush1.bf16.msra.mxu0 %v6410_v42 }
  0x9a   : > { %v614_v40 = vld [vmem:[#allocation2 + $0x480] sm:$0xff]  ;;  %v6403_v44 = vcombine.high %v486_v38, %v490_v39  ;;  %2919 = vmatprep.subr.bf16.mxu1 %v6539_v37  ;;  %v6402_v50 = vcombine.low %v486_v38, %v490_v39 }
  0x9b   : > { %v618_v41 = vld [vmem:[#allocation2 + $0x4a0] sm:$0xff]  ;;  %2920 = vmatpush1.bf16.msra.mxu1 %v6538_v43 }
  0x9c   : > { %v6531_v45 = vcombine.high %v614_v40, %v618_v41  ;;  %v478_v46 = vld [vmem:[#allocation2 + $0x40] sm:$0xff]  ;;  %2878 = vmatprep.subr.bf16.mxu0 %v6403_v44  ;;  %v6530_v51 = vcombine.low %v614_v40, %v618_v41 }
  0x9d   : > { %v482_v47 = vld [vmem:[#allocation2 + $0x60] sm:$0xff]  ;;  %2879 = vmatpush1.bf16.msra.mxu0 %v6402_v50 }
  0x9e   : > { %v606_v48 = vld [vmem:[#allocation2 + $0x440] sm:$0xff]  ;;  %v6395_v52 = vcombine.high %v478_v46, %v482_v47  ;;  %2921 = vmatprep.subr.bf16.mxu1 %v6531_v45  ;;  %v6394_v0 = vcombine.low %v478_v46, %v482_v47 }
  0x9f   : > { %v610_v49 = vld [vmem:[#allocation2 + $0x460] sm:$0xff]  ;;  %2922 = vmatpush1.bf16.msra.mxu1 %v6530_v51 }
  0xa0   : > { %v470_v53 = vld [vmem:[#allocation2] sm:$0xff]  ;;  %v6523_v56 = vcombine.high %v606_v48, %v610_v49  ;;  %2880 = vmatprep.subr.bf16.mxu0 %v6395_v52  ;;  %v6522_v1 = vcombine.low %v606_v48, %v610_v49 }
  0xa1   : > { %v457_v55 = vld [vmem:[%s8182_s22 + $0x40] sm:$0xff]  ;;  %2881 = vmatpush1.bf16.msra.mxu0 %v6394_v0 }
  0xa2   : > { %v474_v57 = vld [vmem:[#allocation2 + $0x20] sm:$0xff]  ;;  %v8186_v58 = vpack.c.bf16 %v457_v55, %v450_v54  ;;  %2923 = vmatprep.subr.bf16.mxu1 %v6523_v56 }
  0xa3   : > { %v598_v61 = vld [vmem:[#allocation2 + $0x400] sm:$0xff]  ;;  %v6387_v2 = vcombine.high %v470_v53, %v474_v57  ;;  %v6386_v8 = vcombine.low %v470_v53, %v474_v57  ;;  %2924 = vmatpush1.bf16.msra.mxu1 %v6522_v1 }
  0xa4   : > { %v602_v62 = vld [vmem:[#allocation2 + $0x420] sm:$0xff]  ;;  %2900 = vmatprep.mubr.bf16.mxu0 %v8186_v58 }
  0xa5   : > { %v6515_v3 = vcombine.high %v598_v61, %v602_v62  ;;  %v590_v4 = vld [vmem:[#allocation2 + $0x3c0] sm:$0xff]  ;;  %2882 = vmatprep.subr.bf16.mxu0 %v6387_v2  ;;  %v6514_v9 = vcombine.low %v598_v61, %v602_v62 }
  0xa6   : > { %v594_v5 = vld [vmem:[#allocation2 + $0x3e0] sm:$0xff]  ;;  %2883 = vmatpush1.bf16.msra.mxu0 %v6386_v8 }
  0xa7   : > { %v718_v6 = vld [vmem:[#allocation2 + $0x7c0] sm:$0xff]  ;;  %v6507_v10 = vcombine.high %v590_v4, %v594_v5  ;;  %2925 = vmatprep.subr.bf16.mxu1 %v6515_v3  ;;  %v6506_v16 = vcombine.low %v590_v4, %v594_v5 }
  0xa8   : > { %v722_v7 = vld [vmem:[#allocation2 + $0x7e0] sm:$0xff]  ;;  %2926 = vmatpush1.bf16.msra.mxu1 %v6514_v9 }
  0xa9   : > { %v6635_v11 = vcombine.high %v718_v6, %v722_v7  ;;  %v582_v12 = vld [vmem:[#allocation2 + $0x380] sm:$0xff]  ;;  %2884 = vmatprep.subr.bf16.mxu0 %v6507_v10  ;;  %v6634_v17 = vcombine.low %v718_v6, %v722_v7 }
  0xaa   : > { %v586_v13 = vld [vmem:[#allocation2 + $0x3a0] sm:$0xff]  ;;  %2885 = vmatpush2.bf16.msra.mxu0 %v6506_v16 }
  0xab   : > { %v710_v14 = vld [vmem:[#allocation2 + $0x780] sm:$0xff]  ;;  %v6499_v18 = vcombine.high %v582_v12, %v586_v13  ;;  %2927 = vmatprep.subr.bf16.mxu1 %v6635_v11  ;;  %v6498_v24 = vcombine.low %v582_v12, %v586_v13  ;;  %v456_v12 = vld [vmem:[%s8182_s22 + $0x38] sm:$0xff] }
  0xac   : > { %v714_v15 = vld [vmem:[#allocation2 + $0x7a0] sm:$0xff]  ;;  %2928 = vmatpush2.bf16.msra.mxu1 %v6634_v17 }
  0xad   : > { %v6627_v19 = vcombine.high %v710_v14, %v714_v15  ;;  %v574_v20 = vld [vmem:[#allocation2 + $0x340] sm:$0xff]  ;;  %2886 = vmatprep.subr.bf16.mxu0 %v6499_v18  ;;  %v6626_v25 = vcombine.low %v710_v14, %v714_v15  ;;  %v451_v14 = vld [vmem:[%s8182_s22 + $0x10] sm:$0xff]  ;;  %v458_v15 = vld [vmem:[%s8182_s22 + $0x48] sm:$0xff] }
  0xae   : > { %v578_v21 = vld [vmem:[#allocation2 + $0x360] sm:$0xff]  ;;  %2887 = vmatpush2.bf16.msra.mxu0 %v6498_v24 }
  0xaf   : > { %v702_v22 = vld [vmem:[#allocation2 + $0x740] sm:$0xff]  ;;  %v6491_v26 = vcombine.high %v574_v20, %v578_v21  ;;  %2929 = vmatprep.subr.bf16.mxu1 %v6627_v19  ;;  %v6490_v32 = vcombine.low %v574_v20, %v578_v21  ;;  %v527_v21 = vld [vmem:[#allocation2 + $0x1c8] sm:$0xff] }
  0xb0   : > { %v706_v23 = vld [vmem:[#allocation2 + $0x760] sm:$0xff]  ;;  %2930 = vmatpush2.bf16.msra.mxu1 %v6626_v25  ;;  %v454_v25 = vld [vmem:[%s8182_s22 + $0x28] sm:$0xff] }
  0xb1   : > { %v6619_v27 = vcombine.high %v702_v22, %v706_v23  ;;  %v566_v28 = vld [vmem:[#allocation2 + $0x300] sm:$0xff]  ;;  %2888 = vmatprep.subr.bf16.mxu0 %v6491_v26  ;;  %v6618_v33 = vcombine.low %v702_v22, %v706_v23  ;;  %v531_v22 = vld [vmem:[#allocation2 + $0x1e8] sm:$0xff]  ;;  %v8200_v23 = vpack.c.bf16 %v458_v15, %v451_v14 }
  0xb2   : > { %v570_v29 = vld [vmem:[#allocation2 + $0x320] sm:$0xff]  ;;  %2889 = vmatpush2.bf16.msra.mxu0 %v6490_v32 }
  0xb3   : > { %v694_v30 = vld [vmem:[#allocation2 + $0x700] sm:$0xff]  ;;  %v6483_v34 = vcombine.high %v566_v28, %v570_v29  ;;  %2931 = vmatprep.subr.bf16.mxu1 %v6619_v27  ;;  %v6482_v40 = vcombine.low %v566_v28, %v570_v29  ;;  %v6445_v29 = vcombine.high %v527_v21, %v531_v22 }
  0xb4   : > { %v698_v31 = vld [vmem:[#allocation2 + $0x720] sm:$0xff]  ;;  %2932 = vmatpush2.bf16.msra.mxu1 %v6618_v33 }
  0xb5   : > { %v6611_v35 = vcombine.high %v694_v30, %v698_v31  ;;  %v558_v36 = vld [vmem:[#allocation2 + $0x2c0] sm:$0xff]  ;;  %2890 = vmatprep.subr.bf16.mxu0 %v6483_v34  ;;  %v6610_v41 = vcombine.low %v694_v30, %v698_v31  ;;  %v455_v34 = vld [vmem:[%s8182_s22 + $0x30] sm:$0xff] }
  0xb6   : > { %v562_v37 = vld [vmem:[#allocation2 + $0x2e0] sm:$0xff]  ;;  %2891 = vmatpush2.bf16.msra.mxu0 %v6482_v40 }
  0xb7   : > { %v686_v38 = vld [vmem:[#allocation2 + $0x6c0] sm:$0xff]  ;;  %v6475_v42 = vcombine.high %v558_v36, %v562_v37  ;;  %2933 = vmatprep.subr.bf16.mxu1 %v6611_v35  ;;  %v6474_v48 = vcombine.low %v558_v36, %v562_v37  ;;  %v462_v36 = vld [vmem:[%s8182_s22 + $0x68] sm:$0xff] }
  0xb8   : > { %v690_v39 = vld [vmem:[#allocation2 + $0x6e0] sm:$0xff]  ;;  %2934 = vmatpush2.bf16.msra.mxu1 %v6610_v41  ;;  %v519_v37 = vld [vmem:[#allocation2 + $0x188] sm:$0xff] }
  0xb9   : > { %v6603_v43 = vcombine.high %v686_v38, %v690_v39  ;;  %v550_v44 = vld [vmem:[#allocation2 + $0x280] sm:$0xff]  ;;  %2892 = vmatprep.subr.bf16.mxu0 %v6475_v42  ;;  %v6602_v49 = vcombine.low %v686_v38, %v690_v39  ;;  %v523_v38 = vld [vmem:[#allocation2 + $0x1a8] sm:$0xff]  ;;  %v7999_v39 = vmov 0  }
  0xba   : > { %v554_v45 = vld [vmem:[#allocation2 + $0x2a0] sm:$0xff]  ;;  %2893 = vmatpush2.bf16.msra.mxu0 %v6474_v48  ;;  %v6437_v48 = vcombine.high %v519_v37, %v523_v38 }
  0xbb   : > { %v678_v46 = vld [vmem:[#allocation2 + $0x680] sm:$0xff]  ;;  %v6467_v50 = vcombine.high %v550_v44, %v554_v45  ;;  %2935 = vmatprep.subr.bf16.mxu1 %v6603_v43  ;;  %v6466_v56 = vcombine.low %v550_v44, %v554_v45  ;;  %v8212_v43 = vpack.c.bf16 %v462_v36, %v455_v34  ;;  %v6444_v44 = vcombine.low %v527_v21, %v531_v22  ;;  %v483_v21 = vld [vmem:[#allocation2 + $0x68] sm:$0xff] }
  0xbc   : > { %v682_v47 = vld [vmem:[#allocation2 + $0x6a0] sm:$0xff]  ;;  %2936 = vmatpush2.bf16.msra.mxu1 %v6602_v49 }
  0xbd   : > { %v6595_v51 = vcombine.high %v678_v46, %v682_v47  ;;  %v542_v52 = vld [vmem:[#allocation2 + $0x240] sm:$0xff]  ;;  %2894 = vmatprep.subr.bf16.mxu0 %v6467_v50  ;;  %v6594_v57 = vcombine.low %v678_v46, %v682_v47  ;;  %v511_v46 = vld [vmem:[#allocation2 + $0x148] sm:$0xff] }
  0xbe   : > { %v546_v53 = vld [vmem:[#allocation2 + $0x260] sm:$0xff]  ;;  %2895 = vmatpush2.bf16.msra.mxu0 %v6466_v56  ;;  %v515_v47 = vld [vmem:[#allocation2 + $0x168] sm:$0xff] }
  0xbf   : > { %v670_v54 = vld [vmem:[#allocation2 + $0x640] sm:$0xff]  ;;  %v6459_v59 = vcombine.high %v542_v52, %v546_v53  ;;  %2937 = vmatprep.subr.bf16.mxu1 %v6595_v51  ;;  %v6458_v2 = vcombine.low %v542_v52, %v546_v53  ;;  %v6436_v52 = vcombine.low %v519_v37, %v523_v38  ;;  %v591_v38 = vld [vmem:[#allocation2 + $0x3c8] sm:$0xff] }
  0xc0   : > { %v674_v55 = vld [vmem:[#allocation2 + $0x660] sm:$0xff]  ;;  %2938 = vmatpush2.bf16.msra.mxu1 %v6594_v57 }
  0xc1   : > { %v6587_v60 = vcombine.high %v670_v54, %v674_v55  ;;  %v534_v61 = vld [vmem:[#allocation2 + $0x200] sm:$0xff]  ;;  %2896 = vmatprep.subr.bf16.mxu0 %v6459_v59  ;;  %v6586_v3 = vcombine.low %v670_v54, %v674_v55  ;;  %v503_v54 = vld [vmem:[#allocation2 + $0x108] sm:$0xff]  ;;  %v6429_v59 = vcombine.high %v511_v46, %v515_v47 }
  0xc2   : > { %v538_v62 = vld [vmem:[#allocation2 + $0x220] sm:$0xff]  ;;  %2897 = vmatpush2.bf16.msra.mxu0 %v6458_v2  ;;  %v507_v55 = vld [vmem:[#allocation2 + $0x128] sm:$0xff] }
  0xc3   : > { %v662_v0 = vld [vmem:[#allocation2 + $0x600] sm:$0xff]  ;;  %v6451_v4 = vcombine.high %v534_v61, %v538_v62  ;;  %2939 = vmatprep.subr.bf16.mxu1 %v6587_v60  ;;  %v6450_v10 = vcombine.low %v534_v61, %v538_v62  ;;  %v6421_v2 = vcombine.high %v503_v54, %v507_v55 }
  0xc4   : > { %v666_v1 = vld [vmem:[#allocation2 + $0x620] sm:$0xff]  ;;  %2940 = vmatpush2.bf16.msra.mxu1 %v6586_v3  ;;  %v495_v3 = vld [vmem:[#allocation2 + $0xc8] sm:$0xff] }
  0xc5   : > { %v6579_v5 = vcombine.high %v662_v0, %v666_v1  ;;  %v782_v6 = vld [vmem:[#allocation2 + $0x9c0] sm:$0xff]  ;;  %2898 = vmatprep.subr.bf16.mxu0 %v6451_v4  ;;  %v6578_v13 = vcombine.low %v662_v0, %v666_v1  ;;  %v6428_v0 = vcombine.low %v511_v46, %v515_v47  ;;  %v499_v4 = vld [vmem:[#allocation2 + $0xe8] sm:$0xff] }
  0xc6   : > { %v786_v7 = vld [vmem:[#allocation2 + $0x9e0] sm:$0xff]  ;;  %2899 = vmatpush2.bf16.msra.mxu0 %v6450_v10  ;;  %v6413_v10 = vcombine.high %v495_v3, %v499_v4  ;;  %v6412_v14 = vcombine.low %v495_v3, %v499_v4  ;;  %v571_v3 = vld [vmem:[#allocation2 + $0x328] sm:$0xff] }
  0xc7   : > { %v854_v8 = vld [vmem:[#allocation2 + $0xc00] sm:$0xff]  ;;  %v6699_v16 = vcombine.high %v782_v6, %v786_v7  ;;  %2941 = vmatprep.subr.bf16.mxu1 %v6579_v5  ;;  %v6698_v24 = vcombine.low %v782_v6, %v786_v7  ;;  %v6420_v6 = vcombine.low %v503_v54, %v507_v55 }
  0xc8   : > { %v858_v9 = vld [vmem:[#allocation2 + $0xc20] sm:$0xff]  ;;  %2942 = vmatpush2.bf16.msra.mxu1 %v6578_v13 }
  0xc9   : > { %v449_v11 = vld [vmem:[%s8182_s22] sm:$0xff]  ;;  %v6771_v17 = vcombine.high %v854_v8, %v858_v9  ;;  %2954 = vmatprep.subr.bf16.mxu0 %v6699_v16  ;;  %v6770_v27 = vcombine.low %v854_v8, %v858_v9 }
  0xca   : > { %v774_v18 = vld [vmem:[#allocation2 + $0x980] sm:$0xff]  ;;  %v8198_v20 = vpack.c.bf16 %v456_v12, %v449_v11  ;;  %v487_v11 = vld [vmem:[#allocation2 + $0x88] sm:$0xff] }
  0xcb   : > { %v778_v19 = vld [vmem:[#allocation2 + $0x9a0] sm:$0xff]  ;;  %3011 = vmatprep.subr.bf16.mxu1 %v6771_v17  ;;  %2944 = vmatmul.mubr.bf16.vlgmr.msra.gmra.mxu1 %v8200_v23  ;;  %v491_v12 = vld [vmem:[#allocation2 + $0xa8] sm:$0xff] }
  0xcc   : > { %v461_v26 = vld [vmem:[%s8182_s22 + $0x60] sm:$0xff]  ;;  %v6691_v28 = vcombine.high %v774_v18, %v778_v19  ;;  %2901 = vmatmul.mubr.bf16.vlgmr.msra.gmra.mxu0 %v8198_v20  ;;  %v6690_v33 = vcombine.low %v774_v18, %v778_v19  ;;  %3012 = vmatpush1.bf16.msra.mxu1 %v6770_v27  ;;  %v6405_v18 = vcombine.high %v487_v11, %v491_v12  ;;  %v479_v19 = vld [vmem:[#allocation2 + $0x48] sm:$0xff] }
  0xcd   : > { %v766_v30 = vld [vmem:[#allocation2 + $0x940] sm:$0xff]  ;;  %v8205_v32 = vpack.c.bf16 %v461_v26, %v454_v25  ;;  %2955 = vmatpush1.bf16.msra.mxu0 %v6698_v24  ;;  %3029 = vmatprep.mubr.bf16.mxu1 %v7999_v39  ;;  %v6404_v24 = vcombine.low %v487_v11, %v491_v12  ;;  %v563_v11 = vld [vmem:[#allocation2 + $0x2e8] sm:$0xff] }
  0xce   : > { %v770_v31 = vld [vmem:[#allocation2 + $0x960] sm:$0xff]  ;;  %2956 = vmatprep.subr.bf16.mxu0 %v6691_v28  ;;  %3040 = vmatprep.subr.bf16.mxu1 %v6445_v29  ;;  %v6397_v28 = vcombine.high %v479_v19, %v483_v21  ;;  %v471_v29 = vld [vmem:[#allocation2 + $0x8] sm:$0xff] }
  0xcf   : > { %v6683_v35 = vcombine.high %v766_v30, %v770_v31  ;;  %v758_v40 = vld [vmem:[#allocation2 + $0x900] sm:$0xff]  ;;  %2986 = vmatprep.mubr.bf16.mxu0 %v8205_v32  ;;  %v6682_v42 = vcombine.low %v766_v30, %v770_v31  ;;  %v475_v30 = vld [vmem:[#allocation2 + $0x28] sm:$0xff] }
  0xd0   : > { %v762_v41 = vld [vmem:[#allocation2 + $0x920] sm:$0xff]  ;;  %v6389_v37 = vcombine.high %v471_v29, %v475_v30 }
  0xd1   : > { %2957 = vmatpush1.bf16.msra.mxu0 %v6690_v33  ;;  %v6675_v45 = vcombine.high %v758_v40, %v762_v41  ;;  %v750_v49 = vld [vmem:[#allocation2 + $0x8c0] sm:$0xff]  ;;  %v6674_v51 = vcombine.low %v758_v40, %v762_v41  ;;  %v6396_v33 = vcombine.low %v479_v19, %v483_v21  ;;  %v595_v40 = vld [vmem:[#allocation2 + $0x3e8] sm:$0xff] }
  0xd2   : > { %2958 = vmatprep.subr.bf16.mxu0 %v6683_v35  ;;  %v754_v50 = vld [vmem:[#allocation2 + $0x8e0] sm:$0xff]  ;;  %v6509_v47 = vcombine.high %v591_v38, %v595_v40  ;;  %v555_v19 = vld [vmem:[#allocation2 + $0x2a8] sm:$0xff] }
  0xd3   : > { %6778 = vmatmul.mubr.msk.bf16.vlgmr.msra.gmra.mxu1 %vm2864_vm0, %v8212_v43  ;;  %v6667_v53 = vcombine.high %v750_v49, %v754_v50  ;;  %v742_v56 = vld [vmem:[#allocation2 + $0x880] sm:$0xff]  ;;  %v6666_v60 = vcombine.low %v750_v49, %v754_v50  ;;  %v587_v49 = vld [vmem:[#allocation2 + $0x3a8] sm:$0xff] }
  0xd4   : > { %3041 = vmatpush1.bf16.msra.mxu1 %v6444_v44  ;;  %v746_v57 = vld [vmem:[#allocation2 + $0x8a0] sm:$0xff]  ;;  %3072 = vmatprep.mubr.bf16.mxu1 %v8186_v58 }
  0xd5   : > { %2959 = vmatpush1.bf16.msra.mxu0 %v6682_v42  ;;  %3042 = vmatprep.subr.bf16.mxu1 %v6437_v48  ;;  %v734_v61 = vld [vmem:[#allocation2 + $0x840] sm:$0xff]  ;;  %v6659_v1 = vcombine.high %v742_v56, %v746_v57  ;;  %v6658_v5 = vcombine.low %v742_v56, %v746_v57  ;;  %v6388_v42 = vcombine.low %v471_v29, %v475_v30  ;;  %v583_v48 = vld [vmem:[#allocation2 + $0x388] sm:$0xff] }
  0xd6   : > { %2960 = vmatprep.subr.bf16.mxu0 %v6675_v45  ;;  %v738_v62 = vld [vmem:[#allocation2 + $0x860] sm:$0xff]  ;;  %v6501_v55 = vcombine.high %v583_v48, %v587_v49  ;;  %v575_v56 = vld [vmem:[#allocation2 + $0x348] sm:$0xff] }
  0xd7   : > { %v6651_v7 = vcombine.high %v734_v61, %v738_v62  ;;  %v726_v8 = vld [vmem:[#allocation2 + $0x800] sm:$0xff]  ;;  %v6650_v13 = vcombine.low %v734_v61, %v738_v62  ;;  %v579_v57 = vld [vmem:[#allocation2 + $0x368] sm:$0xff] }
  0xd8   : > { %3043 = vmatpush1.bf16.msra.mxu1 %v6436_v52  ;;  %v730_v9 = vld [vmem:[#allocation2 + $0x820] sm:$0xff] }
  0xd9   : > { %2961 = vmatpush1.bf16.msra.mxu0 %v6674_v51  ;;  %3044 = vmatprep.subr.bf16.mxu1 %v6429_v59  ;;  %v6643_v15 = vcombine.high %v726_v8, %v730_v9  ;;  %v846_v16 = vld [vmem:[#allocation2 + $0xbc0] sm:$0xff]  ;;  %v6642_v22 = vcombine.low %v726_v8, %v730_v9  ;;  %v6508_v51 = vcombine.low %v591_v38, %v595_v40 }
  0xda   : > { %2962 = vmatprep.subr.bf16.mxu0 %v6667_v53  ;;  %v850_v17 = vld [vmem:[#allocation2 + $0xbe0] sm:$0xff] }
  0xdb   : > { %v6763_v25 = vcombine.high %v846_v16, %v850_v17  ;;  %v838_v26 = vld [vmem:[#allocation2 + $0xb80] sm:$0xff]  ;;  %v6762_v31 = vcombine.low %v846_v16, %v850_v17 }
  0xdc   : > { %3045 = vmatpush1.bf16.msra.mxu1 %v6428_v0  ;;  %v842_v27 = vld [vmem:[#allocation2 + $0xba0] sm:$0xff] }
  0xdd   : > { %2963 = vmatpush1.bf16.msra.mxu0 %v6666_v60  ;;  %3046 = vmatprep.subr.bf16.mxu1 %v6421_v2  ;;  %v6755_v34 = vcombine.high %v838_v26, %v842_v27  ;;  %v830_v35 = vld [vmem:[#allocation2 + $0xb40] sm:$0xff]  ;;  %v6754_v41 = vcombine.low %v838_v26, %v842_v27  ;;  %v6500_v60 = vcombine.low %v583_v48, %v587_v49  ;;  %v567_v2 = vld [vmem:[#allocation2 + $0x308] sm:$0xff] }
  0xde   : > { %2964 = vmatprep.subr.bf16.mxu0 %v6659_v1  ;;  %v834_v36 = vld [vmem:[#allocation2 + $0xb60] sm:$0xff]  ;;  %v6493_v1 = vcombine.high %v575_v56, %v579_v57  ;;  %v6485_v9 = vcombine.high %v567_v2, %v571_v3  ;;  %v547_v26 = vld [vmem:[#allocation2 + $0x268] sm:$0xff] }
  0xdf   : > { %v6747_v44 = vcombine.high %v830_v35, %v834_v36  ;;  %v822_v45 = vld [vmem:[#allocation2 + $0xb00] sm:$0xff]  ;;  %v6746_v50 = vcombine.low %v830_v35, %v834_v36  ;;  %v655_v27 = vld [vmem:[#allocation2 + $0x5c8] sm:$0xff] }
  0xe0   : > { %3047 = vmatpush1.bf16.msra.mxu1 %v6420_v6  ;;  %v826_v46 = vld [vmem:[#allocation2 + $0xb20] sm:$0xff]  ;;  %v647_v36 = vld [vmem:[#allocation2 + $0x588] sm:$0xff] }
  0xe1   : > { %2965 = vmatpush1.bf16.msra.mxu0 %v6658_v5  ;;  %3048 = vmatprep.subr.bf16.mxu1 %v6413_v10  ;;  %v6739_v52 = vcombine.high %v822_v45, %v826_v46  ;;  %v814_v53 = vld [vmem:[#allocation2 + $0xac0] sm:$0xff]  ;;  %v6738_v59 = vcombine.low %v822_v45, %v826_v46  ;;  %v6492_v5 = vcombine.low %v575_v56, %v579_v57  ;;  %v559_v10 = vld [vmem:[#allocation2 + $0x2c8] sm:$0xff] }
  0xe2   : > { %2966 = vmatprep.subr.bf16.mxu0 %v6651_v7  ;;  %v818_v54 = vld [vmem:[#allocation2 + $0xae0] sm:$0xff]  ;;  %v6477_v17 = vcombine.high %v559_v10, %v563_v11  ;;  %v643_v48 = vld [vmem:[#allocation2 + $0x568] sm:$0xff] }
  0xe3   : > { %v6731_v61 = vcombine.high %v814_v53, %v818_v54  ;;  %v806_v62 = vld [vmem:[#allocation2 + $0xa80] sm:$0xff]  ;;  %v6730_v4 = vcombine.low %v814_v53, %v818_v54  ;;  %v635_v56 = vld [vmem:[#allocation2 + $0x528] sm:$0xff] }
  0xe4   : > { %3049 = vmatpush1.bf16.msra.mxu1 %v6412_v14  ;;  %v810_v0 = vld [vmem:[#allocation2 + $0xaa0] sm:$0xff] }
  0xe5   : > { %2967 = vmatpush1.bf16.msra.mxu0 %v6650_v13  ;;  %3050 = vmatprep.subr.bf16.mxu1 %v6405_v18  ;;  %v6723_v6 = vcombine.high %v806_v62, %v810_v0  ;;  %v798_v7 = vld [vmem:[#allocation2 + $0xa40] sm:$0xff]  ;;  %v6722_v12 = vcombine.low %v806_v62, %v810_v0  ;;  %v6484_v13 = vcombine.low %v567_v2, %v571_v3  ;;  %v551_v18 = vld [vmem:[#allocation2 + $0x288] sm:$0xff] }
  0xe6   : > { %2968 = vmatprep.subr.bf16.mxu0 %v6643_v15  ;;  %v802_v8 = vld [vmem:[#allocation2 + $0xa60] sm:$0xff]  ;;  %v6469_v29 = vcombine.high %v551_v18, %v555_v19  ;;  %v627_v2 = vld [vmem:[#allocation2 + $0x4e8] sm:$0xff] }
  0xe7   : > { %v6715_v14 = vcombine.high %v798_v7, %v802_v8  ;;  %v790_v15 = vld [vmem:[#allocation2 + $0xa00] sm:$0xff]  ;;  %v6714_v21 = vcombine.low %v798_v7, %v802_v8 }
  0xe8   : > { %3051 = vmatpush1.bf16.msra.mxu1 %v6404_v24  ;;  %v794_v16 = vld [vmem:[#allocation2 + $0xa20] sm:$0xff] }
  0xe9   : > { %2969 = vmatpush1.bf16.msra.mxu0 %v6642_v22  ;;  %3052 = vmatprep.subr.bf16.mxu1 %v6397_v28  ;;  %v6476_v22 = vcombine.low %v559_v10, %v563_v11  ;;  %v6707_v24 = vcombine.high %v790_v15, %v794_v16  ;;  %v659_v28 = vld [vmem:[#allocation2 + $0x5e8] sm:$0xff]  ;;  %v453_v30 = vld [vmem:[%s8182_s22 + $0x20] sm:$0xff] }
  0xea   : > { %2970 = vmatprep.subr.bf16.mxu0 %v6763_v25  ;;  %v543_v25 = vld [vmem:[#allocation2 + $0x248] sm:$0xff]  ;;  %v6573_v35 = vcombine.high %v655_v27, %v659_v28 }
  0xeb   : > { %v6461_v38 = vcombine.high %v543_v25, %v547_v26  ;;  %v6460_v45 = vcombine.low %v543_v25, %v547_v26  ;;  %v619_v10 = vld [vmem:[#allocation2 + $0x4a8] sm:$0xff] }
  0xec   : > { %3053 = vmatpush1.bf16.msra.mxu1 %v6396_v33  ;;  %v6706_v33 = vcombine.low %v790_v15, %v794_v16  ;;  %v607_v15 = vld [vmem:[#allocation2 + $0x448] sm:$0xff] }
  0xed   : > { %2971 = vmatpush2.bf16.msra.mxu0 %v6762_v31  ;;  %3054 = vmatprep.subr.bf16.mxu1 %v6389_v37  ;;  %v460_v31 = vld [vmem:[%s8182_s22 + $0x58] sm:$0xff]  ;;  %v651_v37 = vld [vmem:[#allocation2 + $0x5a8] sm:$0xff] }
  0xee   : > { %2972 = vmatprep.subr.bf16.mxu0 %v6755_v34  ;;  %v6468_v34 = vcombine.low %v551_v18, %v555_v19  ;;  %v8219_v40 = vpack.c.bf16 %v460_v31, %v453_v30  ;;  %v6565_v46 = vcombine.high %v647_v36, %v651_v37  ;;  %v611_v16 = vld [vmem:[#allocation2 + $0x468] sm:$0xff] }
  0xef   : > { %v6525_v26 = vcombine.high %v607_v15, %v611_v16  ;;  %v603_v30 = vld [vmem:[#allocation2 + $0x428] sm:$0xff] }
  0xf0   : > { %3055 = vmatpush1.bf16.msra.mxu1 %v6388_v42  ;;  %v539_v42 = vld [vmem:[#allocation2 + $0x228] sm:$0xff] }
  0xf1   : > { %2973 = vmatpush2.bf16.msra.mxu0 %v6754_v41  ;;  %3056 = vmatprep.subr.bf16.mxu1 %v6509_v47  ;;  %v535_v41 = vld [vmem:[#allocation2 + $0x208] sm:$0xff] }
  0xf2   : > { %2974 = vmatprep.subr.bf16.mxu0 %v6747_v44  ;;  %v6572_v44 = vcombine.low %v655_v27, %v659_v28  ;;  %v639_v47 = vld [vmem:[#allocation2 + $0x548] sm:$0xff]  ;;  %v6453_v49 = vcombine.high %v535_v41, %v539_v42  ;;  %v6452_v53 = vcombine.low %v535_v41, %v539_v42 }
  0xf3   : > { %v6557_v54 = vcombine.high %v639_v47, %v643_v48  ;;  %v743_v27 = vld [vmem:[#allocation2 + $0x888] sm:$0xff] }
  0xf4   : > { %3057 = vmatpush2.bf16.msra.mxu1 %v6508_v51  ;;  %v787_v51 = vld [vmem:[#allocation2 + $0x9e8] sm:$0xff] }
  0xf5   : > { %2975 = vmatpush2.bf16.msra.mxu0 %v6746_v50  ;;  %3058 = vmatprep.subr.bf16.mxu1 %v6501_v55  ;;  %v783_v50 = vld [vmem:[#allocation2 + $0x9c8] sm:$0xff] }
  0xf6   : > { %2976 = vmatprep.subr.bf16.mxu0 %v6739_v52  ;;  %v6564_v52 = vcombine.low %v647_v36, %v651_v37  ;;  %v631_v55 = vld [vmem:[#allocation2 + $0x508] sm:$0xff]  ;;  %v6701_v57 = vcombine.high %v783_v50, %v787_v51  ;;  %v6700_v62 = vcombine.low %v783_v50, %v787_v51 }
  0xf7   : > { %v6549_v0 = vcombine.high %v631_v55, %v635_v56  ;;  %v747_v28 = vld [vmem:[#allocation2 + $0x8a8] sm:$0xff] }
  0xf8   : > { %3059 = vmatpush2.bf16.msra.mxu1 %v6500_v60  ;;  %v779_v60 = vld [vmem:[#allocation2 + $0x9a8] sm:$0xff]  ;;  %v6661_v42 = vcombine.high %v743_v27, %v747_v28 }
  0xf9   : > { %2977 = vmatpush2.bf16.msra.mxu0 %v6738_v59  ;;  %3060 = vmatprep.subr.bf16.mxu1 %v6493_v1  ;;  %v775_v59 = vld [vmem:[#allocation2 + $0x988] sm:$0xff] }
  0xfa   : > { %2978 = vmatprep.subr.bf16.mxu0 %v6731_v61  ;;  %v6556_v61 = vcombine.low %v639_v47, %v643_v48  ;;  %v623_v1 = vld [vmem:[#allocation2 + $0x4c8] sm:$0xff]  ;;  %v6693_v3 = vcombine.high %v775_v59, %v779_v60  ;;  %v6692_v7 = vcombine.low %v775_v59, %v779_v60 }
  0xfb   : > { %v6541_v8 = vcombine.high %v623_v1, %v627_v2  ;;  %v739_v41 = vld [vmem:[#allocation2 + $0x868] sm:$0xff] }
  0xfc   : > { %3061 = vmatpush2.bf16.msra.mxu1 %v6492_v5  ;;  %v771_v5 = vld [vmem:[#allocation2 + $0x968] sm:$0xff] }
  0xfd   : > { %2979 = vmatpush2.bf16.msra.mxu0 %v6730_v4  ;;  %3062 = vmatprep.subr.bf16.mxu1 %v6485_v9  ;;  %v767_v4 = vld [vmem:[#allocation2 + $0x948] sm:$0xff] }
  0xfe   : > { %2980 = vmatprep.subr.bf16.mxu0 %v6723_v6  ;;  %v6548_v6 = vcombine.low %v631_v55, %v635_v56  ;;  %v615_v9 = vld [vmem:[#allocation2 + $0x488] sm:$0xff]  ;;  %v6685_v11 = vcombine.high %v767_v4, %v771_v5 }
  0xff   : > { %v6533_v18 = vcombine.high %v615_v9, %v619_v10  ;;  %v727_v47 = vld [vmem:[#allocation2 + $0x808] sm:$0xff] }
 0x100   : > { %3063 = vmatpush2.bf16.msra.mxu1 %v6484_v13  ;;  %v763_v13 = vld [vmem:[#allocation2 + $0x928] sm:$0xff] }
 0x101   : > { %2981 = vmatpush2.bf16.msra.mxu0 %v6722_v12  ;;  %3064 = vmatprep.subr.bf16.mxu1 %v6477_v17  ;;  %v759_v12 = vld [vmem:[#allocation2 + $0x908] sm:$0xff]  ;;  %v6684_v17 = vcombine.low %v767_v4, %v771_v5 }
 0x102   : > { %2982 = vmatprep.subr.bf16.mxu0 %v6715_v14  ;;  %v6540_v14 = vcombine.low %v623_v1, %v627_v2  ;;  %v6677_v19 = vcombine.high %v759_v12, %v763_v13  ;;  %v6676_v25 = vcombine.low %v759_v12, %v763_v13  ;;  %v731_v48 = vld [vmem:[#allocation2 + $0x828] sm:$0xff] }
 0x103   : > { %v715_v50 = vld [vmem:[#allocation2 + $0x7a8] sm:$0xff]  ;;  %v6645_v60 = vcombine.high %v727_v47, %v731_v48 }
 0x104   : > { %3065 = vmatpush2.bf16.msra.mxu1 %v6476_v22  ;;  %v755_v22 = vld [vmem:[#allocation2 + $0x8e8] sm:$0xff] }
 0x105   : > { %2983 = vmatpush2.bf16.msra.mxu0 %v6714_v21  ;;  %3066 = vmatprep.subr.bf16.mxu1 %v6469_v29  ;;  %v751_v21 = vld [vmem:[#allocation2 + $0x8c8] sm:$0xff] }
 0x106   : > { %2984 = vmatprep.subr.bf16.mxu0 %v6707_v24  ;;  %v6532_v24 = vcombine.low %v615_v9, %v619_v10  ;;  %v599_v29 = vld [vmem:[#allocation2 + $0x408] sm:$0xff]  ;;  %v6669_v31 = vcombine.high %v751_v21, %v755_v22  ;;  %v6668_v36 = vcombine.low %v751_v21, %v755_v22 }
 0x107   : > { %v6517_v37 = vcombine.high %v599_v29, %v603_v30  ;;  %v847_v55 = vld [vmem:[#allocation2 + $0xbc8] sm:$0xff] }
 0x108   : > { %3067 = vmatpush2.bf16.msra.mxu1 %v6468_v34  ;;  %v719_v34 = vld [vmem:[#allocation2 + $0x7c8] sm:$0xff] }
 0x109   : > { %2985 = vmatpush2.bf16.msra.mxu0 %v6706_v33  ;;  %3068 = vmatprep.subr.bf16.mxu1 %v6461_v38  ;;  %v6524_v33 = vcombine.low %v607_v15, %v611_v16  ;;  %v735_v38 = vld [vmem:[#allocation2 + $0x848] sm:$0xff] }
 0x10a   : > { %3083 = vmatprep.subr.bf16.mxu0 %v6573_v35  ;;  %v723_v35 = vld [vmem:[#allocation2 + $0x7e8] sm:$0xff]  ;;  %v6653_v51 = vcombine.high %v735_v38, %v739_v41 }
 0x10b   : > { %v851_v56 = vld [vmem:[#allocation2 + $0xbe8] sm:$0xff] }
 0x10c   : > { %2987 = vmatmul.mubr.bf16.vlgmr.msra.gmra.mxu0 %v8219_v40  ;;  %3069 = vmatpush2.bf16.msra.mxu1 %v6460_v45  ;;  %v6660_v45 = vcombine.low %v743_v27, %v747_v28  ;;  %v707_v59 = vld [vmem:[#allocation2 + $0x768] sm:$0xff]  ;;  %v6765_v5 = vcombine.high %v847_v55, %v851_v56 }
 0x10d   : > { %3084 = vmatpush1.bf16.msra.mxu0 %v6572_v44  ;;  %3115 = vmatprep.mubr.bf16.mxu0 %v8190_v63  ;;  %v6516_v44 = vcombine.low %v599_v29, %v603_v30  ;;  %v839_v1 = vld [vmem:[#allocation2 + $0xb88] sm:$0xff] }
 0x10e   : > { %3085 = vmatprep.subr.bf16.mxu0 %v6565_v46  ;;  %3070 = vmatprep.subr.bf16.mxu1 %v6453_v49  ;;  %v6637_v46 = vcombine.high %v719_v34, %v723_v35  ;;  %v711_v49 = vld [vmem:[#allocation2 + $0x788] sm:$0xff] }
 0x10f   : > { %v843_v2 = vld [vmem:[#allocation2 + $0xba8] sm:$0xff] }
 0x110   : > { %3071 = vmatpush2.bf16.msra.mxu1 %v6452_v53  ;;  %v6652_v53 = vcombine.low %v735_v38, %v739_v41  ;;  %v699_v4 = vld [vmem:[#allocation2 + $0x728] sm:$0xff]  ;;  %v6757_v13 = vcombine.high %v839_v1, %v843_v2  ;;  %v6756_v15 = vcombine.low %v839_v1, %v843_v2 }
 0x111   : > { %3086 = vmatpush1.bf16.msra.mxu0 %v6564_v52  ;;  %3126 = vmatprep.subr.bf16.mxu1 %v6701_v57  ;;  %v6636_v52 = vcombine.low %v719_v34, %v723_v35  ;;  %v703_v57 = vld [vmem:[#allocation2 + $0x748] sm:$0xff] }
 0x112   : > { %3087 = vmatprep.subr.bf16.mxu0 %v6557_v54  ;;  %v6629_v54 = vcombine.high %v711_v49, %v715_v50  ;;  %v831_v9 = vld [vmem:[#allocation2 + $0xb48] sm:$0xff] }
 0x113   : > { %3073 = vmatmul.mubr.bf16.vlgmr.msra.gmra.mxu1 %v8198_v20  ;;  %v835_v10 = vld [vmem:[#allocation2 + $0xb68] sm:$0xff] }
 0x114   : > { %3127 = vmatpush1.bf16.msra.mxu1 %v6700_v62  ;;  %3158 = vmatprep.mubr.bf16.mxu1 %v8205_v32  ;;  %v6644_v62 = vcombine.low %v727_v47, %v731_v48  ;;  %v691_v12 = vld [vmem:[#allocation2 + $0x6e8] sm:$0xff]  ;;  %v6749_v22 = vcombine.high %v831_v9, %v835_v10 }
 0x115   : > { %3088 = vmatpush1.bf16.msra.mxu0 %v6556_v61  ;;  %3128 = vmatprep.subr.bf16.mxu1 %v6693_v3  ;;  %v6628_v61 = vcombine.low %v711_v49, %v715_v50  ;;  %v695_v3 = vld [vmem:[#allocation2 + $0x708] sm:$0xff]  ;;  %v528_v49 = vld [vmem:[#allocation2 + $0x1d0] sm:$0xff] }
 0x116   : > { %3089 = vmatprep.subr.bf16.mxu0 %v6549_v0  ;;  %v6621_v0 = vcombine.high %v703_v57, %v707_v59  ;;  %v683_v21 = vld [vmem:[#allocation2 + $0x6a8] sm:$0xff]  ;;  %v532_v50 = vld [vmem:[#allocation2 + $0x1f0] sm:$0xff] }
 0x117   : > { %v815_v27 = vld [vmem:[#allocation2 + $0xac8] sm:$0xff] }
 0x118   : > { %3129 = vmatpush1.bf16.msra.mxu1 %v6692_v7  ;;  %v6764_v7 = vcombine.low %v847_v55, %v851_v56  ;;  %v819_v28 = vld [vmem:[#allocation2 + $0xae8] sm:$0xff] }
 0x119   : > { %3090 = vmatpush1.bf16.msra.mxu0 %v6548_v6  ;;  %3130 = vmatprep.subr.bf16.mxu1 %v6685_v11  ;;  %v6620_v6 = vcombine.low %v703_v57, %v707_v59  ;;  %v687_v11 = vld [vmem:[#allocation2 + $0x6c8] sm:$0xff]  ;;  %v520_v57 = vld [vmem:[#allocation2 + $0x190] sm:$0xff] }
 0x11a   : > { %3091 = vmatprep.subr.bf16.mxu0 %v6541_v8  ;;  %v6613_v8 = vcombine.high %v695_v3, %v699_v4  ;;  %v6605_v16 = vcombine.high %v687_v11, %v691_v12  ;;  %v671_v29 = vld [vmem:[#allocation2 + $0x648] sm:$0xff]  ;;  %v524_v59 = vld [vmem:[#allocation2 + $0x1b0] sm:$0xff] }
 0x11b   : > { %v675_v30 = vld [vmem:[#allocation2 + $0x668] sm:$0xff]  ;;  %v6439_v2 = vcombine.high %v520_v57, %v524_v59 }
 0x11c   : > { %3131 = vmatpush1.bf16.msra.mxu1 %v6684_v17  ;;  %v823_v17 = vld [vmem:[#allocation2 + $0xb08] sm:$0xff]  ;;  %v6589_v35 = vcombine.high %v671_v29, %v675_v30 }
 0x11d   : > { %3092 = vmatpush1.bf16.msra.mxu0 %v6540_v14  ;;  %3132 = vmatprep.subr.bf16.mxu1 %v6677_v19  ;;  %v6612_v14 = vcombine.low %v695_v3, %v699_v4  ;;  %v679_v19 = vld [vmem:[#allocation2 + $0x688] sm:$0xff] }
 0x11e   : > { %3093 = vmatprep.subr.bf16.mxu0 %v6533_v18  ;;  %v827_v18 = vld [vmem:[#allocation2 + $0xb28] sm:$0xff] }
 0x11f   : > { %v6740_v34 = vcombine.low %v823_v17, %v827_v18  ;;  %v663_v38 = vld [vmem:[#allocation2 + $0x608] sm:$0xff] }
 0x120   : > { %3133 = vmatpush1.bf16.msra.mxu1 %v6676_v25  ;;  %v6748_v25 = vcombine.low %v831_v9, %v835_v10  ;;  %v667_v41 = vld [vmem:[#allocation2 + $0x628] sm:$0xff] }
 0x121   : > { %3094 = vmatpush1.bf16.msra.mxu0 %v6532_v24  ;;  %3134 = vmatprep.subr.bf16.mxu1 %v6669_v31  ;;  %v6604_v24 = vcombine.low %v687_v11, %v691_v12  ;;  %v6741_v31 = vcombine.high %v823_v17, %v827_v18  ;;  %v799_v47 = vld [vmem:[#allocation2 + $0xa48] sm:$0xff]  ;;  %v656_v11 = vld [vmem:[#allocation2 + $0x5d0] sm:$0xff] }
 0x122   : > { %3095 = vmatprep.subr.bf16.mxu0 %v6525_v26  ;;  %v6597_v26 = vcombine.high %v679_v19, %v683_v21  ;;  %v803_v48 = vld [vmem:[#allocation2 + $0xa68] sm:$0xff]  ;;  %v660_v12 = vld [vmem:[#allocation2 + $0x5f0] sm:$0xff] }
 0x123   : > { %v791_v55 = vld [vmem:[#allocation2 + $0xa08] sm:$0xff]  ;;  %v6716_v1 = vcombine.low %v799_v47, %v803_v48  ;;  %v496_v17 = vld [vmem:[#allocation2 + $0xd0] sm:$0xff] }
 0x124   : > { %3135 = vmatpush1.bf16.msra.mxu1 %v6668_v36  ;;  %v807_v36 = vld [vmem:[#allocation2 + $0xa88] sm:$0xff]  ;;  %v500_v18 = vld [vmem:[#allocation2 + $0xf0] sm:$0xff] }
 0x125   : > { %3096 = vmatpush1.bf16.msra.mxu0 %v6524_v33  ;;  %3136 = vmatprep.subr.bf16.mxu1 %v6661_v42  ;;  %v6596_v33 = vcombine.low %v679_v19, %v683_v21  ;;  %v6733_v42 = vcombine.high %v815_v27, %v819_v28  ;;  %v795_v56 = vld [vmem:[#allocation2 + $0xa28] sm:$0xff]  ;;  %v6575_v19 = vcombine.high %v656_v11, %v660_v12 }
 0x126   : > { %3097 = vmatprep.subr.bf16.mxu0 %v6517_v37  ;;  %v811_v37 = vld [vmem:[#allocation2 + $0xaa8] sm:$0xff]  ;;  %v6708_v9 = vcombine.low %v791_v55, %v795_v56 }
 0x127   : > { %v855_v3 = vld [vmem:[#allocation2 + $0xc08] sm:$0xff] }
 0x128   : > { %3137 = vmatpush1.bf16.msra.mxu1 %v6660_v45  ;;  %v6732_v45 = vcombine.low %v815_v27, %v819_v28  ;;  %v859_v4 = vld [vmem:[#allocation2 + $0xc28] sm:$0xff]  ;;  %v492_v27 = vld [vmem:[#allocation2 + $0xb0] sm:$0xff]  ;;  %v6414_v28 = vcombine.low %v496_v17, %v500_v18 }
 0x129   : > { %3098 = vmatpush1.bf16.msra.mxu0 %v6516_v44  ;;  %3138 = vmatprep.subr.bf16.mxu1 %v6653_v51  ;;  %v6588_v44 = vcombine.low %v671_v29, %v675_v30  ;;  %v6725_v51 = vcombine.high %v807_v36, %v811_v37  ;;  %v6574_v29 = vcombine.low %v656_v11, %v660_v12 }
 0x12a   : > { %3099 = vmatprep.subr.bf16.mxu0 %v6637_v46  ;;  %v6581_v46 = vcombine.high %v663_v38, %v667_v41 }
 0x12c   : > { %3139 = vmatpush1.bf16.msra.mxu1 %v6652_v53  ;;  %v6724_v53 = vcombine.low %v807_v36, %v811_v37 }
 0x12d   : > { %3100 = vmatpush2.bf16.msra.mxu0 %v6636_v52  ;;  %3140 = vmatprep.subr.bf16.mxu1 %v6645_v60  ;;  %v6580_v52 = vcombine.low %v663_v38, %v667_v41  ;;  %v6717_v60 = vcombine.high %v799_v47, %v803_v48 }
 0x12e   : > { %3101 = vmatprep.subr.bf16.mxu0 %v6629_v54  ;;  %v6447_v54 = vcombine.high %v528_v49, %v532_v50 }
 0x130   : > { %3141 = vmatpush1.bf16.msra.mxu1 %v6644_v62  ;;  %v512_v62 = vld [vmem:[#allocation2 + $0x150] sm:$0xff] }
 0x131   : > { %3102 = vmatpush2.bf16.msra.mxu0 %v6628_v61  ;;  %3142 = vmatprep.subr.bf16.mxu1 %v6765_v5  ;;  %v6446_v61 = vcombine.low %v528_v49, %v532_v50  ;;  %v6709_v5 = vcombine.high %v791_v55, %v795_v56 }
 0x132   : > { %3103 = vmatprep.subr.bf16.mxu0 %v6621_v0  ;;  %v516_v0 = vld [vmem:[#allocation2 + $0x170] sm:$0xff] }
 0x133   : > { %v6431_v10 = vcombine.high %v512_v62, %v516_v0 }
 0x134   : > { %3143 = vmatpush2.bf16.msra.mxu1 %v6764_v7  ;;  %v504_v7 = vld [vmem:[#allocation2 + $0x110] sm:$0xff] }
 0x135   : > { %3104 = vmatpush2.bf16.msra.mxu0 %v6620_v6  ;;  %3144 = vmatprep.subr.bf16.mxu1 %v6757_v13  ;;  %v6438_v6 = vcombine.low %v520_v57, %v524_v59  ;;  %v6773_v13 = vcombine.high %v855_v3, %v859_v4 }
 0x136   : > { %3105 = vmatprep.subr.bf16.mxu0 %v6613_v8  ;;  %v508_v8 = vld [vmem:[#allocation2 + $0x130] sm:$0xff] }
 0x137   : > { %v6422_v21 = vcombine.low %v504_v7, %v508_v8 }
 0x138   : > { %3145 = vmatpush2.bf16.msra.mxu1 %v6756_v15  ;;  %v6772_v15 = vcombine.low %v855_v3, %v859_v4 }
 0x139   : > { %3106 = vmatpush2.bf16.msra.mxu0 %v6612_v14  ;;  %3146 = vmatprep.subr.bf16.mxu1 %v6749_v22  ;;  %v6430_v14 = vcombine.low %v512_v62, %v516_v0  ;;  %v6415_v22 = vcombine.high %v496_v17, %v500_v18  ;;  %v584_v62 = vld [vmem:[#allocation2 + $0x390] sm:$0xff] }
 0x13a   : > { %3107 = vmatprep.subr.bf16.mxu0 %v6605_v16  ;;  %v6423_v16 = vcombine.high %v504_v7, %v508_v8  ;;  %v588_v0 = vld [vmem:[#allocation2 + $0x3b0] sm:$0xff] }
 0x13b   : > { %v6503_v4 = vcombine.high %v584_v62, %v588_v0  ;;  %v576_v7 = vld [vmem:[#allocation2 + $0x350] sm:$0xff] }
 0x13c   : > { %3147 = vmatpush2.bf16.msra.mxu1 %v6748_v25  ;;  %v652_v25 = vld [vmem:[#allocation2 + $0x5b0] sm:$0xff] }
 0x13d   : > { %3108 = vmatpush2.bf16.msra.mxu0 %v6604_v24  ;;  %3148 = vmatprep.subr.bf16.mxu1 %v6741_v31  ;;  %v648_v24 = vld [vmem:[#allocation2 + $0x590] sm:$0xff] }
 0x13e   : > { %3109 = vmatprep.subr.bf16.mxu0 %v6597_v26  ;;  %v488_v26 = vld [vmem:[#allocation2 + $0x90] sm:$0xff]  ;;  %v6567_v36 = vcombine.high %v648_v24, %v652_v25  ;;  %v6566_v38 = vcombine.low %v648_v24, %v652_v25 }
 0x13f   : > { %v6407_v30 = vcombine.high %v488_v26, %v492_v27  ;;  %v640_v31 = vld [vmem:[#allocation2 + $0x550] sm:$0xff]  ;;  %v6406_v37 = vcombine.low %v488_v26, %v492_v27 }
 0x140   : > { %3149 = vmatpush2.bf16.msra.mxu1 %v6740_v34  ;;  %v480_v34 = vld [vmem:[#allocation2 + $0x50] sm:$0xff] }
 0x141   : > { %3110 = vmatpush2.bf16.msra.mxu0 %v6596_v33  ;;  %3150 = vmatprep.subr.bf16.mxu1 %v6733_v42  ;;  %v644_v33 = vld [vmem:[#allocation2 + $0x570] sm:$0xff] }
 0x142   : > { %3111 = vmatprep.subr.bf16.mxu0 %v6589_v35  ;;  %v484_v35 = vld [vmem:[#allocation2 + $0x70] sm:$0xff]  ;;  %v6559_v47 = vcombine.high %v640_v31, %v644_v33  ;;  %v6558_v49 = vcombine.low %v640_v31, %v644_v33 }
 0x143   : > { %v6399_v41 = vcombine.high %v480_v34, %v484_v35  ;;  %v632_v42 = vld [vmem:[#allocation2 + $0x510] sm:$0xff]  ;;  %v6398_v48 = vcombine.low %v480_v34, %v484_v35 }
 0x144   : > { %3151 = vmatpush2.bf16.msra.mxu1 %v6732_v45  ;;  %v472_v45 = vld [vmem:[#allocation2 + $0x10] sm:$0xff] }
 0x145   : > { %3112 = vmatpush2.bf16.msra.mxu0 %v6588_v44  ;;  %3152 = vmatprep.subr.bf16.mxu1 %v6725_v51  ;;  %v636_v44 = vld [vmem:[#allocation2 + $0x530] sm:$0xff] }
 0x146   : > { %3113 = vmatprep.subr.bf16.mxu0 %v6581_v46  ;;  %v476_v46 = vld [vmem:[#allocation2 + $0x30] sm:$0xff]  ;;  %v6551_v55 = vcombine.high %v632_v42, %v636_v44  ;;  %v6550_v57 = vcombine.low %v632_v42, %v636_v44 }
 0x147   : > { %v6391_v50 = vcombine.high %v472_v45, %v476_v46  ;;  %v624_v51 = vld [vmem:[#allocation2 + $0x4d0] sm:$0xff]  ;;  %v6390_v56 = vcombine.low %v472_v45, %v476_v46 }
 0x148   : > { %3153 = vmatpush2.bf16.msra.mxu1 %v6724_v53  ;;  %v592_v53 = vld [vmem:[#allocation2 + $0x3d0] sm:$0xff] }
 0x149   : > { %3114 = vmatpush2.bf16.msra.mxu0 %v6580_v52  ;;  %3154 = vmatprep.subr.bf16.mxu1 %v6717_v60  ;;  %v628_v52 = vld [vmem:[#allocation2 + $0x4f0] sm:$0xff] }
 0x14a   : > { %3212 = vmatprep.subr.bf16.mxu0 %v6447_v54  ;;  %v596_v54 = vld [vmem:[#allocation2 + $0x3f0] sm:$0xff]  ;;  %v6542_v3 = vcombine.low %v624_v51, %v628_v52 }
 0x14b   : > { %v6511_v59 = vcombine.high %v592_v53, %v596_v54  ;;  %v616_v60 = vld [vmem:[#allocation2 + $0x490] sm:$0xff] }
 0x14c   : > { %3116 = vmatmul.mubr.bf16.vlgmr.msra.gmra.mxu0 %v8200_v23  ;;  %3155 = vmatpush2.bf16.msra.mxu1 %v6716_v1  ;;  %v6543_v1 = vcombine.high %v624_v51, %v628_v52  ;;  %v580_v8 = vld [vmem:[#allocation2 + $0x370] sm:$0xff] }
 0x14d   : > { %3213 = vmatpush1.bf16.msra.mxu0 %v6446_v61  ;;  %3244 = vmatprep.mubr.bf16.mxu0 %v8186_v58  ;;  %v620_v61 = vld [vmem:[#allocation2 + $0x4b0] sm:$0xff]  ;;  %v6495_v12 = vcombine.high %v576_v7, %v580_v8  ;;  %v6494_v18 = vcombine.low %v576_v7, %v580_v8  ;;  %v8237_v7 = vld [vmem:[#allocation4] sm:$0xff] }
 0x14e   : > { %3214 = vmatprep.subr.bf16.mxu0 %v6439_v2  ;;  %3156 = vmatprep.subr.bf16.mxu1 %v6709_v5  ;;  %v6510_v2 = vcombine.low %v592_v53, %v596_v54  ;;  %v608_v5 = vld [vmem:[#allocation2 + $0x450] sm:$0xff]  ;;  %v6534_v11 = vcombine.low %v616_v60, %v620_v61 }
 0x14f   : > { %v724_v24 = vld [vmem:[#allocation2 + $0x7f0] sm:$0xff] }
 0x150   : > { %3157 = vmatpush2.bf16.msra.mxu1 %v6708_v9  ;;  %v6535_v9 = vcombine.high %v616_v60, %v620_v61  ;;  %v560_v25 = vld [vmem:[#allocation2 + $0x2d0] sm:$0xff] }
 0x151   : > { %3215 = vmatpush1.bf16.msra.mxu0 %v6438_v6  ;;  %3183 = vmatprep.subr.bf16.mxu1 %v6773_v13  ;;  %v612_v6 = vld [vmem:[#allocation2 + $0x470] sm:$0xff] }
 0x152   : > { %3216 = vmatprep.subr.bf16.mxu0 %v6431_v10  ;;  %v6502_v10 = vcombine.low %v584_v62, %v588_v0  ;;  %v600_v13 = vld [vmem:[#allocation2 + $0x410] sm:$0xff]  ;;  %v6527_v17 = vcombine.high %v608_v5, %v612_v6 }
 0x153   : > { %3159 = vmatmul.mubr.bf16.vlgmr.msra.gmra.mxu1 %v8219_v40  ;;  %v564_v26 = vld [vmem:[#allocation2 + $0x2f0] sm:$0xff] }
 0x154   : > { %3184 = vmatpush1.bf16.msra.mxu1 %v6772_v15  ;;  %3201 = vmatprep.mubr.bf16.mxu1 %v7999_v39  ;;  %v568_v15 = vld [vmem:[#allocation2 + $0x310] sm:$0xff] }
 0x155   : > { %3217 = vmatpush1.bf16.msra.mxu0 %v6430_v14  ;;  %3255 = vmatprep.subr.bf16.mxu1 %v6575_v19  ;;  %v604_v14 = vld [vmem:[#allocation2 + $0x430] sm:$0xff]  ;;  %v6526_v19 = vcombine.low %v608_v5, %v612_v6 }
 0x156   : > { %3218 = vmatprep.subr.bf16.mxu0 %v6423_v16  ;;  %v572_v16 = vld [vmem:[#allocation2 + $0x330] sm:$0xff]  ;;  %v6519_v27 = vcombine.high %v600_v13, %v604_v14 }
 0x157   : > { %v712_v31 = vld [vmem:[#allocation2 + $0x790] sm:$0xff] }
 0x158   : > { %v716_v33 = vld [vmem:[#allocation2 + $0x7b0] sm:$0xff] }
 0x159   : > { %3219 = vmatpush1.bf16.msra.mxu0 %v6422_v21  ;;  %v6487_v21 = vcombine.high %v568_v15, %v572_v16  ;;  %v552_v34 = vld [vmem:[#allocation2 + $0x290] sm:$0xff]  ;;  %v6631_v46 = vcombine.high %v712_v31, %v716_v33 }
 0x15a   : > { %3220 = vmatprep.subr.bf16.mxu0 %v6415_v22  ;;  %v720_v22 = vld [vmem:[#allocation2 + $0x7d0] sm:$0xff] }
 0x15b   : > { %6779 = vmatmul.mubr.msk.bf16.vlgmr.msra.gmra.mxu1 %vm2864_vm0, %v8212_v43  ;;  %v556_v35 = vld [vmem:[#allocation2 + $0x2b0] sm:$0xff] }
 0x15c   : > { %3256 = vmatpush1.bf16.msra.mxu1 %v6574_v29  ;;  %3287 = vmatprep.mubr.bf16.mxu1 %v8190_v63  ;;  %v6518_v29 = vcombine.low %v600_v13, %v604_v14  ;;  %v704_v42 = vld [vmem:[#allocation2 + $0x750] sm:$0xff] }
 0x15d   : > { %3221 = vmatpush1.bf16.msra.mxu0 %v6414_v28  ;;  %3257 = vmatprep.subr.bf16.mxu1 %v6567_v36  ;;  %v6486_v28 = vcombine.low %v568_v15, %v572_v16  ;;  %v6639_v36 = vcombine.high %v720_v22, %v724_v24  ;;  %v544_v44 = vld [vmem:[#allocation2 + $0x250] sm:$0xff] }
 0x15e   : > { %3222 = vmatprep.subr.bf16.mxu0 %v6407_v30  ;;  %v6479_v30 = vcombine.high %v560_v25, %v564_v26  ;;  %v548_v45 = vld [vmem:[#allocation2 + $0x270] sm:$0xff] }
 0x15f   : > { %v6463_v51 = vcombine.high %v544_v44, %v548_v45  ;;  %v536_v53 = vld [vmem:[#allocation2 + $0x210] sm:$0xff] }
 0x160   : > { %3258 = vmatpush1.bf16.msra.mxu1 %v6566_v38  ;;  %v6638_v38 = vcombine.low %v720_v22, %v724_v24  ;;  %v540_v54 = vld [vmem:[#allocation2 + $0x230] sm:$0xff] }
 0x161   : > { %3223 = vmatpush1.bf16.msra.mxu0 %v6406_v37  ;;  %3259 = vmatprep.subr.bf16.mxu1 %v6559_v47  ;;  %v6478_v37 = vcombine.low %v560_v25, %v564_v26  ;;  %v708_v47 = vld [vmem:[#allocation2 + $0x770] sm:$0xff]  ;;  %v6455_v61 = vcombine.high %v536_v53, %v540_v54 }
 0x162   : > { %3224 = vmatprep.subr.bf16.mxu0 %v6399_v41  ;;  %v6471_v41 = vcombine.high %v552_v34, %v556_v35  ;;  %v6623_v52 = vcombine.high %v704_v42, %v708_v47  ;;  %v6622_v60 = vcombine.low %v704_v42, %v708_v47  ;;  %v784_v0 = vld [vmem:[#allocation2 + $0x9d0] sm:$0xff] }
 0x163   : > { %v684_v13 = vld [vmem:[#allocation2 + $0x6b0] sm:$0xff] }
 0x164   : > { %3260 = vmatpush1.bf16.msra.mxu1 %v6558_v49  ;;  %v864_v49 = vlaneseq  ;;  %v672_v24 = vld [vmem:[#allocation2 + $0x650] sm:$0xff] }
 0x165   : > { %3225 = vmatpush1.bf16.msra.mxu0 %v6398_v48  ;;  %3261 = vmatprep.subr.bf16.mxu1 %v6551_v55  ;;  %v6470_v48 = vcombine.low %v552_v34, %v556_v35  ;;  %v696_v55 = vld [vmem:[#allocation2 + $0x710] sm:$0xff] }
 0x166   : > { %3226 = vmatprep.subr.bf16.mxu0 %v6391_v50  ;;  %v6630_v50 = vcombine.low %v712_v31, %v716_v33  ;;  %v676_v25 = vld [vmem:[#allocation2 + $0x670] sm:$0xff] }
 0x167   : > { %v6591_v35 = vcombine.high %v672_v24, %v676_v25  ;;  %v668_v42 = vld [vmem:[#allocation2 + $0x630] sm:$0xff]  ;;  %v6590_v47 = vcombine.low %v672_v24, %v676_v25  ;;  %v513_v24 = vld [vmem:[#allocation2 + $0x158] sm:$0xff] }
 0x168   : > { %3262 = vmatpush1.bf16.msra.mxu1 %v6550_v57  ;;  %v6462_v57 = vcombine.low %v544_v44, %v548_v45  ;;  %v517_v25 = vld [vmem:[#allocation2 + $0x178] sm:$0xff] }
 0x169   : > { %3227 = vmatpush1.bf16.msra.mxu0 %v6390_v56  ;;  %3263 = vmatprep.subr.bf16.mxu1 %v6543_v1  ;;  %v700_v56 = vld [vmem:[#allocation2 + $0x730] sm:$0xff] }
 0x16a   : > { %3228 = vmatprep.subr.bf16.mxu0 %v6511_v59  ;;  %v8232_v59 = vshrl.u32 %v864_v49, 7  ;;  %v6615_v62 = vcombine.high %v696_v55, %v700_v56  ;;  %v788_v1 = vld [vmem:[#allocation2 + $0x9f0] sm:$0xff]  ;;  %v6614_v6 = vcombine.low %v696_v55, %v700_v56 }
 0x16b   : > { %v6703_v8 = vcombine.high %v784_v0, %v788_v1  ;;  %v6702_v15 = vcombine.low %v784_v0, %v788_v1  ;;  %v529_v0 = vld [vmem:[#allocation2 + $0x1d8] sm:$0xff] }
 0x16c   : > { %3264 = vmatpush1.bf16.msra.mxu1 %v6542_v3  ;;  %v692_v3 = vld [vmem:[#allocation2 + $0x6f0] sm:$0xff]  ;;  %v8235_v5 = vsub.s32 0, %v8232_v59  ;;  %v533_v1 = vld [vmem:[#allocation2 + $0x1f8] sm:$0xff] }
 0x16d   : > { %3229 = vmatpush2.bf16.msra.mxu0 %v6510_v2  ;;  %3265 = vmatprep.subr.bf16.mxu1 %v6535_v9  ;;  %v688_v2 = vld [vmem:[#allocation2 + $0x6d0] sm:$0xff] }
 0x16e   : > { %3230 = vmatprep.subr.bf16.mxu0 %v6503_v4  ;;  %v6454_v4 = vcombine.low %v536_v53, %v540_v54  ;;  %v6607_v9 = vcombine.high %v688_v2, %v692_v3  ;;  %v867_v14 = vrot.slane %v8237_v7, %v8235_v5  ;;  %v6606_v16 = vcombine.low %v688_v2, %v692_v3  ;;  %v856_v53 = vld [vmem:[#allocation2 + $0xc10] sm:$0xff] }
 0x16f   : > { %v860_v54 = vld [vmem:[#allocation2 + $0xc30] sm:$0xff] }
 0x170   : > { %3266 = vmatpush1.bf16.msra.mxu1 %v6534_v11  ;;  %v780_v11 = vld [vmem:[#allocation2 + $0x9b0] sm:$0xff]  ;;  %v6774_v3 = vcombine.low %v856_v53, %v860_v54 }
 0x171   : > { %3231 = vmatpush2.bf16.msra.mxu0 %v6502_v10  ;;  %3267 = vmatprep.subr.bf16.mxu1 %v6527_v17  ;;  %v776_v10 = vld [vmem:[#allocation2 + $0x990] sm:$0xff] }
 0x172   : > { %3232 = vmatprep.subr.bf16.mxu0 %v6495_v12  ;;  %v680_v12 = vld [vmem:[#allocation2 + $0x690] sm:$0xff]  ;;  %v6695_v17 = vcombine.high %v776_v10, %v780_v11 }
 0x174   : > { %3268 = vmatpush1.bf16.msra.mxu1 %v6526_v19  ;;  %v768_v19 = vld [vmem:[#allocation2 + $0x950] sm:$0xff] }
 0x175   : > { %3233 = vmatpush2.bf16.msra.mxu0 %v6494_v18  ;;  %3269 = vmatprep.subr.bf16.mxu1 %v6519_v27  ;;  %v6599_v18 = vcombine.high %v680_v12, %v684_v13 }
 0x176   : > { %3234 = vmatprep.subr.bf16.mxu0 %v6487_v21  ;;  %v772_v21 = vld [vmem:[#allocation2 + $0x970] sm:$0xff] }
 0x177   : > { %v6687_v31 = vcombine.high %v768_v19, %v772_v21  ;;  %v6686_v45 = vcombine.low %v768_v19, %v772_v21  ;;  %v848_v21 = vld [vmem:[#allocation2 + $0xbd0] sm:$0xff] }
 0x178   : > { %3270 = vmatpush1.bf16.msra.mxu1 %v6518_v29 }
 0x179   : > { %3235 = vmatpush2.bf16.msra.mxu0 %v6486_v28  ;;  %3271 = vmatprep.subr.bf16.mxu1 %v6639_v36  ;;  %v6694_v28 = vcombine.low %v776_v10, %v780_v11  ;;  %v760_v36 = vld [vmem:[#allocation2 + $0x910] sm:$0xff] }
 0x17a   : > { %3236 = vmatprep.subr.bf16.mxu0 %v6479_v30  ;;  %v6598_v30 = vcombine.low %v680_v12, %v684_v13  ;;  %v728_v12 = vld [vmem:[#allocation2 + $0x810] sm:$0xff] }
 0x17b   : > { %v732_v13 = vld [vmem:[#allocation2 + $0x830] sm:$0xff] }
 0x17c   : > { %3272 = vmatpush2.bf16.msra.mxu1 %v6638_v38 }
 0x17d   : > { %3237 = vmatpush2.bf16.msra.mxu0 %v6478_v37  ;;  %3273 = vmatprep.subr.bf16.mxu1 %v6631_v46  ;;  %v764_v37 = vld [vmem:[#allocation2 + $0x930] sm:$0xff] }
 0x17e   : > { %3238 = vmatprep.subr.bf16.mxu0 %v6471_v41  ;;  %v664_v41 = vld [vmem:[#allocation2 + $0x610] sm:$0xff]  ;;  %v6678_v55 = vcombine.low %v760_v36, %v764_v37 }
 0x17f   : > { %v6582_v56 = vcombine.low %v664_v41, %v668_v42 }
 0x180   : > { %3274 = vmatpush2.bf16.msra.mxu1 %v6630_v50  ;;  %v6583_v50 = vcombine.high %v664_v41, %v668_v42  ;;  %v6432_v41 = vcombine.low %v513_v24, %v517_v25 }
 0x181   : > { %3239 = vmatpush2.bf16.msra.mxu0 %v6470_v48  ;;  %3275 = vmatprep.subr.bf16.mxu1 %v6623_v52  ;;  %v6679_v48 = vcombine.high %v760_v36, %v764_v37  ;;  %v756_v52 = vld [vmem:[#allocation2 + $0x8f0] sm:$0xff]  ;;  %v505_v36 = vld [vmem:[#allocation2 + $0x118] sm:$0xff] }
 0x182   : > { %3240 = vmatprep.subr.bf16.mxu0 %v6463_v51  ;;  %v752_v51 = vld [vmem:[#allocation2 + $0x8d0] sm:$0xff]  ;;  %v509_v37 = vld [vmem:[#allocation2 + $0x138] sm:$0xff] }
 0x183   : > { %v6670_v2 = vcombine.low %v752_v51, %v756_v52 }
 0x184   : > { %3276 = vmatpush2.bf16.msra.mxu1 %v6622_v60  ;;  %v6775_v60 = vcombine.high %v856_v53, %v860_v54  ;;  %v824_v53 = vld [vmem:[#allocation2 + $0xb10] sm:$0xff] }
 0x185   : > { %3241 = vmatpush2.bf16.msra.mxu0 %v6462_v57  ;;  %3277 = vmatprep.subr.bf16.mxu1 %v6615_v62  ;;  %v6671_v57 = vcombine.high %v752_v51, %v756_v52  ;;  %v748_v62 = vld [vmem:[#allocation2 + $0x8b0] sm:$0xff]  ;;  %v6424_v51 = vcombine.low %v505_v36, %v509_v37 }
 0x186   : > { %3242 = vmatprep.subr.bf16.mxu0 %v6455_v61  ;;  %v744_v61 = vld [vmem:[#allocation2 + $0x890] sm:$0xff] }
 0x187   : > { %v6662_v10 = vcombine.low %v744_v61, %v748_v62  ;;  %v828_v54 = vld [vmem:[#allocation2 + $0xb30] sm:$0xff] }
 0x188   : > { %3278 = vmatpush2.bf16.msra.mxu1 %v6614_v6  ;;  %v6449_v6 = vcombine.high %v529_v0, %v533_v1 }
 0x189   : > { %3243 = vmatpush2.bf16.msra.mxu0 %v6454_v4  ;;  %3279 = vmatprep.subr.bf16.mxu1 %v6607_v9  ;;  %v6663_v4 = vcombine.high %v744_v61, %v748_v62  ;;  %v740_v9 = vld [vmem:[#allocation2 + $0x870] sm:$0xff]  ;;  %v6743_v61 = vcombine.high %v824_v53, %v828_v54 }
 0x18a   : > { %3298 = vmatprep.subr.bf16.mxu0 %v6703_v8  ;;  %v736_v8 = vld [vmem:[#allocation2 + $0x850] sm:$0xff] }
 0x18b   : > { %v2945_v27 = vpop.f32.mrf.mxu1  ;;  %v6655_v11 = vcombine.high %v736_v8, %v740_v9 }
 0x18c   : > { %v2902_v22 = vpop.f32.mrf.mxu0  ;;  %3245 = vmatmul.mubr.bf16.vlgmr.msra.gmra.mxu0 %v8198_v20  ;;  %3280 = vmatpush2.bf16.msra.mxu1 %v6606_v16  ;;  %v6654_v16 = vcombine.low %v736_v8, %v740_v9 }
 0x18d   : > { %v2903_v26 = vadd.f32 %v2902_v22, %v867_v14  ;;  %3299 = vmatpush1.bf16.msra.mxu0 %v6702_v15  ;;  %3330 = vmatprep.mubr.bf16.mxu0 %v8205_v32  ;;  %v8247_v34 = vpop.f32.mrf.mxu1  ;;  %v525_v15 = vld [vmem:[#allocation2 + $0x1b8] sm:$0xff]  ;;  %v852_v22 = vld [vmem:[#allocation2 + $0xbf0] sm:$0xff] }
 0x18e   : > { %v8243_v29 = vpop.f32.mrf.mxu0  ;;  %3300 = vmatprep.subr.bf16.mxu0 %v6695_v17  ;;  %3281 = vmatprep.subr.bf16.mxu1 %v6599_v18  ;;  %v6448_v17 = vcombine.low %v529_v0, %v533_v1  ;;  %v6647_v18 = vcombine.high %v728_v12, %v732_v13  ;;  %v816_v0 = vld [vmem:[#allocation2 + $0xad0] sm:$0xff] }
 0x18f   : > { %v8245_v33 = vadd.f32 %v2945_v27, %v2903_v26  ;;  %v2949_v46 = vpop.f32.mrf.mxu1  ;;  %v6646_v26 = vcombine.low %v728_v12, %v732_v13  ;;  %v820_v1 = vld [vmem:[#allocation2 + $0xaf0] sm:$0xff]  ;;  %v473_v12 = vld [vmem:[#allocation2 + $0x18] sm:$0xff] }
 0x190   : > { %v2906_v38 = vpop.f32.mrf.mxu0  ;;  %3282 = vmatpush2.bf16.msra.mxu1 %v6598_v30  ;;  %v6433_v30 = vcombine.high %v513_v24, %v517_v25  ;;  %v6735_v8 = vcombine.high %v816_v0, %v820_v1  ;;  %v477_v13 = vld [vmem:[#allocation2 + $0x38] sm:$0xff] }
 0x191   : > { %v2907_v44 = vadd.f32 %v2906_v38, %v867_v14  ;;  %3301 = vmatpush1.bf16.msra.mxu0 %v6694_v28  ;;  %3283 = vmatprep.subr.bf16.mxu1 %v6591_v35  ;;  %v521_v14 = vld [vmem:[#allocation2 + $0x198] sm:$0xff]  ;;  %v6767_v28 = vcombine.high %v848_v21, %v852_v22  ;;  %v844_v35 = vld [vmem:[#allocation2 + $0xbb0] sm:$0xff]  ;;  %v6766_v38 = vcombine.low %v848_v21, %v852_v22 }
 0x192   : > { %3302 = vmatprep.subr.bf16.mxu0 %v6687_v31  ;;  %v6441_v19 = vcombine.high %v521_v14, %v525_v15  ;;  %v6440_v27 = vcombine.low %v521_v14, %v525_v15  ;;  %v840_v31 = vld [vmem:[#allocation2 + $0xb90] sm:$0xff]  ;;  %v6734_v14 = vcombine.low %v816_v0, %v820_v1  ;;  %v593_v21 = vld [vmem:[#allocation2 + $0x3d8] sm:$0xff]  ;;  %v6392_v25 = vcombine.low %v473_v12, %v477_v13 }
 0x193   : > { %v8249_v49 = vadd.f32 %v2949_v46, %v2907_v44  ;;  %v6759_v42 = vcombine.high %v840_v31, %v844_v35  ;;  %v6425_v44 = vcombine.high %v505_v36, %v509_v37  ;;  %v836_v46 = vld [vmem:[#allocation2 + $0xb70] sm:$0xff]  ;;  %v597_v22 = vld [vmem:[#allocation2 + $0x3f8] sm:$0xff] }
 0x194   : > { %3284 = vmatpush2.bf16.msra.mxu1 %v6590_v47  ;;  %v497_v47 = vld [vmem:[#allocation2 + $0xd8] sm:$0xff]  ;;  %v6512_v37 = vcombine.low %v593_v21, %v597_v22 }
 0x195   : > { %3303 = vmatpush1.bf16.msra.mxu0 %v6686_v45  ;;  %3285 = vmatprep.subr.bf16.mxu1 %v6583_v50  ;;  %v832_v45 = vld [vmem:[#allocation2 + $0xb50] sm:$0xff]  ;;  %v6758_v50 = vcombine.low %v840_v31, %v844_v35  ;;  %v585_v31 = vld [vmem:[#allocation2 + $0x398] sm:$0xff] }
 0x196   : > { %3304 = vmatprep.subr.bf16.mxu0 %v6679_v48  ;;  %v501_v48 = vld [vmem:[#allocation2 + $0xf8] sm:$0xff] }
 0x197   : > { %v6417_v52 = vcombine.high %v497_v47, %v501_v48  ;;  %v589_v35 = vld [vmem:[#allocation2 + $0x3b8] sm:$0xff] }
 0x198   : > { %3286 = vmatpush2.bf16.msra.mxu1 %v6582_v56  ;;  %v493_v56 = vld [vmem:[#allocation2 + $0xb8] sm:$0xff] }
 0x199   : > { %3305 = vmatpush1.bf16.msra.mxu0 %v6678_v55  ;;  %3355 = vmatprep.subr.bf16.mxu1 %v6775_v60  ;;  %v489_v55 = vld [vmem:[#allocation2 + $0x98] sm:$0xff]  ;;  %v6416_v60 = vcombine.low %v497_v47, %v501_v48  ;;  %v8256_v48 = vpop.f32.mrf.mxu1 }
 0x19a   : > { %3306 = vmatprep.subr.bf16.mxu0 %v6671_v57  ;;  %v6750_v57 = vcombine.low %v832_v45, %v836_v46  ;;  %v6409_v62 = vcombine.high %v489_v55, %v493_v56  ;;  %v641_v1 = vld [vmem:[#allocation2 + $0x558] sm:$0xff] }
 0x19b   : > { %3288 = vmatmul.mubr.bf16.vlgmr.msra.gmra.mxu1 %v8200_v23 }
 0x19c   : > { %3356 = vmatpush1.bf16.msra.mxu1 %v6774_v3  ;;  %3373 = vmatprep.mubr.bf16.mxu1 %v7999_v39  ;;  %v485_v3 = vld [vmem:[#allocation2 + $0x78] sm:$0xff] }
 0x19d   : > { %3307 = vmatpush1.bf16.msra.mxu0 %v6670_v2  ;;  %3384 = vmatprep.subr.bf16.mxu1 %v6449_v6  ;;  %v481_v2 = vld [vmem:[#allocation2 + $0x58] sm:$0xff]  ;;  %v6408_v6 = vcombine.low %v489_v55, %v493_v56 }
 0x19e   : > { %3308 = vmatprep.subr.bf16.mxu0 %v6663_v4  ;;  %v6742_v4 = vcombine.low %v824_v53, %v828_v54  ;;  %v6401_v9 = vcombine.high %v481_v2, %v485_v3  ;;  %v6400_v15 = vcombine.low %v481_v2, %v485_v3  ;;  %v653_v53 = vld [vmem:[#allocation2 + $0x5b8] sm:$0xff] }
 0x19f   : > { %v569_v54 = vld [vmem:[#allocation2 + $0x318] sm:$0xff] }
 0x1a0   : > { %v573_v55 = vld [vmem:[#allocation2 + $0x338] sm:$0xff] }
 0x1a1   : > { %3309 = vmatpush1.bf16.msra.mxu0 %v6662_v10  ;;  %v808_v10 = vld [vmem:[#allocation2 + $0xa90] sm:$0xff]  ;;  %v6489_v0 = vcombine.high %v569_v54, %v573_v55  ;;  %v645_v2 = vld [vmem:[#allocation2 + $0x578] sm:$0xff] }
 0x1a2   : > { %3310 = vmatprep.subr.bf16.mxu0 %v6655_v11  ;;  %v812_v11 = vld [vmem:[#allocation2 + $0xab0] sm:$0xff] }
 0x1a3   : > { %6780 = vmatmul.mubr.msk.bf16.vlgmr.msra.gmra.mxu1 %vm2864_vm0, %v8212_v43  ;;  %v6726_v24 = vcombine.low %v808_v10, %v812_v11 }
 0x1a4   : > { %3385 = vmatpush1.bf16.msra.mxu1 %v6448_v17  ;;  %3416 = vmatprep.mubr.bf16.mxu1 %v8186_v58  ;;  %v6751_v58 = vcombine.high %v832_v45, %v836_v46  ;;  %v6393_v17 = vcombine.high %v473_v12, %v477_v13  ;;  %v577_v45 = vld [vmem:[#allocation2 + $0x358] sm:$0xff]  ;;  %v6561_v13 = vcombine.high %v641_v1, %v645_v2 }
 0x1a5   : > { %3311 = vmatpush1.bf16.msra.mxu0 %v6654_v16  ;;  %3386 = vmatprep.subr.bf16.mxu1 %v6441_v19  ;;  %v6727_v16 = vcombine.high %v808_v10, %v812_v11  ;;  %v804_v19 = vld [vmem:[#allocation2 + $0xa70] sm:$0xff]  ;;  %v581_v46 = vld [vmem:[#allocation2 + $0x378] sm:$0xff]  ;;  %v6488_v11 = vcombine.low %v569_v54, %v573_v55 }
 0x1a6   : > { %3312 = vmatprep.subr.bf16.mxu0 %v6647_v18  ;;  %v800_v18 = vld [vmem:[#allocation2 + $0xa50] sm:$0xff] }
 0x1a7   : > { %v6718_v36 = vcombine.low %v800_v18, %v804_v19 }
 0x1a8   : > { %3387 = vmatpush1.bf16.msra.mxu1 %v6440_v27  ;;  %v6513_v27 = vcombine.high %v593_v21, %v597_v22 }
 0x1a9   : > { %3313 = vmatpush1.bf16.msra.mxu0 %v6646_v26  ;;  %3388 = vmatprep.subr.bf16.mxu1 %v6433_v30  ;;  %v6719_v26 = vcombine.high %v800_v18, %v804_v19  ;;  %v796_v30 = vld [vmem:[#allocation2 + $0xa30] sm:$0xff]  ;;  %v553_v19 = vld [vmem:[#allocation2 + $0x298] sm:$0xff] }
 0x1aa   : > { %3314 = vmatprep.subr.bf16.mxu0 %v6767_v28  ;;  %v792_v28 = vld [vmem:[#allocation2 + $0xa10] sm:$0xff] }
 0x1ab   : > { %v6710_v47 = vcombine.low %v792_v28, %v796_v30 }
 0x1ac   : > { %3389 = vmatpush1.bf16.msra.mxu1 %v6432_v41  ;;  %v6505_v41 = vcombine.high %v585_v31, %v589_v35 }
 0x1ad   : > { %3315 = vmatpush2.bf16.msra.mxu0 %v6766_v38  ;;  %3390 = vmatprep.subr.bf16.mxu1 %v6425_v44  ;;  %v6711_v38 = vcombine.high %v792_v28, %v796_v30  ;;  %v661_v44 = vld [vmem:[#allocation2 + $0x5f8] sm:$0xff] }
 0x1ae   : > { %3316 = vmatprep.subr.bf16.mxu0 %v6759_v42  ;;  %v657_v42 = vld [vmem:[#allocation2 + $0x5d8] sm:$0xff] }
 0x1af   : > { %v6576_v56 = vcombine.low %v657_v42, %v661_v44  ;;  %v625_v30 = vld [vmem:[#allocation2 + $0x4d8] sm:$0xff] }
 0x1b0   : > { %3391 = vmatpush1.bf16.msra.mxu1 %v6424_v51  ;;  %v6577_v51 = vcombine.high %v657_v42, %v661_v44 }
 0x1b1   : > { %3317 = vmatpush2.bf16.msra.mxu0 %v6758_v50  ;;  %3392 = vmatprep.subr.bf16.mxu1 %v6417_v52  ;;  %v6504_v50 = vcombine.low %v585_v31, %v589_v35  ;;  %v649_v52 = vld [vmem:[#allocation2 + $0x598] sm:$0xff] }
 0x1b2   : > { %3318 = vmatprep.subr.bf16.mxu0 %v6751_v58  ;;  %v6497_v58 = vcombine.high %v577_v45, %v581_v46  ;;  %v629_v31 = vld [vmem:[#allocation2 + $0x4f8] sm:$0xff] }
 0x1b3   : > { %v545_v35 = vld [vmem:[#allocation2 + $0x258] sm:$0xff] }
 0x1b4   : > { %3393 = vmatpush1.bf16.msra.mxu1 %v6416_v60  ;;  %v3031_v60 = vpop.f32.mrf.mxu1 }
 0x1b5   : > { %3319 = vmatpush2.bf16.msra.mxu0 %v6750_v57  ;;  %3394 = vmatprep.subr.bf16.mxu1 %v6409_v62  ;;  %v8258_v57 = vpop.f32.mrf.mxu0  ;;  %v6569_v62 = vcombine.high %v649_v52, %v653_v53 }
 0x1b6   : > { %3320 = vmatprep.subr.bf16.mxu0 %v6743_v61  ;;  %v6496_v61 = vcombine.low %v577_v45, %v581_v46  ;;  %v8263_v10 = vpop.f32.mrf.mxu1  ;;  %v617_v46 = vld [vmem:[#allocation2 + $0x498] sm:$0xff] }
 0x1b8   : > { %3395 = vmatpush1.bf16.msra.mxu1 %v6408_v6  ;;  %v565_v6 = vld [vmem:[#allocation2 + $0x2f8] sm:$0xff]  ;;  %v3035_v22 = vpop.f32.mrf.mxu1 }
 0x1b9   : > { %3321 = vmatpush2.bf16.msra.mxu0 %v6742_v4  ;;  %3396 = vmatprep.subr.bf16.mxu1 %v6401_v9  ;;  %v561_v4 = vld [vmem:[#allocation2 + $0x2d8] sm:$0xff]  ;;  %v6568_v9 = vcombine.low %v649_v52, %v653_v53  ;;  %v6544_v52 = vcombine.low %v625_v30, %v629_v31 }
 0x1ba   : > { %3322 = vmatprep.subr.bf16.mxu0 %v6735_v8 }
 0x1bc   : > { %3397 = vmatpush1.bf16.msra.mxu1 %v6400_v15  ;;  %v6481_v15 = vcombine.high %v561_v4, %v565_v6 }
 0x1bd   : > { %3323 = vmatpush2.bf16.msra.mxu0 %v6734_v14  ;;  %3398 = vmatprep.subr.bf16.mxu1 %v6393_v17  ;;  %v637_v17 = vld [vmem:[#allocation2 + $0x538] sm:$0xff] }
 0x1be   : > { %3324 = vmatprep.subr.bf16.mxu0 %v6727_v16  ;;  %v633_v16 = vld [vmem:[#allocation2 + $0x518] sm:$0xff] }
 0x1c0   : > { %3399 = vmatpush1.bf16.msra.mxu1 %v6392_v25  ;;  %v6553_v25 = vcombine.high %v633_v16, %v637_v17 }
 0x1c1   : > { %3325 = vmatpush2.bf16.msra.mxu0 %v6726_v24  ;;  %3400 = vmatprep.subr.bf16.mxu1 %v6513_v27  ;;  %v6480_v24 = vcombine.low %v561_v4, %v565_v6  ;;  %v601_v4 = vld [vmem:[#allocation2 + $0x418] sm:$0xff] }
 0x1c2   : > { %3326 = vmatprep.subr.bf16.mxu0 %v6719_v26  ;;  %v605_v6 = vld [vmem:[#allocation2 + $0x438] sm:$0xff] }
 0x1c4   : > { %3401 = vmatpush2.bf16.msra.mxu1 %v6512_v37 }
 0x1c5   : > { %3327 = vmatpush2.bf16.msra.mxu0 %v6718_v36  ;;  %3402 = vmatprep.subr.bf16.mxu1 %v6505_v41  ;;  %v549_v36 = vld [vmem:[#allocation2 + $0x278] sm:$0xff]  ;;  %v6545_v41 = vcombine.high %v625_v30, %v629_v31 }
 0x1c6   : > { %3328 = vmatprep.subr.bf16.mxu0 %v6711_v38  ;;  %v6465_v45 = vcombine.high %v545_v35, %v549_v36  ;;  %v6464_v53 = vcombine.low %v545_v35, %v549_v36  ;;  %v705_v35 = vld [vmem:[#allocation2 + $0x758] sm:$0xff] }
 0x1c7   : > { %v709_v36 = vld [vmem:[#allocation2 + $0x778] sm:$0xff] }
 0x1c8   : > { %3403 = vmatpush2.bf16.msra.mxu1 %v6504_v50  ;;  %v537_v50 = vld [vmem:[#allocation2 + $0x218] sm:$0xff] }
 0x1c9   : > { %3329 = vmatpush2.bf16.msra.mxu0 %v6710_v47  ;;  %3404 = vmatprep.subr.bf16.mxu1 %v6497_v58  ;;  %v621_v47 = vld [vmem:[#allocation2 + $0x4b8] sm:$0xff] }
 0x1ca   : > { %3427 = vmatprep.subr.bf16.mxu0 %v6577_v51  ;;  %v541_v51 = vld [vmem:[#allocation2 + $0x238] sm:$0xff]  ;;  %v6537_v54 = vcombine.high %v617_v46, %v621_v47 }
 0x1cb   : > { %v6457_v55 = vcombine.high %v537_v50, %v541_v51 }
 0x1cc   : > { %v2988_v3 = vpop.f32.mrf.mxu0  ;;  %3331 = vmatmul.mubr.bf16.vlgmr.msra.gmra.mxu0 %v8219_v40  ;;  %3405 = vmatpush2.bf16.msra.mxu1 %v6496_v61  ;;  %v785_v61 = vld [vmem:[#allocation2 + $0x9d8] sm:$0xff] }
 0x1cd   : > { %v2989_v8 = vadd.f32 %v2988_v3, %v8245_v33  ;;  %3428 = vmatpush1.bf16.msra.mxu0 %v6576_v56  ;;  %3459 = vmatprep.mubr.bf16.mxu0 %v8190_v63  ;;  %v557_v33 = vld [vmem:[#allocation2 + $0x2b8] sm:$0xff]  ;;  %v6560_v63 = vcombine.low %v641_v1, %v645_v2  ;;  %v6456_v1 = vcombine.low %v537_v50, %v541_v51 }
 0x1ce   : > { %v8265_v12 = vpop.f32.mrf.mxu0  ;;  %3429 = vmatprep.subr.bf16.mxu0 %v6569_v62  ;;  %3406 = vmatprep.subr.bf16.mxu1 %v6489_v0  ;;  %v6473_v28 = vcombine.high %v553_v19, %v557_v33  ;;  %v6472_v38 = vcombine.low %v553_v19, %v557_v33  ;;  %v609_v56 = vld [vmem:[#allocation2 + $0x458] sm:$0xff]  ;;  %v6536_v0 = vcombine.low %v617_v46, %v621_v47  ;;  %v8273_v46 = vsub.s32 1, %v8232_v59 }
 0x1cf   : > { %v3032_v14 = vadd.f32 %v3031_v60, %v2989_v8  ;;  %v613_v60 = vld [vmem:[#allocation2 + $0x478] sm:$0xff]  ;;  %v6520_v33 = vcombine.low %v601_v4, %v605_v6  ;;  %v6624_v51 = vcombine.low %v705_v35, %v709_v36 }
 0x1d0   : > { %v2992_v18 = vpop.f32.mrf.mxu0  ;;  %3407 = vmatpush2.bf16.msra.mxu1 %v6488_v11  ;;  %v789_v62 = vld [vmem:[#allocation2 + $0x9f8] sm:$0xff]  ;;  %v6529_v2 = vcombine.high %v609_v56, %v613_v60  ;;  %v6528_v11 = vcombine.low %v609_v56, %v613_v60  ;;  %v871_v60 = vrot.slane %v8237_v7, %v8273_v46 }
 0x1d1   : > { %v2993_v21 = vadd.f32 %v2992_v18, %v8249_v49  ;;  %3430 = vmatpush1.bf16.msra.mxu0 %v6568_v9  ;;  %v3572_v26 = vmul.f32 0.2, %v3032_v14  ;;  %3408 = vmatprep.subr.bf16.mxu1 %v6481_v15  ;;  %vm3556_vm1 = vcmp.gt.f32.partialorder %v3032_v14, 0.0  ;;  %v6552_v49 = vcombine.low %v633_v16, %v637_v17  ;;  %v777_v8 = vld [vmem:[#allocation2 + $0x998] sm:$0xff] }
 0x1d2   : > { %3431 = vmatprep.subr.bf16.mxu0 %v6561_v13  ;;  %v6705_v3 = vcombine.high %v785_v61, %v789_v62  ;;  %v781_v9 = vld [vmem:[#allocation2 + $0x9b8] sm:$0xff]  ;;  %v6704_v13 = vcombine.low %v785_v61, %v789_v62 }
 0x1d3   : > { %v3036_v27 = vadd.f32 %v3035_v22, %v2993_v21  ;;  %v3588_v42 = vsel %vm3556_vm1, %v3032_v14, %v3572_v26  ;;  %v6521_v14 = vcombine.high %v601_v4, %v605_v6  ;;  %v6697_v15 = vcombine.high %v777_v8, %v781_v9  ;;  %v721_v16 = vld [vmem:[#allocation2 + $0x7d8] sm:$0xff] }
 0x1d4   : > { %3409 = vmatpush2.bf16.msra.mxu1 %v6480_v24  ;;  %v725_v17 = vld [vmem:[#allocation2 + $0x7f8] sm:$0xff]  ;;  %v6696_v21 = vcombine.low %v777_v8, %v781_v9  ;;  %v2905_v9 = vadd.f32 %v8243_v29, %v871_v60 }
 0x1d5   : > { %vm3564_vm2 = vcmp.gt.f32.partialorder %v3036_v27, 0.0  ;;  %v3580_v37 = vmul.f32 0.2, %v3036_v27  ;;  %3432 = vmatpush1.bf16.msra.mxu0 %v6560_v63  ;;  %3410 = vmatprep.subr.bf16.mxu1 %v6473_v28  ;;  %v769_v18 = vld [vmem:[#allocation2 + $0x958] sm:$0xff]  ;;  %v6641_v63 = vcombine.high %v721_v16, %v725_v17  ;;  %v6640_v28 = vcombine.low %v721_v16, %v725_v17 }
 0x1d6   : > { %3433 = vmatprep.subr.bf16.mxu0 %v6553_v25  ;;  %v773_v19 = vld [vmem:[#allocation2 + $0x978] sm:$0xff] }
 0x1d7   : > { %v3596_v44 = vsel %vm3564_vm2, %v3036_v27, %v3580_v37  ;;  %v6689_v22 = vcombine.high %v769_v18, %v773_v19  ;;  %v713_v24 = vld [vmem:[#allocation2 + $0x798] sm:$0xff]  ;;  %v6688_v30 = vcombine.low %v769_v18, %v773_v19 }
 0x1d8   : > { %v8268_v58 = vpack.c.bf16 %v3596_v44, %v3588_v42  ;;  %3411 = vmatpush2.bf16.msra.mxu1 %v6472_v38  ;;  %v717_v25 = vld [vmem:[#allocation2 + $0x7b8] sm:$0xff] }
 0x1d9   : > { %3434 = vmatpush1.bf16.msra.mxu0 %v6552_v49  ;;  %3412 = vmatprep.subr.bf16.mxu1 %v6465_v45  ;;  %v761_v26 = vld [vmem:[#allocation2 + $0x918] sm:$0xff]  ;;  %v6632_v38 = vcombine.low %v713_v24, %v717_v25 }
 0x1da   : > { %3435 = vmatprep.subr.bf16.mxu0 %v6545_v41  ;;  %v765_v27 = vld [vmem:[#allocation2 + $0x938] sm:$0xff] }
 0x1db   : > { %v6681_v31 = vcombine.high %v761_v26, %v765_v27  ;;  %v753_v37 = vld [vmem:[#allocation2 + $0x8d8] sm:$0xff]  ;;  %v6680_v41 = vcombine.low %v761_v26, %v765_v27  ;;  %v3037_v27 = vpop.f32.mrf.mxu1 }
 0x1dc   : > { %3413 = vmatpush2.bf16.msra.mxu1 %v6464_v53  ;;  %v757_v49 = vld [vmem:[#allocation2 + $0x8f8] sm:$0xff] }
 0x1dd   : > { %3436 = vmatpush1.bf16.msra.mxu0 %v6544_v52  ;;  %3414 = vmatprep.subr.bf16.mxu1 %v6457_v55  ;;  %v6673_v42 = vcombine.high %v753_v37, %v757_v49  ;;  %v697_v44 = vld [vmem:[#allocation2 + $0x718] sm:$0xff]  ;;  %v6672_v52 = vcombine.low %v753_v37, %v757_v49 }
 0x1de   : > { %3437 = vmatprep.subr.bf16.mxu0 %v6537_v54  ;;  %v701_v45 = vld [vmem:[#allocation2 + $0x738] sm:$0xff] }
 0x1df   : > { %v745_v47 = vld [vmem:[#allocation2 + $0x898] sm:$0xff]  ;;  %v6617_v53 = vcombine.high %v697_v44, %v701_v45 }
 0x1e0   : > { %3415 = vmatpush2.bf16.msra.mxu1 %v6456_v1  ;;  %v749_v50 = vld [vmem:[#allocation2 + $0x8b8] sm:$0xff]  ;;  %v2909_v1 = vadd.f32 %v8258_v57, %v871_v60 }
 0x1e1   : > { %3438 = vmatpush1.bf16.msra.mxu0 %v6536_v0  ;;  %3470 = vmatprep.subr.bf16.mxu1 %v6705_v3  ;;  %v6665_v54 = vcombine.high %v745_v47, %v749_v50  ;;  %v689_v55 = vld [vmem:[#allocation2 + $0x6d8] sm:$0xff]  ;;  %v6616_v0 = vcombine.low %v697_v44, %v701_v45 }
 0x1e2   : > { %3439 = vmatprep.subr.bf16.mxu0 %v6529_v2  ;;  %v693_v56 = vld [vmem:[#allocation2 + $0x6f8] sm:$0xff]  ;;  %v6664_v2 = vcombine.low %v745_v47, %v749_v50  ;;  %v2952_v16 = vadd.f32 %v8256_v48, %v2909_v1 }
 0x1e3   : > { %3417 = vmatmul.mubr.bf16.vlgmr.msra.gmra.mxu1 %v8198_v20  ;;  %v6633_v20 = vcombine.high %v713_v24, %v717_v25  ;;  %v737_v61 = vld [vmem:[#allocation2 + $0x858] sm:$0xff]  ;;  %v6609_v3 = vcombine.high %v689_v55, %v693_v56 }
 0x1e4   : > { %3471 = vmatpush1.bf16.msra.mxu1 %v6704_v13  ;;  %3502 = vmatprep.mubr.bf16.mxu1 %v8205_v32  ;;  %v6625_v32 = vcombine.high %v705_v35, %v709_v36  ;;  %v741_v62 = vld [vmem:[#allocation2 + $0x878] sm:$0xff] }
 0x1e5   : > { %3440 = vmatpush1.bf16.msra.mxu0 %v6528_v11  ;;  %3472 = vmatprep.subr.bf16.mxu1 %v6697_v15  ;;  %v6657_v4 = vcombine.high %v737_v61, %v741_v62  ;;  %v681_v6 = vld [vmem:[#allocation2 + $0x698] sm:$0xff]  ;;  %v6608_v15 = vcombine.low %v689_v55, %v693_v56  ;;  %v6656_v17 = vcombine.low %v737_v61, %v741_v62 }
 0x1e6   : > { %3441 = vmatprep.subr.bf16.mxu0 %v6521_v14  ;;  %v685_v8 = vld [vmem:[#allocation2 + $0x6b8] sm:$0xff]  ;;  %v2994_v14 = vpop.f32.mrf.mxu0 }
 0x1e7   : > { %v729_v11 = vld [vmem:[#allocation2 + $0x818] sm:$0xff]  ;;  %v6601_v57 = vcombine.high %v681_v6, %v685_v8  ;;  %v6600_v24 = vcombine.low %v681_v6, %v685_v8 }
 0x1e8   : > { %3473 = vmatpush1.bf16.msra.mxu1 %v6696_v21  ;;  %v733_v13 = vld [vmem:[#allocation2 + $0x838] sm:$0xff]  ;;  %v2948_v21 = vadd.f32 %v8247_v34, %v2905_v9 }
 0x1e9   : > { %3442 = vmatpush1.bf16.msra.mxu0 %v6520_v33  ;;  %3474 = vmatprep.subr.bf16.mxu1 %v6689_v22  ;;  %v6649_v18 = vcombine.high %v729_v11, %v733_v13  ;;  %v673_v19 = vld [vmem:[#allocation2 + $0x658] sm:$0xff]  ;;  %v6648_v26 = vcombine.low %v729_v11, %v733_v13 }
 0x1ea   : > { %3443 = vmatprep.subr.bf16.mxu0 %v6641_v63  ;;  %v677_v33 = vld [vmem:[#allocation2 + $0x678] sm:$0xff]  ;;  %v2995_v63 = vadd.f32 %v2994_v14, %v2952_v16  ;;  %v2991_v25 = vadd.f32 %v8265_v12, %v2948_v21 }
 0x1eb   : > { %v849_v22 = vld [vmem:[#allocation2 + $0xbd8] sm:$0xff]  ;;  %v6593_v48 = vcombine.high %v673_v19, %v677_v33  ;;  %v6592_v34 = vcombine.low %v673_v19, %v677_v33 }
 0x1ec   : > { %3475 = vmatpush1.bf16.msra.mxu1 %v6688_v30  ;;  %v853_v29 = vld [vmem:[#allocation2 + $0xbf8] sm:$0xff]  ;;  %v3034_v37 = vadd.f32 %v8263_v10, %v2991_v25 }
 0x1ed   : > { %3444 = vmatpush2.bf16.msra.mxu0 %v6640_v28  ;;  %3476 = vmatprep.subr.bf16.mxu1 %v6681_v31  ;;  %v6769_v28 = vcombine.high %v849_v22, %v853_v29  ;;  %v665_v30 = vld [vmem:[#allocation2 + $0x618] sm:$0xff]  ;;  %v3038_v31 = vadd.f32 %v3037_v27, %v2995_v63  ;;  %v6768_v49 = vcombine.low %v849_v22, %v853_v29 }
 0x1ee   : > { %3445 = vmatprep.subr.bf16.mxu0 %v6633_v20  ;;  %v669_v20 = vld [vmem:[#allocation2 + $0x638] sm:$0xff]  ;;  %v3573_v50 = vmul.f32 0.2, %v3034_v37  ;;  %vm3557_vm4 = vcmp.gt.f32.partialorder %v3034_v37, 0.0 }
 0x1ef   : > { %v841_v35 = vld [vmem:[#allocation2 + $0xb98] sm:$0xff]  ;;  %v6585_v12 = vcombine.high %v665_v30, %v669_v20  ;;  %vm3565_vm3 = vcmp.gt.f32.partialorder %v3038_v31, 0.0  ;;  %v6584_v47 = vcombine.low %v665_v30, %v669_v20 }
 0x1f0   : > { %3477 = vmatpush1.bf16.msra.mxu1 %v6680_v41  ;;  %v845_v36 = vld [vmem:[#allocation2 + $0xbb8] sm:$0xff] }
 0x1f1   : > { %3446 = vmatpush2.bf16.msra.mxu0 %v6632_v38  ;;  %3478 = vmatprep.subr.bf16.mxu1 %v6673_v42  ;;  %v874_v38 = vsub.s32 2, %v8232_v59  ;;  %v6761_v41 = vcombine.high %v841_v35, %v845_v36  ;;  %v3074_v42 = vpop.f32.mrf.mxu1  ;;  %v833_v44 = vld [vmem:[#allocation2 + $0xb58] sm:$0xff] }
 0x1f2   : > { %3447 = vmatprep.subr.bf16.mxu0 %v6625_v32  ;;  %v3581_v32 = vmul.f32 0.2, %v3038_v31  ;;  %v837_v45 = vld [vmem:[#allocation2 + $0xb78] sm:$0xff] }
 0x1f3   : > { %v7244_v10 = vld [vmem:[#allocation6 + $0xe4] ss:$16 sps:$4 sm:$0xff]   ;;  %v7242_v61 = vld [vmem:[#allocation6 + $0xe0] ss:$16 sps:$4 sm:$0xff]   ;;  %v6752_v62 = vcombine.low %v833_v44, %v837_v45 }
 0x1f4   : > { %3479 = vmatpush1.bf16.msra.mxu1 %v6672_v52  ;;  %v875_v52 = vrot.slane %v8237_v7, %v874_v38  ;;  %v825_v55 = vld [vmem:[#allocation2 + $0xb18] sm:$0xff]  ;;  %v3597_v60 = vsel %vm3565_vm3, %v3038_v31, %v3581_v32 }
 0x1f5   : > { %3448 = vmatpush2.bf16.msra.mxu0 %v6624_v51  ;;  %3480 = vmatprep.subr.bf16.mxu1 %v6665_v54  ;;  %v6760_v51 = vcombine.low %v841_v35, %v845_v36  ;;  %v8287_v54 = vpop.f32.mrf.mxu1  ;;  %v829_v56 = vld [vmem:[#allocation2 + $0xb38] sm:$0xff] }
 0x1f6   : > { %3449 = vmatprep.subr.bf16.mxu0 %v6617_v53  ;;  %v6753_v53 = vcombine.high %v833_v44, %v837_v45  ;;  %v7247_v1 = vld [vmem:[#allocation6 + $0xc4] ss:$16 sps:$4 sm:$0xff]   ;;  %v7245_v14 = vld [vmem:[#allocation6 + $0xc0] ss:$16 sps:$4 sm:$0xff]  }
 0x1f7   : > { %v3078_v6 = vpop.f32.mrf.mxu1  ;;  %v817_v9 = vld [vmem:[#allocation2 + $0xad8] sm:$0xff] }
 0x1f8   : > { %3481 = vmatpush1.bf16.msra.mxu1 %v6664_v2  ;;  %v3075_v2 = vadd.f32 %v3074_v42, %v875_v52  ;;  %v821_v11 = vld [vmem:[#allocation2 + $0xaf8] sm:$0xff] }
 0x1f9   : > { %3450 = vmatpush2.bf16.msra.mxu0 %v6616_v0  ;;  %3482 = vmatprep.subr.bf16.mxu1 %v6657_v4  ;;  %v3589_v0 = vsel %vm3557_vm4, %v3034_v37, %v3573_v50  ;;  %v809_v33 = vld [vmem:[#allocation2 + $0xa98] sm:$0xff]  ;;  %v6736_v22 = vcombine.low %v817_v9, %v821_v11  ;;  %v3080_v25 = vpop.f32.mrf.mxu1 }
 0x1fa   : > { %3451 = vmatprep.subr.bf16.mxu0 %v6609_v3  ;;  %v6745_v3 = vcombine.high %v825_v55, %v829_v56  ;;  %v8289_v4 = vpack.c.bf16 %v3597_v60, %v3589_v0  ;;  %v813_v21 = vld [vmem:[#allocation2 + $0xab8] sm:$0xff] }
 0x1fb   : > { %v7253_v29 = vld [vmem:[#allocation6 + $0x84] ss:$16 sps:$4 sm:$0xff]   ;;  %v7251_v30 = vld [vmem:[#allocation6 + $0x80] ss:$16 sps:$4 sm:$0xff]   ;;  %v6728_v31 = vcombine.low %v809_v33, %v813_v21 }
 0x1fc   : > { %3483 = vmatpush1.bf16.msra.mxu1 %v6656_v17  ;;  %v7250_v17 = vld [vmem:[#allocation6 + $0xa4] ss:$16 sps:$4 sm:$0xff]   ;;  %v7254_v32 = vld [vmem:[#allocation6 + $0x60] ss:$16 sps:$4 sm:$0xff]  }
 0x1fd   : > { %3452 = vmatpush2.bf16.msra.mxu0 %v6608_v15  ;;  %3484 = vmatprep.subr.bf16.mxu1 %v6649_v18  ;;  %v6744_v15 = vcombine.low %v825_v55, %v829_v56  ;;  %v6737_v18 = vcombine.high %v817_v9, %v821_v11  ;;  %v805_v27 = vld [vmem:[#allocation2 + $0xa78] sm:$0xff] }
 0x1fe   : > { %3453 = vmatprep.subr.bf16.mxu0 %v6601_v57  ;;  %v3079_v57 = vadd.f32 %v3078_v6, %v875_v52  ;;  %v7256_v35 = vld [vmem:[#allocation6 + $0x64] ss:$16 sps:$4 sm:$0xff]   ;;  %v7257_v56 = vld [vmem:[#allocation6 + $0x40] ss:$16 sps:$4 sm:$0xff]  }
 0x1ff   : > { %v7259_v45 = vld [vmem:[#allocation6 + $0x44] ss:$16 sps:$4 sm:$0xff]   ;;  %v7260_v11 = vld [vmem:[#allocation6 + $0x20] ss:$16 sps:$4 sm:$0xff]  }
 0x200   : > { %3485 = vmatpush1.bf16.msra.mxu1 %v6648_v26  ;;  %v6729_v26 = vcombine.high %v809_v33, %v813_v21  ;;  %v7262_v0 = vld [vmem:[#allocation6 + $0x24] ss:$16 sps:$4 sm:$0xff]  }
 0x201   : > { %3454 = vmatpush2.bf16.msra.mxu0 %v6600_v24  ;;  %3486 = vmatprep.subr.bf16.mxu1 %v6769_v28  ;;  %v878_v24 = vsub.s32 3, %v8232_v59 }
 0x202   : > { %3455 = vmatprep.subr.bf16.mxu0 %v6593_v48  ;;  %v801_v48 = vld [vmem:[#allocation2 + $0xa58] sm:$0xff] }
 0x203   : > { %v879_v36 = vrot.slane %v8237_v7, %v878_v24  ;;  %v6721_v37 = vcombine.high %v801_v48, %v805_v27  ;;  %v6720_v44 = vcombine.low %v801_v48, %v805_v27  ;;  %v861_v7 = vld [vmem:[#allocation2 + $0xc38] sm:$0xff] }
 0x204   : > { %3487 = vmatpush2.bf16.msra.mxu1 %v6768_v49  ;;  %v793_v49 = vld [vmem:[#allocation2 + $0xa18] sm:$0xff] }
 0x205   : > { %3456 = vmatpush2.bf16.msra.mxu0 %v6592_v34  ;;  %3488 = vmatprep.subr.bf16.mxu1 %v6761_v41  ;;  %v3081_v60 = vadd.f32 %v3080_v25, %v879_v36  ;;  %v7269_v27 = vld [vmem:[#allocation6 + $0x1e0] ss:$16 sps:$4 sm:$0xff]  }
 0x206   : > { %3457 = vmatprep.subr.bf16.mxu0 %v6585_v12  ;;  %v797_v12 = vld [vmem:[#allocation2 + $0xa38] sm:$0xff] }
 0x208   : > { %3489 = vmatpush2.bf16.msra.mxu1 %v6760_v51  ;;  %v6713_v51 = vcombine.high %v793_v49, %v797_v12 }
 0x209   : > { %3458 = vmatpush2.bf16.msra.mxu0 %v6584_v47  ;;  %3490 = vmatprep.subr.bf16.mxu1 %v6753_v53  ;;  %v3077_v47 = vadd.f32 %v8287_v54, %v879_v36  ;;  %v7280_v36 = vld [vmem:[#allocation6 + $0x2a4] ss:$16 sps:$4 sm:$0xff]  }
 0x20a   : > { %5170 = vmatprep.subr.bf16.mxu0 %v7244_v10  ;;  %v857_v10 = vld [vmem:[#allocation2 + $0xc18] sm:$0xff] }
 0x20b   : > { %v6777_v54 = vcombine.high %v857_v10, %v861_v7 }
 0x20c   : > { %v3117_v8 = vpop.f32.mrf.mxu0  ;;  %3460 = vmatmul.mubr.bf16.vlgmr.msra.gmra.mxu0 %v8200_v23  ;;  %3491 = vmatpush2.bf16.msra.mxu1 %v6752_v62  ;;  %v7248_v23 = vld [vmem:[#allocation6 + $0xa0] ss:$16 sps:$4 sm:$0xff]   ;;  %v6712_v62 = vcombine.low %v793_v49, %v797_v12  ;;  %v7289_v49 = vld [vmem:[#allocation6 + $0x184] ss:$16 sps:$4 sm:$0xff]  }
 0x20d   : > { %v3118_v13 = vadd.f32 %v3117_v8, %v3075_v2  ;;  %5171 = vmatpush1.bf16.msra.mxu0 %v7242_v61  ;;  %5202 = vmatprep.mubr.bf16.mxu0 %v8289_v4  ;;  %v7286_v12 = vld [vmem:[#allocation6 + $0x284] ss:$16 sps:$4 sm:$0xff]  }
 0x20e   : > { %v3119_v16 = vpop.f32.mrf.mxu0  ;;  %5172 = vmatprep.subr.bf16.mxu0 %v7247_v1  ;;  %3492 = vmatprep.subr.bf16.mxu1 %v6745_v3 }
 0x20f   : > { %v3120_v52 = vadd.f32 %v3119_v16, %v3077_v47  ;;  %v7301_v47 = vld [vmem:[#allocation6 + $0x144] ss:$16 sps:$4 sm:$0xff]  }
 0x210   : > { %v3121_v19 = vpop.f32.mrf.mxu0  ;;  %3493 = vmatpush2.bf16.msra.mxu1 %v6744_v15  ;;  %v6776_v15 = vcombine.low %v857_v10, %v861_v7  ;;  %v7296_v10 = vld [vmem:[#allocation6 + $0x240] ss:$16 sps:$4 sm:$0xff]   ;;  %v7307_v7 = vld [vmem:[#allocation6 + $0x124] ss:$16 sps:$4 sm:$0xff]  }
 0x211   : > { %v3122_v63 = vadd.f32 %v3121_v19, %v3079_v57  ;;  %5173 = vmatpush1.bf16.msra.mxu0 %v7245_v14  ;;  %3494 = vmatprep.subr.bf16.mxu1 %v6737_v18  ;;  %v7268_v57 = vld [vmem:[#allocation6 + $0x2e4] ss:$16 sps:$4 sm:$0xff]  }
 0x212   : > { %5174 = vmatprep.subr.bf16.mxu0 %v7250_v17  ;;  %v3123_v53 = vpop.f32.mrf.mxu0  ;;  %v7265_v17 = vld [vmem:[#allocation6 + $0x4] ss:$16 sps:$4 sm:$0xff]  }
 0x213   : > { %v3160_v28 = vpop.f32.mrf.mxu1  ;;  %v3124_v3 = vadd.f32 %v3123_v53, %v3081_v60  ;;  %v7305_v53 = vld [vmem:[#allocation6 + $0x120] ss:$16 sps:$4 sm:$0xff]   ;;  %v7310_v60 = vld [vmem:[#allocation6 + $0x204] ss:$16 sps:$4 sm:$0xff]  }
 0x214   : > { %3495 = vmatpush2.bf16.msra.mxu1 %v6736_v22  ;;  %v3161_v20 = vadd.f32 %v3160_v28, %v3118_v13  ;;  %v7266_v28 = vld [vmem:[#allocation6 + $0x2e0] ss:$16 sps:$4 sm:$0xff]  }
 0x215   : > { %5175 = vmatpush1.bf16.msra.mxu0 %v7248_v23  ;;  %v3162_v34 = vpop.f32.mrf.mxu1  ;;  %3496 = vmatprep.subr.bf16.mxu1 %v6729_v26 }
 0x216   : > { %5176 = vmatprep.subr.bf16.mxu0 %v7253_v29  ;;  %v3163_v1 = vadd.f32 %v3162_v34, %v3120_v52  ;;  %v7271_v29 = vld [vmem:[#allocation6 + $0x1e4] ss:$16 sps:$4 sm:$0xff]   ;;  %v7281_v34 = vld [vmem:[#allocation6 + $0x1a0] ss:$16 sps:$4 sm:$0xff]  }
 0x217   : > { %v3164_v41 = vpop.f32.mrf.mxu1  ;;  %v7304_v52 = vld [vmem:[#allocation6 + $0x224] ss:$16 sps:$4 sm:$0xff]  }
 0x218   : > { %3497 = vmatpush2.bf16.msra.mxu1 %v6728_v31  ;;  %v3165_v42 = vadd.f32 %v3164_v41, %v3122_v63  ;;  %v7263_v63 = vld [vmem:[#allocation6] ss:$16 sps:$4 sm:$0xff]  }
 0x219   : > { %5177 = vmatpush1.bf16.msra.mxu0 %v7251_v30  ;;  %v3166_v50 = vpop.f32.mrf.mxu1  ;;  %3498 = vmatprep.subr.bf16.mxu1 %v6721_v37  ;;  %v7274_v30 = vld [vmem:[#allocation6 + $0x2c4] ss:$16 sps:$4 sm:$0xff]   ;;  %v7272_v31 = vld [vmem:[#allocation6 + $0x2c0] ss:$16 sps:$4 sm:$0xff]  }
 0x21a   : > { %5178 = vmatprep.subr.bf16.mxu0 %v7256_v35  ;;  %v3167_v13 = vadd.f32 %v3166_v50, %v3124_v3  ;;  %v7283_v35 = vld [vmem:[#allocation6 + $0x1a4] ss:$16 sps:$4 sm:$0xff]   ;;  %v7278_v37 = vld [vmem:[#allocation6 + $0x2a0] ss:$16 sps:$4 sm:$0xff]  }
 0x21b   : > { %v3203_v55 = vpop.f32.mrf.mxu1  ;;  %v7284_v41 = vld [vmem:[#allocation6 + $0x280] ss:$16 sps:$4 sm:$0xff]   ;;  %v7298_v50 = vld [vmem:[#allocation6 + $0x244] ss:$16 sps:$4 sm:$0xff]  }
 0x21c   : > { %3499 = vmatpush2.bf16.msra.mxu1 %v6720_v44  ;;  %v3204_v61 = vadd.f32 %v3203_v55, %v3161_v20  ;;  %v7277_v20 = vld [vmem:[#allocation6 + $0x1c4] ss:$16 sps:$4 sm:$0xff]   ;;  %v7293_v44 = vld [vmem:[#allocation6 + $0x160] ss:$16 sps:$4 sm:$0xff]  }
 0x21d   : > { %5179 = vmatpush1.bf16.msra.mxu0 %v7254_v32  ;;  %v3205_v2 = vpop.f32.mrf.mxu1  ;;  %3500 = vmatprep.subr.bf16.mxu1 %v6713_v51  ;;  %v7295_v32 = vld [vmem:[#allocation6 + $0x164] ss:$16 sps:$4 sm:$0xff]   ;;  %v7299_v51 = vld [vmem:[#allocation6 + $0x140] ss:$16 sps:$4 sm:$0xff]  }
 0x21e   : > { %5180 = vmatprep.subr.bf16.mxu0 %v7259_v45  ;;  %v3574_v6 = vmul.f32 0.2, %v3204_v61  ;;  %v3206_v8 = vadd.f32 %v3205_v2, %v3163_v1  ;;  %vm3558_vm5 = vcmp.gt.f32.partialorder %v3204_v61, 0.0  ;;  %v7290_v45 = vld [vmem:[#allocation6 + $0x260] ss:$16 sps:$4 sm:$0xff]  }
 0x21f   : > { %v3207_v9 = vpop.f32.mrf.mxu1  ;;  %v7302_v55 = vld [vmem:[#allocation6 + $0x220] ss:$16 sps:$4 sm:$0xff]   ;;  %v7316_v1 = vld [vmem:[#allocation6 + $0x3e4] ss:$16 sps:$4 sm:$0xff]  }
 0x220   : > { %3501 = vmatpush2.bf16.msra.mxu1 %v6712_v62  ;;  %v3208_v14 = vadd.f32 %v3207_v9, %v3165_v42  ;;  %v3590_v33 = vsel %vm3558_vm5, %v3204_v61, %v3574_v6  ;;  %v3575_v21 = vmul.f32 0.2, %v3206_v8  ;;  %vm3559_vm7 = vcmp.gt.f32.partialorder %v3206_v8, 0.0  ;;  %v7292_v42 = vld [vmem:[#allocation6 + $0x264] ss:$16 sps:$4 sm:$0xff]  }
 0x221   : > { %5181 = vmatpush1.bf16.msra.mxu0 %v7257_v56  ;;  %v3209_v16 = vpop.f32.mrf.mxu1  ;;  %3527 = vmatprep.subr.bf16.mxu1 %v6777_v54  ;;  %v7313_v56 = vld [vmem:[#allocation6 + $0x104] ss:$16 sps:$4 sm:$0xff]   ;;  %v7311_v61 = vld [vmem:[#allocation6 + $0x100] ss:$16 sps:$4 sm:$0xff]  }
 0x222   : > { %5182 = vmatprep.subr.bf16.mxu0 %v7262_v0  ;;  %vm3566_vm6 = vcmp.gt.f32.partialorder %v3208_v14, 0.0  ;;  %v3582_v18 = vmul.f32 0.2, %v3208_v14  ;;  %v3210_v19 = vadd.f32 %v3209_v16, %v3167_v13  ;;  %v3591_v48 = vsel %vm3559_vm7, %v3206_v8, %v3575_v21  ;;  %v7308_v62 = vld [vmem:[#allocation6 + $0x200] ss:$16 sps:$4 sm:$0xff]  }
 0x223   : > { %3503 = vmatmul.mubr.bf16.vlgmr.msra.gmra.mxu1 %v8219_v40  ;;  %v7334_v0 = vld [vmem:[#allocation6 + $0x4e4] ss:$16 sps:$4 sm:$0xff]   ;;  %v7332_v2 = vld [vmem:[#allocation6 + $0x4e0] ss:$16 sps:$4 sm:$0xff]  }
 0x224   : > { %v3598_v23 = vsel %vm3566_vm6, %v3208_v14, %v3582_v18  ;;  %vm3567_vm8 = vcmp.gt.f32.partialorder %v3210_v19, 0.0  ;;  %v3583_v22 = vmul.f32 0.2, %v3210_v19  ;;  %3528 = vmatpush1.bf16.msra.mxu1 %v6776_v15  ;;  %3545 = vmatprep.mubr.bf16.mxu1 %v7999_v39  ;;  %v7275_v39 = vld [vmem:[#allocation6 + $0x1c0] ss:$16 sps:$4 sm:$0xff]  }
 0x225   : > { %5183 = vmatpush1.bf16.msra.mxu0 %v7260_v11  ;;  %v8300_v25 = vpack.c.bf16 %v3598_v23, %v3590_v33  ;;  %5213 = vmatprep.subr.bf16.mxu1 %v7268_v57  ;;  %v7314_v54 = vld [vmem:[#allocation6 + $0x3e0] ss:$16 sps:$4 sm:$0xff]   ;;  %v7340_v3 = vld [vmem:[#allocation6 + $0x4c4] ss:$16 sps:$4 sm:$0xff]  }
 0x226   : > { %5184 = vmatprep.subr.bf16.mxu0 %v7265_v17  ;;  %v3599_v26 = vsel %vm3567_vm8, %v3210_v19, %v3583_v22  ;;  %v7319_v6 = vld [vmem:[#allocation6 + $0x3c4] ss:$16 sps:$4 sm:$0xff]   ;;  %v7338_v8 = vld [vmem:[#allocation6 + $0x4c0] ss:$16 sps:$4 sm:$0xff]  }
 0x227   : > { %v8302_v40 = vpack.c.bf16 %v3599_v26, %v3591_v48  ;;  %v7317_v9 = vld [vmem:[#allocation6 + $0x3c0] ss:$16 sps:$4 sm:$0xff]   ;;  %v7346_v11 = vld [vmem:[#allocation6 + $0x4a4] ss:$16 sps:$4 sm:$0xff]  }
 0x228   : > { %v7322_v13 = vld [vmem:[#allocation6 + $0x3a4] ss:$16 sps:$4 sm:$0xff]   ;;  %v7344_v14 = vld [vmem:[#allocation6 + $0x4a0] ss:$16 sps:$4 sm:$0xff]  }
 0x229   : > { %5185 = vmatpush1.bf16.msra.mxu0 %v7263_v63  ;;  %v7320_v15 = vld [vmem:[#allocation6 + $0x3a0] ss:$16 sps:$4 sm:$0xff]   ;;  %v7349_v16 = vld [vmem:[#allocation6 + $0x484] ss:$16 sps:$4 sm:$0xff]  }
 0x22a   : > { %5186 = vmatprep.subr.bf16.mxu0 %v7271_v29  ;;  %v7325_v17 = vld [vmem:[#allocation6 + $0x384] ss:$16 sps:$4 sm:$0xff]   ;;  %v7347_v57 = vld [vmem:[#allocation6 + $0x480] ss:$16 sps:$4 sm:$0xff]  }
 0x22b   : > { %6781 = vmatmul.mubr.msk.bf16.vlgmr.msra.gmra.mxu1 %vm2864_vm0, %v8212_v43  ;;  %v7287_v43 = vld [vmem:[#allocation6 + $0x180] ss:$16 sps:$4 sm:$0xff]   ;;  %v7352_v19 = vld [vmem:[#allocation6 + $0x464] ss:$16 sps:$4 sm:$0xff]  }
 0x22c   : > { %5214 = vmatpush1.bf16.msra.mxu1 %v7266_v28  ;;  %5245 = vmatprep.mubr.bf16.mxu1 %v8302_v40  ;;  %v7323_v18 = vld [vmem:[#allocation6 + $0x380] ss:$16 sps:$4 sm:$0xff]   ;;  %v7328_v33 = vld [vmem:[#allocation6 + $0x364] ss:$16 sps:$4 sm:$0xff]  }
 0x22d   : > { %5187 = vmatpush2.bf16.msra.mxu0 %v7269_v27  ;;  %5215 = vmatprep.subr.bf16.mxu1 %v7274_v30  ;;  %v7350_v21 = vld [vmem:[#allocation6 + $0x460] ss:$16 sps:$4 sm:$0xff]   ;;  %v7355_v23 = vld [vmem:[#allocation6 + $0x444] ss:$16 sps:$4 sm:$0xff]  }
 0x22e   : > { %5188 = vmatprep.subr.bf16.mxu0 %v7277_v20  ;;  %v7326_v63 = vld [vmem:[#allocation6 + $0x360] ss:$16 sps:$4 sm:$0xff]   ;;  %v7331_v22 = vld [vmem:[#allocation6 + $0x344] ss:$16 sps:$4 sm:$0xff]  }
 0x22f   : > { %v7353_v29 = vld [vmem:[#allocation6 + $0x440] ss:$16 sps:$4 sm:$0xff]   ;;  %v7358_v48 = vld [vmem:[#allocation6 + $0x424] ss:$16 sps:$4 sm:$0xff]  }
 0x230   : > { %5216 = vmatpush1.bf16.msra.mxu1 %v7272_v31  ;;  %v7329_v26 = vld [vmem:[#allocation6 + $0x340] ss:$16 sps:$4 sm:$0xff]   ;;  %v7337_v27 = vld [vmem:[#allocation6 + $0x324] ss:$16 sps:$4 sm:$0xff]  }
 0x231   : > { %5189 = vmatpush2.bf16.msra.mxu0 %v7275_v39  ;;  %5217 = vmatprep.subr.bf16.mxu1 %v7280_v36  ;;  %v7356_v28 = vld [vmem:[#allocation6 + $0x420] ss:$16 sps:$4 sm:$0xff]   ;;  %v7361_v20 = vld [vmem:[#allocation6 + $0x404] ss:$16 sps:$4 sm:$0xff]  }
 0x232   : > { %5190 = vmatprep.subr.bf16.mxu0 %v7283_v35  ;;  %v7335_v30 = vld [vmem:[#allocation6 + $0x320] ss:$16 sps:$4 sm:$0xff]   ;;  %v7343_v39 = vld [vmem:[#allocation6 + $0x304] ss:$16 sps:$4 sm:$0xff]  }
 0x233   : > { %v7359_v31 = vld [vmem:[#allocation6 + $0x400] ss:$16 sps:$4 sm:$0xff]   ;;  %v7364_v36 = vld [vmem:[#allocation6 + $0x5e4] ss:$16 sps:$4 sm:$0xff]  }
 0x234   : > { %5218 = vmatpush1.bf16.msra.mxu1 %v7278_v37  ;;  %v7341_v35 = vld [vmem:[#allocation6 + $0x300] ss:$16 sps:$4 sm:$0xff]  }
 0x235   : > { %5191 = vmatpush2.bf16.msra.mxu0 %v7281_v34  ;;  %5219 = vmatprep.subr.bf16.mxu1 %v7286_v12  ;;  %v7409_v34 = vld [vmem:[#allocation6 + $0x6e4] ss:$16 sps:$4 sm:$0xff]   ;;  %v7362_v37 = vld [vmem:[#allocation6 + $0x5e0] ss:$16 sps:$4 sm:$0xff]  }
 0x236   : > { %5192 = vmatprep.subr.bf16.mxu0 %v7289_v49  ;;  %v7367_v49 = vld [vmem:[#allocation6 + $0x5c4] ss:$16 sps:$4 sm:$0xff]   ;;  %v7407_v12 = vld [vmem:[#allocation6 + $0x6e0] ss:$16 sps:$4 sm:$0xff]  }
 0x238   : > { %5220 = vmatpush1.bf16.msra.mxu1 %v7284_v41  ;;  %v7365_v41 = vld [vmem:[#allocation6 + $0x5c0] ss:$16 sps:$4 sm:$0xff]  }
 0x239   : > { %5193 = vmatpush2.bf16.msra.mxu0 %v7287_v43  ;;  %5221 = vmatprep.subr.bf16.mxu1 %v7292_v42  ;;  %v7415_v43 = vld [vmem:[#allocation6 + $0x6c4] ss:$16 sps:$4 sm:$0xff]   ;;  %v7413_v42 = vld [vmem:[#allocation6 + $0x6c0] ss:$16 sps:$4 sm:$0xff]  }
 0x23a   : > { %5194 = vmatprep.subr.bf16.mxu0 %v7295_v32  ;;  %v7370_v32 = vld [vmem:[#allocation6 + $0x5a4] ss:$16 sps:$4 sm:$0xff]  }
 0x23c   : > { %5222 = vmatpush1.bf16.msra.mxu1 %v7290_v45  ;;  %v7368_v45 = vld [vmem:[#allocation6 + $0x5a0] ss:$16 sps:$4 sm:$0xff]  }
 0x23d   : > { %5195 = vmatpush2.bf16.msra.mxu0 %v7293_v44  ;;  %5223 = vmatprep.subr.bf16.mxu1 %v7298_v50  ;;  %v7421_v44 = vld [vmem:[#allocation6 + $0x6a4] ss:$16 sps:$4 sm:$0xff]   ;;  %v7419_v50 = vld [vmem:[#allocation6 + $0x6a0] ss:$16 sps:$4 sm:$0xff]  }
 0x23e   : > { %5196 = vmatprep.subr.bf16.mxu0 %v7301_v47  ;;  %v7373_v47 = vld [vmem:[#allocation6 + $0x584] ss:$16 sps:$4 sm:$0xff]  }
 0x240   : > { %5224 = vmatpush1.bf16.msra.mxu1 %v7296_v10  ;;  %v7371_v10 = vld [vmem:[#allocation6 + $0x580] ss:$16 sps:$4 sm:$0xff]  }
 0x241   : > { %5197 = vmatpush2.bf16.msra.mxu0 %v7299_v51  ;;  %5225 = vmatprep.subr.bf16.mxu1 %v7304_v52  ;;  %v7427_v51 = vld [vmem:[#allocation6 + $0x684] ss:$16 sps:$4 sm:$0xff]   ;;  %v7425_v52 = vld [vmem:[#allocation6 + $0x680] ss:$16 sps:$4 sm:$0xff]  }
 0x242   : > { %5198 = vmatprep.subr.bf16.mxu0 %v7307_v7  ;;  %v7376_v7 = vld [vmem:[#allocation6 + $0x564] ss:$16 sps:$4 sm:$0xff]  }
 0x244   : > { %5226 = vmatpush1.bf16.msra.mxu1 %v7302_v55 }
 0x245   : > { %5199 = vmatpush2.bf16.msra.mxu0 %v7305_v53  ;;  %5227 = vmatprep.subr.bf16.mxu1 %v7310_v60  ;;  %v7433_v53 = vld [vmem:[#allocation6 + $0x664] ss:$16 sps:$4 sm:$0xff]  }
 0x246   : > { %5200 = vmatprep.subr.bf16.mxu0 %v7313_v56  ;;  %v7374_v56 = vld [vmem:[#allocation6 + $0x560] ss:$16 sps:$4 sm:$0xff]   ;;  %v7379_v60 = vld [vmem:[#allocation6 + $0x544] ss:$16 sps:$4 sm:$0xff]  }
 0x248   : > { %5228 = vmatpush1.bf16.msra.mxu1 %v7308_v62  ;;  %v7439_v62 = vld [vmem:[#allocation6 + $0x644] ss:$16 sps:$4 sm:$0xff]  }
 0x249   : > { %5201 = vmatpush2.bf16.msra.mxu0 %v7311_v61  ;;  %5229 = vmatprep.subr.bf16.mxu1 %v7316_v1  ;;  %v7431_v61 = vld [vmem:[#allocation6 + $0x660] ss:$16 sps:$4 sm:$0xff]  }
 0x24a   : > { %5256 = vmatprep.subr.bf16.mxu0 %v7334_v0  ;;  %v7377_v1 = vld [vmem:[#allocation6 + $0x540] ss:$16 sps:$4 sm:$0xff]  }
 0x24c   : > { %5203 = vmatmul.mubr.bf16.vlgmr.msra.gmra.mxu0 %v8268_v58  ;;  %5230 = vmatpush2.bf16.msra.mxu1 %v7314_v54  ;;  %v7382_v54 = vld [vmem:[#allocation6 + $0x524] ss:$16 sps:$4 sm:$0xff]  }
 0x24d   : > { %5257 = vmatpush1.bf16.msra.mxu0 %v7332_v2  ;;  %5231 = vmatprep.subr.bf16.mxu1 %v7319_v6  ;;  %v3246_v2 = vpop.f32.mrf.mxu0  ;;  %v7445_v6 = vld [vmem:[#allocation6 + $0x624] ss:$16 sps:$4 sm:$0xff]  }
 0x24e   : > { %5258 = vmatprep.subr.bf16.mxu0 %v7340_v3  ;;  %v7437_v3 = vld [vmem:[#allocation6 + $0x640] ss:$16 sps:$4 sm:$0xff]  }
 0x250   : > { %5232 = vmatpush2.bf16.msra.mxu1 %v7317_v9  ;;  %v886_v9 = vsub.s32 5, %v8232_v59 }
 0x251   : > { %5259 = vmatpush1.bf16.msra.mxu0 %v7338_v8  ;;  %5233 = vmatprep.subr.bf16.mxu1 %v7322_v13  ;;  %v882_v8 = vsub.s32 4, %v8232_v59  ;;  %v7380_v13 = vld [vmem:[#allocation6 + $0x520] ss:$16 sps:$4 sm:$0xff]  }
 0x252   : > { %5260 = vmatprep.subr.bf16.mxu0 %v7346_v11 }
 0x254   : > { %5234 = vmatpush2.bf16.msra.mxu1 %v7320_v15  ;;  %v7385_v15 = vld [vmem:[#allocation6 + $0x504] ss:$16 sps:$4 sm:$0xff]  }
 0x255   : > { %5261 = vmatpush1.bf16.msra.mxu0 %v7344_v14  ;;  %5235 = vmatprep.subr.bf16.mxu1 %v7325_v17  ;;  %v3248_v14 = vpop.f32.mrf.mxu0  ;;  %v7451_v17 = vld [vmem:[#allocation6 + $0x604] ss:$16 sps:$4 sm:$0xff]  }
 0x256   : > { %5262 = vmatprep.subr.bf16.mxu0 %v7349_v16  ;;  %v7443_v16 = vld [vmem:[#allocation6 + $0x620] ss:$16 sps:$4 sm:$0xff]  }
 0x258   : > { %5236 = vmatpush2.bf16.msra.mxu1 %v7323_v18 }
 0x259   : > { %5263 = vmatpush1.bf16.msra.mxu0 %v7347_v57  ;;  %5237 = vmatprep.subr.bf16.mxu1 %v7328_v33  ;;  %v8311_v57 = vld [vmem:[#allocation4] sm:$0xff] }
 0x25a   : > { %5264 = vmatprep.subr.bf16.mxu0 %v7352_v19  ;;  %v883_v18 = vrot.slane %v8311_v57, %v882_v8  ;;  %v887_v19 = vrot.slane %v8311_v57, %v886_v9 }
 0x25b   : > { %v3289_v55 = vpop.f32.mrf.mxu1 }
 0x25c   : > { %5238 = vmatpush2.bf16.msra.mxu1 %v7326_v63  ;;  %v3250_v63 = vpop.f32.mrf.mxu0 }
 0x25d   : > { %5265 = vmatpush1.bf16.msra.mxu0 %v7350_v21  ;;  %5239 = vmatprep.subr.bf16.mxu1 %v7331_v22  ;;  %v3291_v0 = vpop.f32.mrf.mxu1  ;;  %v7383_v21 = vld [vmem:[#allocation6 + $0x500] ss:$16 sps:$4 sm:$0xff]  }
 0x25e   : > { %5266 = vmatprep.subr.bf16.mxu0 %v7355_v23  ;;  %v7388_v23 = vld [vmem:[#allocation6 + $0xec] ss:$16 sps:$4 sm:$0xff]   ;;  %v7449_v22 = vld [vmem:[#allocation6 + $0x600] ss:$16 sps:$4 sm:$0xff]  }
 0x25f   : > { %v3293_v11 = vpop.f32.mrf.mxu1 }
 0x260   : > { %5240 = vmatpush2.bf16.msra.mxu1 %v7329_v26  ;;  %v3247_v26 = vadd.f32 %v3246_v2, %v883_v18 }
 0x261   : > { %5267 = vmatpush1.bf16.msra.mxu0 %v7353_v29  ;;  %5241 = vmatprep.subr.bf16.mxu1 %v7337_v27  ;;  %v3295_v33 = vpop.f32.mrf.mxu1  ;;  %v7457_v29 = vld [vmem:[#allocation6 + $0x7e4] ss:$16 sps:$4 sm:$0xff]  }
 0x262   : > { %5268 = vmatprep.subr.bf16.mxu0 %v7358_v48  ;;  %v3249_v48 = vadd.f32 %v3248_v14, %v887_v19 }
 0x263   : > { %v3375_v27 = vpop.f32.mrf.mxu1 }
 0x264   : > { %5242 = vmatpush2.bf16.msra.mxu1 %v7335_v30  ;;  %v7455_v30 = vld [vmem:[#allocation6 + $0x7e0] ss:$16 sps:$4 sm:$0xff]  }
 0x265   : > { %5269 = vmatpush1.bf16.msra.mxu0 %v7356_v28  ;;  %5243 = vmatprep.subr.bf16.mxu1 %v7343_v39  ;;  %v3252_v28 = vpop.f32.mrf.mxu0  ;;  %v7463_v39 = vld [vmem:[#allocation6 + $0x7c4] ss:$16 sps:$4 sm:$0xff]  }
 0x266   : > { %5270 = vmatprep.subr.bf16.mxu0 %v7361_v20  ;;  %v3251_v20 = vadd.f32 %v3250_v63, %v883_v18  ;;  %v7487_v18 = vld [vmem:[#allocation6 + $0x744] ss:$16 sps:$4 sm:$0xff]   ;;  %v7394_v63 = vld [vmem:[#allocation6 + $0xac] ss:$16 sps:$4 sm:$0xff]  }
 0x268   : > { %5244 = vmatpush2.bf16.msra.mxu1 %v7341_v35  ;;  %v3290_v35 = vadd.f32 %v3289_v55, %v3247_v26  ;;  %v7475_v55 = vld [vmem:[#allocation6 + $0x784] ss:$16 sps:$4 sm:$0xff]   ;;  %v7397_v26 = vld [vmem:[#allocation6 + $0x8c] ss:$16 sps:$4 sm:$0xff]  }
 0x269   : > { %5271 = vmatpush1.bf16.msra.mxu0 %v7359_v31  ;;  %5299 = vmatprep.subr.bf16.mxu1 %v7409_v34  ;;  %v3377_v34 = vpop.f32.mrf.mxu1 }
 0x26a   : > { %5272 = vmatprep.subr.bf16.mxu0 %v7364_v36  ;;  %v3292_v36 = vadd.f32 %v3291_v0, %v3249_v48  ;;  %v7497_v48 = vld [vmem:[#allocation6 + $0x700] ss:$16 sps:$4 sm:$0xff]  }
 0x26b   : > { %5246 = vmatmul.mubr.bf16.vlgmr.msra.gmra.mxu1 %v8300_v25 }
 0x26c   : > { %5300 = vmatpush1.bf16.msra.mxu1 %v7407_v12  ;;  %v7461_v12 = vld [vmem:[#allocation6 + $0x7c0] ss:$16 sps:$4 sm:$0xff]  }
 0x26d   : > { %5273 = vmatpush2.bf16.msra.mxu0 %v7362_v37  ;;  %5301 = vmatprep.subr.bf16.mxu1 %v7415_v43  ;;  %v3253_v37 = vadd.f32 %v3252_v28, %v887_v19  ;;  %v3294_v43 = vadd.f32 %v3293_v11, %v3251_v20  ;;  %v7479_v11 = vld [vmem:[#allocation6 + $0x760] ss:$16 sps:$4 sm:$0xff]   ;;  %v7505_v28 = vld [vmem:[#allocation6 + $0x2ec] ss:$16 sps:$4 sm:$0xff]  }
 0x26e   : > { %5274 = vmatprep.subr.bf16.mxu0 %v7367_v49  ;;  %v7485_v19 = vld [vmem:[#allocation6 + $0x740] ss:$16 sps:$4 sm:$0xff]   ;;  %v7403_v20 = vld [vmem:[#allocation6 + $0x4c] ss:$16 sps:$4 sm:$0xff]  }
 0x270   : > { %5302 = vmatpush1.bf16.msra.mxu1 %v7413_v42  ;;  %v7469_v42 = vld [vmem:[#allocation6 + $0x7a4] ss:$16 sps:$4 sm:$0xff]  }
 0x271   : > { %5275 = vmatpush2.bf16.msra.mxu0 %v7365_v41  ;;  %5303 = vmatprep.subr.bf16.mxu1 %v7421_v44 }
 0x272   : > { %5276 = vmatprep.subr.bf16.mxu0 %v7370_v32 }
 0x274   : > { %5304 = vmatpush1.bf16.msra.mxu1 %v7419_v50  ;;  %v3296_v50 = vadd.f32 %v3295_v33, %v3253_v37  ;;  %v7389_v33 = vld [vmem:[#allocation6 + $0xc8] ss:$16 sps:$4 sm:$0xff]   ;;  %v7418_v37 = vld [vmem:[#allocation6 + $0x1ec] ss:$16 sps:$4 sm:$0xff]  }
 0x275   : > { %5277 = vmatpush2.bf16.msra.mxu0 %v7368_v45  ;;  %5305 = vmatprep.subr.bf16.mxu1 %v7427_v51  ;;  %v3379_v45 = vpop.f32.mrf.mxu1 }
 0x276   : > { %5278 = vmatprep.subr.bf16.mxu0 %v7373_v47 }
 0x278   : > { %5306 = vmatpush1.bf16.msra.mxu1 %v7425_v52 }
 0x279   : > { %5279 = vmatpush2.bf16.msra.mxu0 %v7371_v10  ;;  %5307 = vmatprep.subr.bf16.mxu1 %v7433_v53 }
 0x27a   : > { %5280 = vmatprep.subr.bf16.mxu0 %v7376_v7  ;;  %v7467_v7 = vld [vmem:[#allocation6 + $0x7a0] ss:$16 sps:$4 sm:$0xff]  }
 0x27c   : > { %5308 = vmatpush1.bf16.msra.mxu1 %v7431_v61 }
 0x27d   : > { %5281 = vmatpush2.bf16.msra.mxu0 %v7374_v56  ;;  %5309 = vmatprep.subr.bf16.mxu1 %v7439_v62 }
 0x27e   : > { %5282 = vmatprep.subr.bf16.mxu0 %v7379_v60  ;;  %v3381_v60 = vpop.f32.mrf.mxu1 }
 0x280   : > { %5310 = vmatpush1.bf16.msra.mxu1 %v7437_v3 }
 0x281   : > { %5283 = vmatpush2.bf16.msra.mxu0 %v7377_v1  ;;  %5311 = vmatprep.subr.bf16.mxu1 %v7445_v6  ;;  %v7473_v1 = vld [vmem:[#allocation6 + $0x780] ss:$16 sps:$4 sm:$0xff]  }
 0x282   : > { %5284 = vmatprep.subr.bf16.mxu0 %v7382_v54  ;;  %v7481_v54 = vld [vmem:[#allocation6 + $0x764] ss:$16 sps:$4 sm:$0xff]  }
 0x284   : > { %5312 = vmatpush1.bf16.msra.mxu1 %v7443_v16 }
 0x285   : > { %5285 = vmatpush2.bf16.msra.mxu0 %v7380_v13  ;;  %5313 = vmatprep.subr.bf16.mxu1 %v7451_v17  ;;  %v7391_v17 = vld [vmem:[#allocation6 + $0xcc] ss:$16 sps:$4 sm:$0xff]  }
 0x286   : > { %5286 = vmatprep.subr.bf16.mxu0 %v7385_v15  ;;  %v7386_v15 = vld [vmem:[#allocation6 + $0xe8] ss:$16 sps:$4 sm:$0xff]  }
 0x288   : > { %5314 = vmatpush1.bf16.msra.mxu1 %v7449_v22  ;;  %v7392_v22 = vld [vmem:[#allocation6 + $0xa8] ss:$16 sps:$4 sm:$0xff]  }
 0x289   : > { %5287 = vmatpush2.bf16.msra.mxu0 %v7383_v21  ;;  %5315 = vmatprep.subr.bf16.mxu1 %v7457_v29  ;;  %v7493_v21 = vld [vmem:[#allocation6 + $0x724] ss:$16 sps:$4 sm:$0xff]  }
 0x28a   : > { %5342 = vmatprep.subr.bf16.mxu0 %v7388_v23  ;;  %v7491_v23 = vld [vmem:[#allocation6 + $0x720] ss:$16 sps:$4 sm:$0xff]   ;;  %v7499_v29 = vld [vmem:[#allocation6 + $0x704] ss:$16 sps:$4 sm:$0xff]  }
 0x28c   : > { %v3332_v31 = vpop.f32.mrf.mxu0  ;;  %5316 = vmatpush2.bf16.msra.mxu1 %v7455_v30  ;;  %v7398_v30 = vld [vmem:[#allocation6 + $0x68] ss:$16 sps:$4 sm:$0xff]  }
 0x28d   : > { %v3333_v41 = vadd.f32 %v3332_v31, %v3290_v35  ;;  %5317 = vmatprep.subr.bf16.mxu1 %v7463_v39  ;;  %v7401_v39 = vld [vmem:[#allocation6 + $0x48] ss:$16 sps:$4 sm:$0xff]   ;;  %v7406_v31 = vld [vmem:[#allocation6 + $0x2c] ss:$16 sps:$4 sm:$0xff]  }
 0x28e   : > { %v3334_v49 = vpop.f32.mrf.mxu0  ;;  %v7404_v35 = vld [vmem:[#allocation6 + $0x28] ss:$16 sps:$4 sm:$0xff]  }
 0x28f   : > { %v3335_v32 = vadd.f32 %v3334_v49, %v3292_v36  ;;  %v3376_v52 = vadd.f32 %v3375_v27, %v3333_v41  ;;  %v7395_v27 = vld [vmem:[#allocation6 + $0x88] ss:$16 sps:$4 sm:$0xff]   ;;  %v7412_v36 = vld [vmem:[#allocation6 + $0xc] ss:$16 sps:$4 sm:$0xff]  }
 0x290   : > { %v3336_v44 = vpop.f32.mrf.mxu0  ;;  %5318 = vmatpush2.bf16.msra.mxu1 %v7461_v12  ;;  %v7416_v49 = vld [vmem:[#allocation6 + $0x1e8] ss:$16 sps:$4 sm:$0xff]   ;;  %v7424_v12 = vld [vmem:[#allocation6 + $0x1cc] ss:$16 sps:$4 sm:$0xff]  }
 0x291   : > { %v3337_v47 = vadd.f32 %v3336_v44, %v3294_v43  ;;  %v3378_v51 = vadd.f32 %v3377_v34, %v3335_v32  ;;  %5319 = vmatprep.subr.bf16.mxu1 %v7469_v42  ;;  %v3576_v2 = vmul.f32 0.2, %v3376_v52  ;;  %vm3560_vm11 = vcmp.gt.f32.partialorder %v3376_v52, 0.0  ;;  %v7410_v34 = vld [vmem:[#allocation6 + $0x8] ss:$16 sps:$4 sm:$0xff]  }
 0x292   : > { %v3338_v10 = vpop.f32.mrf.mxu0  ;;  %v7422_v43 = vld [vmem:[#allocation6 + $0x1c8] ss:$16 sps:$4 sm:$0xff]   ;;  %v7430_v41 = vld [vmem:[#allocation6 + $0x1ac] ss:$16 sps:$4 sm:$0xff]  }
 0x293   : > { %v3380_v53 = vadd.f32 %v3379_v45, %v3337_v47  ;;  %v3339_v56 = vadd.f32 %v3338_v10, %v3296_v50  ;;  %v3577_v62 = vmul.f32 0.2, %v3378_v51  ;;  %vm3561_vm10 = vcmp.gt.f32.partialorder %v3378_v51, 0.0  ;;  %v7428_v32 = vld [vmem:[#allocation6 + $0x1a8] ss:$16 sps:$4 sm:$0xff]  }
 0x294   : > { %5320 = vmatpush2.bf16.msra.mxu1 %v7467_v7  ;;  %v3592_v13 = vsel %vm3560_vm11, %v3376_v52, %v3576_v2  ;;  %v7436_v42 = vld [vmem:[#allocation6 + $0x18c] ss:$16 sps:$4 sm:$0xff]   ;;  %v7434_v44 = vld [vmem:[#allocation6 + $0x188] ss:$16 sps:$4 sm:$0xff]  }
 0x295   : > { %v3584_v61 = vmul.f32 0.2, %v3380_v53  ;;  %vm3568_vm9 = vcmp.gt.f32.partialorder %v3380_v53, 0.0  ;;  %v3382_v0 = vadd.f32 %v3381_v60, %v3339_v56  ;;  %5321 = vmatprep.subr.bf16.mxu1 %v7475_v55  ;;  %v3593_v8 = vsel %vm3561_vm10, %v3378_v51, %v3577_v62  ;;  %v7442_v45 = vld [vmem:[#allocation6 + $0x16c] ss:$16 sps:$4 sm:$0xff]  }
 0x296   : > { %v7440_v47 = vld [vmem:[#allocation6 + $0x168] ss:$16 sps:$4 sm:$0xff]   ;;  %v7448_v50 = vld [vmem:[#allocation6 + $0x14c] ss:$16 sps:$4 sm:$0xff]  }
 0x297   : > { %vm3569_vm12 = vcmp.gt.f32.partialorder %v3382_v0, 0.0  ;;  %v3585_v3 = vmul.f32 0.2, %v3382_v0  ;;  %v3600_v6 = vsel %vm3568_vm9, %v3380_v53, %v3584_v61  ;;  %v7446_v51 = vld [vmem:[#allocation6 + $0x148] ss:$16 sps:$4 sm:$0xff]  }
 0x298   : > { %5322 = vmatpush2.bf16.msra.mxu1 %v7473_v1  ;;  %v8317_v16 = vpack.c.bf16 %v3600_v6, %v3592_v13  ;;  %v7454_v10 = vld [vmem:[#allocation6 + $0x12c] ss:$16 sps:$4 sm:$0xff]   ;;  %v7452_v7 = vld [vmem:[#allocation6 + $0x128] ss:$16 sps:$4 sm:$0xff]   ;;  %v890_v6 = vsub.s32 6, %v8232_v59 }
 0x299   : > { %v3601_v9 = vsel %vm3569_vm12, %v3382_v0, %v3585_v3  ;;  %5323 = vmatprep.subr.bf16.mxu1 %v7481_v54  ;;  %v7460_v52 = vld [vmem:[#allocation6 + $0x10c] ss:$16 sps:$4 sm:$0xff]   ;;  %v7458_v55 = vld [vmem:[#allocation6 + $0x108] ss:$16 sps:$4 sm:$0xff]   ;;  %v894_v3 = vsub.s32 7, %v8232_v59 }
 0x29a   : > { %v8315_v14 = vpack.c.bf16 %v3601_v9, %v3593_v8  ;;  %v7466_v56 = vld [vmem:[#allocation6 + $0x4ec] ss:$16 sps:$4 sm:$0xff]   ;;  %v7464_v61 = vld [vmem:[#allocation6 + $0x4e8] ss:$16 sps:$4 sm:$0xff]  }
 0x29b   : > { %v7472_v62 = vld [vmem:[#allocation6 + $0x4cc] ss:$16 sps:$4 sm:$0xff]   ;;  %v7470_v1 = vld [vmem:[#allocation6 + $0x4c8] ss:$16 sps:$4 sm:$0xff]  }
 0x29c   : > { %5288 = vmatprep.mubr.bf16.mxu0 %v8315_v14  ;;  %5324 = vmatpush2.bf16.msra.mxu1 %v7479_v11  ;;  %v7478_v2 = vld [vmem:[#allocation6 + $0x4ac] ss:$16 sps:$4 sm:$0xff]   ;;  %v7476_v9 = vld [vmem:[#allocation6 + $0x4a8] ss:$16 sps:$4 sm:$0xff]  }
 0x29d   : > { %5289 = vmatmul.mubr.bf16.vlgmr.msra.gmra.mxu0 %v8317_v16  ;;  %5325 = vmatprep.subr.bf16.mxu1 %v7487_v18  ;;  %v7484_v11 = vld [vmem:[#allocation6 + $0x48c] ss:$16 sps:$4 sm:$0xff]   ;;  %v7482_v18 = vld [vmem:[#allocation6 + $0x488] ss:$16 sps:$4 sm:$0xff]  }
 0x29e   : > { %5343 = vmatpush1.bf16.msra.mxu0 %v7386_v15  ;;  %5374 = vmatprep.mubr.bf16.mxu0 %v8289_v4  ;;  %v7400_v4 = vld [vmem:[#allocation6 + $0x6c] ss:$16 sps:$4 sm:$0xff]  }
 0x29f   : > { %5344 = vmatprep.subr.bf16.mxu0 %v7391_v17  ;;  %v891_v17 = vrot.slane %v8311_v57, %v890_v6  ;;  %v7520_v6 = vld [vmem:[#allocation6 + $0x5cc] ss:$16 sps:$4 sm:$0xff]  }
 0x2a0   : > { %5326 = vmatpush2.bf16.msra.mxu1 %v7485_v19  ;;  %v7490_v19 = vld [vmem:[#allocation6 + $0x46c] ss:$16 sps:$4 sm:$0xff]  }
 0x2a1   : > { %5327 = vmatprep.subr.bf16.mxu1 %v7493_v21 }
 0x2a2   : > { %5345 = vmatpush1.bf16.msra.mxu0 %v7389_v33 }
 0x2a3   : > { %5346 = vmatprep.subr.bf16.mxu0 %v7394_v63  ;;  %v3418_v53 = vpop.f32.mrf.mxu1 }
 0x2a4   : > { %5328 = vmatpush2.bf16.msra.mxu1 %v7491_v23  ;;  %v3419_v23 = vadd.f32 %v3418_v53, %v891_v17 }
 0x2a5   : > { %5329 = vmatprep.subr.bf16.mxu1 %v7499_v29  ;;  %v3420_v60 = vpop.f32.mrf.mxu1  ;;  %v7488_v29 = vld [vmem:[#allocation6 + $0x468] ss:$16 sps:$4 sm:$0xff]  }
 0x2a6   : > { %5347 = vmatpush1.bf16.msra.mxu0 %v7392_v22 }
 0x2a7   : > { %5348 = vmatprep.subr.bf16.mxu0 %v7397_v26  ;;  %v3422_v0 = vpop.f32.mrf.mxu1 }
 0x2a8   : > { %5330 = vmatpush2.bf16.msra.mxu1 %v7497_v48  ;;  %v3423_v26 = vadd.f32 %v3422_v0, %v891_v17  ;;  %v7524_v17 = vld [vmem:[#allocation6 + $0x5a8] ss:$16 sps:$4 sm:$0xff]  }
 0x2a9   : > { %5385 = vmatprep.subr.bf16.mxu1 %v7505_v28  ;;  %v3424_v8 = vpop.f32.mrf.mxu1 }
 0x2aa   : > { %5349 = vmatpush1.bf16.msra.mxu0 %v7395_v27  ;;  %v7496_v27 = vld [vmem:[#allocation6 + $0x44c] ss:$16 sps:$4 sm:$0xff]  }
 0x2ab   : > { %5350 = vmatprep.subr.bf16.mxu0 %v7400_v4 }
 0x2ae   : > { %5351 = vmatpush1.bf16.msra.mxu0 %v7398_v30 }
 0x2af   : > { %5352 = vmatprep.subr.bf16.mxu0 %v7403_v20 }
 0x2b2   : > { %5353 = vmatpush1.bf16.msra.mxu0 %v7401_v39 }
 0x2b3   : > { %5354 = vmatprep.subr.bf16.mxu0 %v7406_v31 }
 0x2b6   : > { %5355 = vmatpush1.bf16.msra.mxu0 %v7404_v35 }
 0x2b7   : > { %5356 = vmatprep.subr.bf16.mxu0 %v7412_v36  ;;  %v7494_v36 = vld [vmem:[#allocation6 + $0x448] ss:$16 sps:$4 sm:$0xff]  }
 0x2ba   : > { %5357 = vmatpush1.bf16.msra.mxu0 %v7410_v34 }
 0x2bb   : > { %5358 = vmatprep.subr.bf16.mxu0 %v7418_v37 }
 0x2be   : > { %5359 = vmatpush2.bf16.msra.mxu0 %v7416_v49 }
 0x2bf   : > { %5360 = vmatprep.subr.bf16.mxu0 %v7424_v12  ;;  %v7502_v12 = vld [vmem:[#allocation6 + $0x42c] ss:$16 sps:$4 sm:$0xff]  }
 0x2c2   : > { %5361 = vmatpush2.bf16.msra.mxu0 %v7422_v43 }
 0x2c3   : > { %5362 = vmatprep.subr.bf16.mxu0 %v7430_v41 }
 0x2c6   : > { %5363 = vmatpush2.bf16.msra.mxu0 %v7428_v32 }
 0x2c7   : > { %5364 = vmatprep.subr.bf16.mxu0 %v7436_v42 }
 0x2ca   : > { %5365 = vmatpush2.bf16.msra.mxu0 %v7434_v44 }
 0x2cb   : > { %5366 = vmatprep.subr.bf16.mxu0 %v7442_v45  ;;  %v7500_v45 = vld [vmem:[#allocation6 + $0x428] ss:$16 sps:$4 sm:$0xff]  }
 0x2cc   : > { %v3461_v54 = vpop.f32.mrf.mxu0 }
 0x2cd   : > { %v3462_v28 = vadd.f32 %v3461_v54, %v3419_v23  ;;  %v7511_v54 = vld [vmem:[#allocation6 + $0x2cc] ss:$16 sps:$4 sm:$0xff]   ;;  %v7536_v23 = vld [vmem:[#allocation6 + $0x568] ss:$16 sps:$4 sm:$0xff]  }
 0x2ce   : > { %5367 = vmatpush2.bf16.msra.mxu0 %v7440_v47  ;;  %v3463_v13 = vpop.f32.mrf.mxu0  ;;  %v7508_v47 = vld [vmem:[#allocation6 + $0x40c] ss:$16 sps:$4 sm:$0xff]  }
 0x2cf   : > { %5368 = vmatprep.subr.bf16.mxu0 %v7448_v50 }
 0x2d0   : > { %v3465_v33 = vpop.f32.mrf.mxu0 }
 0x2d1   : > { %v3466_v20 = vadd.f32 %v3465_v33, %v3423_v26  ;;  %v7538_v33 = vld [vmem:[#allocation6 + $0x56c] ss:$16 sps:$4 sm:$0xff]  }
 0x2d2   : > { %5369 = vmatpush2.bf16.msra.mxu0 %v7446_v51  ;;  %v3467_v4 = vpop.f32.mrf.mxu0  ;;  %v7541_v26 = vld [vmem:[#allocation6 + $0x22c] ss:$16 sps:$4 sm:$0xff]  }
 0x2d3   : > { %5370 = vmatprep.subr.bf16.mxu0 %v7454_v10 }
 0x2d6   : > { %5371 = vmatpush2.bf16.msra.mxu0 %v7452_v7 }
 0x2d7   : > { %5372 = vmatprep.subr.bf16.mxu0 %v7460_v52 }
 0x2da   : > { %5373 = vmatpush2.bf16.msra.mxu0 %v7458_v55  ;;  %v7506_v55 = vld [vmem:[#allocation6 + $0x408] ss:$16 sps:$4 sm:$0xff]  }
 0x2db   : > { %5428 = vmatprep.subr.bf16.mxu0 %v7466_v56 }
 0x2dd   : > { %5375 = vmatmul.mubr.bf16.vlgmr.msra.gmra.mxu0 %v8268_v58  ;;  %v895_v58 = vrot.slane %v8311_v57, %v894_v3  ;;  %v7512_v3 = vld [vmem:[#allocation6 + $0x5e8] ss:$16 sps:$4 sm:$0xff]  }
 0x2de   : > { %5429 = vmatpush1.bf16.msra.mxu0 %v7464_v61  ;;  %5460 = vmatprep.mubr.bf16.mxu0 %v8315_v14  ;;  %v7514_v61 = vld [vmem:[#allocation6 + $0x5ec] ss:$16 sps:$4 sm:$0xff]  }
 0x2df   : > { %5430 = vmatprep.subr.bf16.mxu0 %v7472_v62  ;;  %v3421_v63 = vadd.f32 %v3420_v60, %v895_v58  ;;  %v3425_v57 = vadd.f32 %v3424_v8, %v895_v58  ;;  %v7509_v8 = vld [vmem:[#allocation6 + $0x2c8] ss:$16 sps:$4 sm:$0xff]   ;;  %v7523_v58 = vld [vmem:[#allocation6 + $0x28c] ss:$16 sps:$4 sm:$0xff]  }
 0x2e1   : > { %v3464_v48 = vadd.f32 %v3463_v13, %v3421_v63  ;;  %v3468_v34 = vadd.f32 %v3467_v4, %v3425_v57  ;;  %v7526_v13 = vld [vmem:[#allocation6 + $0x5ac] ss:$16 sps:$4 sm:$0xff]  }
 0x2e2   : > { %5431 = vmatpush1.bf16.msra.mxu0 %v7470_v1  ;;  %v7503_v1 = vld [vmem:[#allocation6 + $0x2e8] ss:$16 sps:$4 sm:$0xff]   ;;  %v7535_v63 = vld [vmem:[#allocation6 + $0x24c] ss:$16 sps:$4 sm:$0xff]  }
 0x2e3   : > { %5432 = vmatprep.subr.bf16.mxu0 %v7478_v2  ;;  %v3504_v15 = vpop.f32.mrf.mxu1  ;;  %v7547_v4 = vld [vmem:[#allocation6 + $0x20c] ss:$16 sps:$4 sm:$0xff]  }
 0x2e4   : > { %v3505_v31 = vadd.f32 %v3504_v15, %v3462_v28  ;;  %v7515_v15 = vld [vmem:[#allocation6 + $0x2a8] ss:$16 sps:$4 sm:$0xff]   ;;  %v7556_v57 = vld [vmem:[#allocation6 + $0x50c] ss:$16 sps:$4 sm:$0xff]  }
 0x2e5   : > { %v3506_v14 = vpop.f32.mrf.mxu1  ;;  %v7539_v28 = vld [vmem:[#allocation6 + $0x228] ss:$16 sps:$4 sm:$0xff]  }
 0x2e6   : > { %5433 = vmatpush1.bf16.msra.mxu0 %v7476_v9  ;;  %v3507_v39 = vadd.f32 %v3506_v14, %v3464_v48  ;;  %v7517_v9 = vld [vmem:[#allocation6 + $0x2ac] ss:$16 sps:$4 sm:$0xff]   ;;  %v7542_v48 = vld [vmem:[#allocation6 + $0x548] ss:$16 sps:$4 sm:$0xff]  }
 0x2e7   : > { %5434 = vmatprep.subr.bf16.mxu0 %v7484_v11  ;;  %v3508_v21 = vpop.f32.mrf.mxu1  ;;  %v7518_v11 = vld [vmem:[#allocation6 + $0x5c8] ss:$16 sps:$4 sm:$0xff]   ;;  %v7532_v14 = vld [vmem:[#allocation6 + $0x58c] ss:$16 sps:$4 sm:$0xff]  }
 0x2e8   : > { %v3509_v37 = vadd.f32 %v3508_v21, %v3466_v20  ;;  %v7527_v21 = vld [vmem:[#allocation6 + $0x268] ss:$16 sps:$4 sm:$0xff]  }
 0x2e9   : > { %v3510_v22 = vpop.f32.mrf.mxu1  ;;  %v7545_v20 = vld [vmem:[#allocation6 + $0x208] ss:$16 sps:$4 sm:$0xff]  }
 0x2ea   : > { %5435 = vmatpush1.bf16.msra.mxu0 %v7482_v18  ;;  %v3511_v32 = vadd.f32 %v3510_v22, %v3468_v34  ;;  %v7521_v18 = vld [vmem:[#allocation6 + $0x288] ss:$16 sps:$4 sm:$0xff]   ;;  %v7544_v22 = vld [vmem:[#allocation6 + $0x54c] ss:$16 sps:$4 sm:$0xff]  }
 0x2eb   : > { %5436 = vmatprep.subr.bf16.mxu0 %v7490_v19  ;;  %v3547_v30 = vpop.f32.mrf.mxu1  ;;  %v7529_v19 = vld [vmem:[#allocation6 + $0x26c] ss:$16 sps:$4 sm:$0xff]  }
 0x2ec   : > { %v3548_v43 = vadd.f32 %v3547_v30, %v3505_v31  ;;  %v7548_v30 = vld [vmem:[#allocation6 + $0x528] ss:$16 sps:$4 sm:$0xff]   ;;  %v7559_v34 = vld [vmem:[#allocation6 + $0x3cc] ss:$16 sps:$4 sm:$0xff]  }
 0x2ed   : > { %v3549_v35 = vpop.f32.mrf.mxu1  ;;  %v7554_v31 = vld [vmem:[#allocation6 + $0x508] ss:$16 sps:$4 sm:$0xff]  }
 0x2ee   : > { %5437 = vmatpush1.bf16.msra.mxu0 %v7488_v29  ;;  %v3550_v49 = vadd.f32 %v3549_v35, %v3507_v39  ;;  %v3578_v7 = vmul.f32 0.2, %v3548_v43  ;;  %vm3562_vm15 = vcmp.gt.f32.partialorder %v3548_v43, 0.0  ;;  %v7533_v29 = vld [vmem:[#allocation6 + $0x248] ss:$16 sps:$4 sm:$0xff]  }
 0x2ef   : > { %5438 = vmatprep.subr.bf16.mxu0 %v7496_v27  ;;  %v3551_v41 = vpop.f32.mrf.mxu1  ;;  %v7550_v27 = vld [vmem:[#allocation6 + $0x52c] ss:$16 sps:$4 sm:$0xff]   ;;  %v7628_v35 = vld [vmem:[#allocation9 + $0x74] ss:$8 sps:$4 sm:$0xff]  }
 0x2f0   : > { %v3552_v42 = vadd.f32 %v3551_v41, %v3509_v37  ;;  %v3579_v50 = vmul.f32 0.2, %v3550_v49  ;;  %vm3563_vm14 = vcmp.gt.f32.partialorder %v3550_v49, 0.0  ;;  %v3594_v62 = vsel %vm3562_vm15, %v3548_v43, %v3578_v7  ;;  %v7553_v39 = vld [vmem:[#allocation6 + $0x3ec] ss:$16 sps:$4 sm:$0xff]  }
 0x2f1   : > { %v3553_v44 = vpop.f32.mrf.mxu1  ;;  %v7626_v37 = vld [vmem:[#allocation9 + $0x70] ss:$8 sps:$4 sm:$0xff]   ;;  %v7629_v41 = vld [vmem:[#allocation9 + $0x60] ss:$8 sps:$4 sm:$0xff]   ;;  %v7566_v7 = vld [vmem:[#allocation6 + $0x368] ss:$16 sps:$4 sm:$0xff]  }
 0x2f2   : > { %5439 = vmatpush1.bf16.msra.mxu0 %v7494_v36  ;;  %vm3570_vm13 = vcmp.gt.f32.partialorder %v3552_v42, 0.0  ;;  %v3586_v51 = vmul.f32 0.2, %v3552_v42  ;;  %v3554_v10 = vadd.f32 %v3553_v44, %v3511_v32  ;;  %v3595_v56 = vsel %vm3563_vm14, %v3550_v49, %v3579_v50  ;;  %v7551_v36 = vld [vmem:[#allocation6 + $0x3e8] ss:$16 sps:$4 sm:$0xff]  }
 0x2f3   : > { %5440 = vmatprep.subr.bf16.mxu0 %v7502_v12  ;;  %v7631_v49 = vld [vmem:[#allocation9 + $0x64] ss:$8 sps:$4 sm:$0xff]   ;;  %v7562_v43 = vld [vmem:[#allocation6 + $0x3ac] ss:$16 sps:$4 sm:$0xff]   ;;  %v7634_v32 = vld [vmem:[#allocation9 + $0x54] ss:$8 sps:$4 sm:$0xff]  }
 0x2f4   : > { %vm3571_vm0 = vcmp.gt.f32.partialorder %v3554_v10, 0.0  ;;  %v3587_v52 = vmul.f32 0.2, %v3554_v10  ;;  %v3602_v53 = vsel %vm3570_vm13, %v3552_v42, %v3586_v51  ;;  %v7557_v12 = vld [vmem:[#allocation6 + $0x3c8] ss:$16 sps:$4 sm:$0xff]  }
 0x2f5   : > { %v8330_v2 = vpack.c.bf16 %v3602_v53, %v3594_v62  ;;  %v7560_v42 = vld [vmem:[#allocation6 + $0x3a8] ss:$16 sps:$4 sm:$0xff]   ;;  %v7565_v44 = vld [vmem:[#allocation6 + $0x38c] ss:$16 sps:$4 sm:$0xff]  }
 0x2f6   : > { %5441 = vmatpush1.bf16.msra.mxu0 %v7500_v45  ;;  %v3603_v60 = vsel %vm3571_vm0, %v3554_v10, %v3587_v52  ;;  %v7632_v45 = vld [vmem:[#allocation9 + $0x50] ss:$8 sps:$4 sm:$0xff]   ;;  %v7563_v50 = vld [vmem:[#allocation6 + $0x388] ss:$16 sps:$4 sm:$0xff]   ;;  %v7635_v10 = vld [vmem:[#allocation9 + $0x40] ss:$8 sps:$4 sm:$0xff]  }
 0x2f7   : > { %5442 = vmatprep.subr.bf16.mxu0 %v7508_v47  ;;  %v8328_v0 = vpack.c.bf16 %v3603_v60, %v3595_v56  ;;  %v7637_v47 = vld [vmem:[#allocation9 + $0x44] ss:$8 sps:$4 sm:$0xff]   ;;  %v7568_v51 = vld [vmem:[#allocation6 + $0x36c] ss:$16 sps:$4 sm:$0xff]   ;;  %v7646_v62 = vld [vmem:[#allocation9 + $0x14] ss:$8 sps:$4 sm:$0xff]  }
 0x2f8   : > { %v7571_v52 = vld [vmem:[#allocation6 + $0x34c] ss:$16 sps:$4 sm:$0xff]   ;;  %v7569_v56 = vld [vmem:[#allocation6 + $0x348] ss:$16 sps:$4 sm:$0xff]  }
 0x2f9   : > { %5331 = vmatprep.mubr.bf16.mxu1 %v8328_v0  ;;  %v7638_v53 = vld [vmem:[#allocation9 + $0x30] ss:$8 sps:$4 sm:$0xff]  }
 0x2fa   : > { %5443 = vmatpush1.bf16.msra.mxu0 %v7506_v55  ;;  %5332 = vmatmul.mubr.bf16.vlgmr.msra.gmra.mxu1 %v8330_v2  ;;  %v7643_v55 = vld [vmem:[#allocation9 + $0x24] ss:$8 sps:$4 sm:$0xff]   ;;  %v7574_v60 = vld [vmem:[#allocation6 + $0x32c] ss:$16 sps:$4 sm:$0xff]  }
 0x2fb   : > { %5444 = vmatprep.subr.bf16.mxu0 %v7514_v61  ;;  %5386 = vmatpush1.bf16.msra.mxu1 %v7503_v1  ;;  %v7641_v61 = vld [vmem:[#allocation9 + $0x20] ss:$8 sps:$4 sm:$0xff]   ;;  %v7572_v1 = vld [vmem:[#allocation6 + $0x328] ss:$16 sps:$4 sm:$0xff]  }
 0x2fc   : > { %5417 = vmatprep.mubr.bf16.mxu1 %v8302_v40  ;;  %5387 = vmatprep.subr.bf16.mxu1 %v7511_v54  ;;  %v7530_v40 = vld [vmem:[#allocation6 + $0x588] ss:$16 sps:$4 sm:$0xff]   ;;  %v7577_v54 = vld [vmem:[#allocation6 + $0x30c] ss:$16 sps:$4 sm:$0xff]  }
 0x2fe   : > { %5445 = vmatpush2.bf16.msra.mxu0 %v7512_v3  ;;  %v7644_v3 = vld [vmem:[#allocation9 + $0x10] ss:$8 sps:$4 sm:$0xff]  }
 0x2ff   : > { %5446 = vmatprep.subr.bf16.mxu0 %v7520_v6  ;;  %5388 = vmatpush1.bf16.msra.mxu1 %v7509_v8  ;;  %v7649_v6 = vld [vmem:[#allocation9 + $0x4] ss:$8 sps:$4 sm:$0xff]  }
 0x300   : > { %5389 = vmatprep.subr.bf16.mxu1 %v7517_v9  ;;  %v7575_v8 = vld [vmem:[#allocation6 + $0x308] ss:$16 sps:$4 sm:$0xff]   ;;  %v7580_v9 = vld [vmem:[#allocation6 + $0x6ec] ss:$16 sps:$4 sm:$0xff]  }
 0x302   : > { %5447 = vmatpush2.bf16.msra.mxu0 %v7518_v11  ;;  %v7647_v11 = vld [vmem:[#allocation9] ss:$8 sps:$4 sm:$0xff]  }
 0x303   : > { %5448 = vmatprep.subr.bf16.mxu0 %v7526_v13  ;;  %5390 = vmatpush1.bf16.msra.mxu1 %v7515_v15  ;;  %v7652_v13 = vld [vmem:[#allocation9 + $0xf4] ss:$8 sps:$4 sm:$0xff]  }
 0x304   : > { %5391 = vmatprep.subr.bf16.mxu1 %v7523_v58  ;;  %v7578_v15 = vld [vmem:[#allocation6 + $0x6e8] ss:$16 sps:$4 sm:$0xff]   ;;  %v7583_v58 = vld [vmem:[#allocation6 + $0x6cc] ss:$16 sps:$4 sm:$0xff]  }
 0x306   : > { %5449 = vmatpush2.bf16.msra.mxu0 %v7524_v17  ;;  %v7650_v17 = vld [vmem:[#allocation9 + $0xf0] ss:$8 sps:$4 sm:$0xff]  }
 0x307   : > { %5450 = vmatprep.subr.bf16.mxu0 %v7532_v14  ;;  %5392 = vmatpush1.bf16.msra.mxu1 %v7521_v18  ;;  %v7655_v14 = vld [vmem:[#allocation9 + $0xe4] ss:$8 sps:$4 sm:$0xff]  }
 0x308   : > { %5393 = vmatprep.subr.bf16.mxu1 %v7529_v19  ;;  %v7581_v18 = vld [vmem:[#allocation6 + $0x6c8] ss:$16 sps:$4 sm:$0xff]   ;;  %v7586_v19 = vld [vmem:[#allocation6 + $0x6ac] ss:$16 sps:$4 sm:$0xff]  }
 0x30a   : > { %5451 = vmatpush2.bf16.msra.mxu0 %v7530_v40  ;;  %v7653_v40 = vld [vmem:[#allocation9 + $0xe0] ss:$8 sps:$4 sm:$0xff]  }
 0x30b   : > { %5452 = vmatprep.subr.bf16.mxu0 %v7538_v33  ;;  %5394 = vmatpush1.bf16.msra.mxu1 %v7527_v21  ;;  %v7658_v33 = vld [vmem:[#allocation9 + $0xd4] ss:$8 sps:$4 sm:$0xff]  }
 0x30c   : > { %5395 = vmatprep.subr.bf16.mxu1 %v7535_v63  ;;  %v7584_v21 = vld [vmem:[#allocation6 + $0x6a8] ss:$16 sps:$4 sm:$0xff]   ;;  %v7589_v63 = vld [vmem:[#allocation6 + $0x68c] ss:$16 sps:$4 sm:$0xff]  }
 0x30e   : > { %5453 = vmatpush2.bf16.msra.mxu0 %v7536_v23  ;;  %v7656_v23 = vld [vmem:[#allocation9 + $0xd0] ss:$8 sps:$4 sm:$0xff]  }
 0x30f   : > { %5454 = vmatprep.subr.bf16.mxu0 %v7544_v22  ;;  %5396 = vmatpush1.bf16.msra.mxu1 %v7533_v29  ;;  %v7587_v22 = vld [vmem:[#allocation6 + $0x688] ss:$16 sps:$4 sm:$0xff]   ;;  %v7592_v29 = vld [vmem:[#allocation6 + $0x66c] ss:$16 sps:$4 sm:$0xff]  }
 0x310   : > { %5397 = vmatprep.subr.bf16.mxu1 %v7541_v26  ;;  %v7664_v26 = vld [vmem:[#allocation9 + $0xb4] ss:$8 sps:$4 sm:$0xff]  }
 0x312   : > { %5455 = vmatpush2.bf16.msra.mxu0 %v7542_v48  ;;  %v7590_v48 = vld [vmem:[#allocation6 + $0x668] ss:$16 sps:$4 sm:$0xff]  }
 0x313   : > { %5456 = vmatprep.subr.bf16.mxu0 %v7550_v27  ;;  %5398 = vmatpush1.bf16.msra.mxu1 %v7539_v28  ;;  %v7595_v27 = vld [vmem:[#allocation6 + $0x64c] ss:$16 sps:$4 sm:$0xff]  }
 0x314   : > { %5399 = vmatprep.subr.bf16.mxu1 %v7547_v4  ;;  %v7662_v28 = vld [vmem:[#allocation9 + $0xb0] ss:$8 sps:$4 sm:$0xff]   ;;  %v7667_v4 = vld [vmem:[#allocation9 + $0xa4] ss:$8 sps:$4 sm:$0xff]  }
 0x316   : > { %5457 = vmatpush2.bf16.msra.mxu0 %v7548_v30  ;;  %v7593_v30 = vld [vmem:[#allocation6 + $0x648] ss:$16 sps:$4 sm:$0xff]  }
 0x317   : > { %5458 = vmatprep.subr.bf16.mxu0 %v7556_v57  ;;  %5400 = vmatpush1.bf16.msra.mxu1 %v7545_v20  ;;  %v7598_v57 = vld [vmem:[#allocation6 + $0x62c] ss:$16 sps:$4 sm:$0xff]  }
 0x318   : > { %5401 = vmatprep.subr.bf16.mxu1 %v7553_v39  ;;  %v7665_v20 = vld [vmem:[#allocation9 + $0xa0] ss:$8 sps:$4 sm:$0xff]   ;;  %v7670_v39 = vld [vmem:[#allocation9 + $0x94] ss:$8 sps:$4 sm:$0xff]  }
 0x31a   : > { %5459 = vmatpush2.bf16.msra.mxu0 %v7554_v31  ;;  %v7596_v31 = vld [vmem:[#allocation6 + $0x628] ss:$16 sps:$4 sm:$0xff]  }
 0x31b   : > { %5938 = vmatprep.subr.bf16.mxu0 %v7628_v35  ;;  %5402 = vmatpush2.bf16.msra.mxu1 %v7551_v36  ;;  %v7601_v35 = vld [vmem:[#allocation6 + $0x60c] ss:$16 sps:$4 sm:$0xff]  }
 0x31c   : > { %5403 = vmatprep.subr.bf16.mxu1 %v7559_v34  ;;  %v7668_v36 = vld [vmem:[#allocation9 + $0x90] ss:$8 sps:$4 sm:$0xff]   ;;  %v7673_v34 = vld [vmem:[#allocation9 + $0x84] ss:$8 sps:$4 sm:$0xff]  }
 0x31d   : > { %5461 = vmatmul.mubr.bf16.vlgmr.msra.gmra.mxu0 %v8317_v16  ;;  %v7640_v16 = vld [vmem:[#allocation9 + $0x34] ss:$8 sps:$4 sm:$0xff]  }
 0x31e   : > { %5939 = vmatpush1.bf16.msra.mxu0 %v7626_v37  ;;  %v7599_v37 = vld [vmem:[#allocation6 + $0x608] ss:$16 sps:$4 sm:$0xff]  }
 0x31f   : > { %5940 = vmatprep.subr.bf16.mxu0 %v7631_v49  ;;  %5404 = vmatpush2.bf16.msra.mxu1 %v7557_v12  ;;  %v7604_v49 = vld [vmem:[#allocation6 + $0x7ec] ss:$16 sps:$4 sm:$0xff]  }
 0x320   : > { %5405 = vmatprep.subr.bf16.mxu1 %v7562_v43  ;;  %v7671_v12 = vld [vmem:[#allocation9 + $0x80] ss:$8 sps:$4 sm:$0xff]   ;;  %v7602_v43 = vld [vmem:[#allocation6 + $0x7e8] ss:$16 sps:$4 sm:$0xff]  }
 0x322   : > { %5941 = vmatpush1.bf16.msra.mxu0 %v7629_v41  ;;  %v7607_v41 = vld [vmem:[#allocation6 + $0x7cc] ss:$16 sps:$4 sm:$0xff]  }
 0x323   : > { %5942 = vmatprep.subr.bf16.mxu0 %v7634_v32  ;;  %5406 = vmatpush2.bf16.msra.mxu1 %v7560_v42  ;;  %v7605_v32 = vld [vmem:[#allocation6 + $0x7c8] ss:$16 sps:$4 sm:$0xff]   ;;  %v7610_v42 = vld [vmem:[#allocation6 + $0x7ac] ss:$16 sps:$4 sm:$0xff]  }
 0x324   : > { %5407 = vmatprep.subr.bf16.mxu1 %v7565_v44  ;;  %v7608_v44 = vld [vmem:[#allocation6 + $0x7a8] ss:$16 sps:$4 sm:$0xff]  }
 0x326   : > { %5943 = vmatpush1.bf16.msra.mxu0 %v7632_v45  ;;  %v7613_v45 = vld [vmem:[#allocation6 + $0x78c] ss:$16 sps:$4 sm:$0xff]  }
 0x327   : > { %5944 = vmatprep.subr.bf16.mxu0 %v7637_v47  ;;  %5408 = vmatpush2.bf16.msra.mxu1 %v7563_v50  ;;  %v7611_v47 = vld [vmem:[#allocation6 + $0x788] ss:$16 sps:$4 sm:$0xff]   ;;  %v7616_v50 = vld [vmem:[#allocation6 + $0x76c] ss:$16 sps:$4 sm:$0xff]  }
 0x328   : > { %5409 = vmatprep.subr.bf16.mxu1 %v7568_v51  ;;  %v7614_v51 = vld [vmem:[#allocation6 + $0x768] ss:$16 sps:$4 sm:$0xff]  }
 0x32a   : > { %5945 = vmatpush1.bf16.msra.mxu0 %v7635_v10  ;;  %v7619_v10 = vld [vmem:[#allocation6 + $0x74c] ss:$16 sps:$4 sm:$0xff]  }
 0x32b   : > { %5946 = vmatprep.subr.bf16.mxu0 %v7640_v16  ;;  %5410 = vmatpush2.bf16.msra.mxu1 %v7566_v7  ;;  %v7617_v16 = vld [vmem:[#allocation6 + $0x748] ss:$16 sps:$4 sm:$0xff]   ;;  %v7622_v7 = vld [vmem:[#allocation6 + $0x72c] ss:$16 sps:$4 sm:$0xff]  }
 0x32c   : > { %5411 = vmatprep.subr.bf16.mxu1 %v7571_v52  ;;  %v7620_v52 = vld [vmem:[#allocation6 + $0x728] ss:$16 sps:$4 sm:$0xff]  }
 0x32e   : > { %5947 = vmatpush1.bf16.msra.mxu0 %v7638_v53  ;;  %v7625_v53 = vld [vmem:[#allocation6 + $0x70c] ss:$16 sps:$4 sm:$0xff]  }
 0x32f   : > { %5948 = vmatprep.subr.bf16.mxu0 %v7643_v55  ;;  %5412 = vmatpush2.bf16.msra.mxu1 %v7569_v56  ;;  %v7623_v55 = vld [vmem:[#allocation6 + $0x708] ss:$16 sps:$4 sm:$0xff]   ;;  %v7674_v56 = vld [vmem:[#allocation9 + $0x170] ss:$8 sps:$4 sm:$0xff]  }
 0x330   : > { %5413 = vmatprep.subr.bf16.mxu1 %v7574_v60  ;;  %v7676_v60 = vld [vmem:[#allocation9 + $0x174] ss:$8 sps:$4 sm:$0xff]  }
 0x332   : > { %5949 = vmatpush1.bf16.msra.mxu0 %v7641_v61  ;;  %v7679_v61 = vld [vmem:[#allocation9 + $0x164] ss:$8 sps:$4 sm:$0xff]  }
 0x333   : > { %5950 = vmatprep.subr.bf16.mxu0 %v7646_v62  ;;  %5414 = vmatpush2.bf16.msra.mxu1 %v7572_v1  ;;  %v7677_v62 = vld [vmem:[#allocation9 + $0x160] ss:$8 sps:$4 sm:$0xff]   ;;  %v7682_v1 = vld [vmem:[#allocation9 + $0x154] ss:$8 sps:$4 sm:$0xff]  }
 0x334   : > { %5415 = vmatprep.subr.bf16.mxu1 %v7577_v54  ;;  %v7680_v54 = vld [vmem:[#allocation9 + $0x150] ss:$8 sps:$4 sm:$0xff]  }
 0x336   : > { %5951 = vmatpush1.bf16.msra.mxu0 %v7644_v3  ;;  %v7685_v3 = vld [vmem:[#allocation9 + $0x144] ss:$8 sps:$4 sm:$0xff]  }
 0x337   : > { %5952 = vmatprep.subr.bf16.mxu0 %v7649_v6  ;;  %5416 = vmatpush2.bf16.msra.mxu1 %v7575_v8  ;;  %v7683_v6 = vld [vmem:[#allocation9 + $0x140] ss:$8 sps:$4 sm:$0xff]   ;;  %v7688_v8 = vld [vmem:[#allocation9 + $0x134] ss:$8 sps:$4 sm:$0xff]  }
 0x338   : > { %5471 = vmatprep.subr.bf16.mxu1 %v7580_v9  ;;  %v7686_v9 = vld [vmem:[#allocation9 + $0x130] ss:$8 sps:$4 sm:$0xff]  }
 0x33a   : > { %5953 = vmatpush1.bf16.msra.mxu0 %v7647_v11  ;;  %5418 = vmatmul.mubr.bf16.vlgmr.msra.gmra.mxu1 %v8300_v25  ;;  %v7661_v25 = vld [vmem:[#allocation9 + $0xc4] ss:$8 sps:$4 sm:$0xff]   ;;  %v7689_v11 = vld [vmem:[#allocation9 + $0x120] ss:$8 sps:$4 sm:$0xff]  }
 0x33b   : > { %5954 = vmatprep.subr.bf16.mxu0 %v7652_v13  ;;  %5472 = vmatpush1.bf16.msra.mxu1 %v7578_v15  ;;  %v7694_v13 = vld [vmem:[#allocation9 + $0x114] ss:$8 sps:$4 sm:$0xff]   ;;  %v7692_v15 = vld [vmem:[#allocation9 + $0x110] ss:$8 sps:$4 sm:$0xff]  }
 0x33c   : > { %5503 = vmatprep.mubr.bf16.mxu1 %v8328_v0  ;;  %5473 = vmatprep.subr.bf16.mxu1 %v7583_v58  ;;  %v7659_v0 = vld [vmem:[#allocation9 + $0xc0] ss:$8 sps:$4 sm:$0xff]   ;;  %v7697_v58 = vld [vmem:[#allocation9 + $0x104] ss:$8 sps:$4 sm:$0xff]  }
 0x33e   : > { %5955 = vmatpush2.bf16.msra.mxu0 %v7650_v17  ;;  %v7695_v17 = vld [vmem:[#allocation9 + $0x100] ss:$8 sps:$4 sm:$0xff]  }
 0x33f   : > { %5956 = vmatprep.subr.bf16.mxu0 %v7655_v14  ;;  %5474 = vmatpush1.bf16.msra.mxu1 %v7581_v18  ;;  %v7700_v14 = vld [vmem:[#allocation9 + $0x1f4] ss:$8 sps:$4 sm:$0xff]   ;;  %v7698_v18 = vld [vmem:[#allocation9 + $0x1f0] ss:$8 sps:$4 sm:$0xff]  }
 0x340   : > { %5475 = vmatprep.subr.bf16.mxu1 %v7586_v19  ;;  %v7703_v19 = vld [vmem:[#allocation9 + $0x1e4] ss:$8 sps:$4 sm:$0xff]  }
 0x342   : > { %5957 = vmatpush2.bf16.msra.mxu0 %v7653_v40  ;;  %v5204_v40 = vpop.f32.mrf.mxu0 }
 0x343   : > { %5958 = vmatprep.subr.bf16.mxu0 %v7658_v33  ;;  %5476 = vmatpush1.bf16.msra.mxu1 %v7584_v21  ;;  %v7701_v33 = vld [vmem:[#allocation9 + $0x1e0] ss:$8 sps:$4 sm:$0xff]   ;;  %v7706_v21 = vld [vmem:[#allocation9 + $0x1d4] ss:$8 sps:$4 sm:$0xff]  }
 0x344   : > { %5477 = vmatprep.subr.bf16.mxu1 %v7589_v63  ;;  %v5206_v63 = vpop.f32.mrf.mxu0 }
 0x346   : > { %5959 = vmatpush2.bf16.msra.mxu0 %v7656_v23  ;;  %v7704_v23 = vld [vmem:[#allocation9 + $0x1d0] ss:$8 sps:$4 sm:$0xff]  }
 0x347   : > { %5960 = vmatprep.subr.bf16.mxu0 %v7661_v25  ;;  %5478 = vmatpush1.bf16.msra.mxu1 %v7587_v22  ;;  %v7709_v25 = vld [vmem:[#allocation9 + $0x1c4] ss:$8 sps:$4 sm:$0xff]   ;;  %v5208_v22 = vpop.f32.mrf.mxu0 }
 0x348   : > { %5479 = vmatprep.subr.bf16.mxu1 %v7592_v29  ;;  %v5247_v29 = vpop.f32.mrf.mxu1 }
 0x34a   : > { %5961 = vmatpush2.bf16.msra.mxu0 %v7659_v0  ;;  %v7707_v0 = vld [vmem:[#allocation9 + $0x1c0] ss:$8 sps:$4 sm:$0xff]  }
 0x34b   : > { %5962 = vmatprep.subr.bf16.mxu0 %v7664_v26  ;;  %5480 = vmatpush1.bf16.msra.mxu1 %v7590_v48  ;;  %v7712_v26 = vld [vmem:[#allocation9 + $0x1b4] ss:$8 sps:$4 sm:$0xff]   ;;  %v5210_v48 = vpop.f32.mrf.mxu0 }
 0x34c   : > { %5481 = vmatprep.subr.bf16.mxu1 %v7595_v27  ;;  %v5249_v27 = vpop.f32.mrf.mxu1 }
 0x34e   : > { %5963 = vmatpush2.bf16.msra.mxu0 %v7662_v28 }
 0x34f   : > { %5964 = vmatprep.subr.bf16.mxu0 %v7667_v4  ;;  %5482 = vmatpush1.bf16.msra.mxu1 %v7593_v30  ;;  %v7710_v4 = vld [vmem:[#allocation9 + $0x1b0] ss:$8 sps:$4 sm:$0xff]   ;;  %v8339_v30 = vld [vmem:[#allocation7] sm:$0xf] }
 0x350   : > { %5483 = vmatprep.subr.bf16.mxu1 %v7598_v57  ;;  %v3877_v57 = vrot.slane %v8339_v30, %v8273_v46 }
 0x352   : > { %5965 = vmatpush2.bf16.msra.mxu0 %v7665_v20  ;;  %v3873_v20 = vrot.slane %v8339_v30, %v8235_v5 }
 0x353   : > { %5966 = vmatprep.subr.bf16.mxu0 %v7670_v39  ;;  %5484 = vmatpush1.bf16.msra.mxu1 %v7596_v31  ;;  %v5251_v39 = vpop.f32.mrf.mxu1 }
 0x354   : > { %5485 = vmatprep.subr.bf16.mxu1 %v7601_v35  ;;  %v5207_v35 = vadd.f32 %v5206_v63, %v3877_v57  ;;  %v7726_v63 = vld [vmem:[#allocation12 + $0x68] sm:$0xff]  }
 0x356   : > { %5967 = vmatpush2.bf16.msra.mxu0 %v7668_v36  ;;  %v5205_v36 = vadd.f32 %v5204_v40, %v3873_v20  ;;  %v7723_v40 = vld [vmem:[#allocation12 + $0x38] sm:$0xff]  }
 0x357   : > { %5968 = vmatprep.subr.bf16.mxu0 %v7673_v34  ;;  %5486 = vmatpush1.bf16.msra.mxu1 %v7599_v37  ;;  %v5253_v34 = vpop.f32.mrf.mxu1 }
 0x358   : > { %5487 = vmatprep.subr.bf16.mxu1 %v7604_v49  ;;  %v5209_v49 = vadd.f32 %v5208_v22, %v3873_v20  ;;  %v7729_v22 = vld [vmem:[#allocation12 + $0x20] sm:$0xff]   ;;  %v3881_v20 = vrot.slane %v8339_v30, %v874_v38 }
 0x35a   : > { %5969 = vmatpush2.bf16.msra.mxu0 %v7671_v12  ;;  %v5250_v12 = vadd.f32 %v5249_v27, %v5207_v35 }
 0x35b   : > { %5488 = vmatpush2.bf16.msra.mxu1 %v7602_v43  ;;  %v5248_v43 = vadd.f32 %v5247_v29, %v5205_v36  ;;  %v7730_v29 = vld [vmem:[#allocation12 + $0x58] sm:$0xff]  }
 0x35c   : > { %5489 = vmatprep.subr.bf16.mxu1 %v7607_v41 }
 0x35d   : > { %v5290_v28 = vpop.f32.mrf.mxu0 }
 0x35f   : > { %5490 = vmatpush2.bf16.msra.mxu1 %v7605_v32  ;;  %v5292_v31 = vpop.f32.mrf.mxu0  ;;  %v5211_v32 = vadd.f32 %v5210_v48, %v3877_v57  ;;  %v3885_v57 = vrot.slane %v8339_v30, %v878_v24 }
 0x360   : > { %5491 = vmatprep.subr.bf16.mxu1 %v7610_v42  ;;  %v5252_v42 = vadd.f32 %v5251_v39, %v5209_v49 }
 0x361   : > { %v5294_v37 = vpop.f32.mrf.mxu0 }
 0x363   : > { %5492 = vmatpush2.bf16.msra.mxu1 %v7608_v44  ;;  %v5293_v44 = vadd.f32 %v5292_v31, %v5250_v12 }
 0x364   : > { %5493 = vmatprep.subr.bf16.mxu1 %v7613_v45  ;;  %v7715_v45 = vld [vmem:[#allocation9 + $0x1a4] ss:$8 sps:$4 sm:$0xff]  }
 0x367   : > { %5494 = vmatpush2.bf16.msra.mxu1 %v7611_v47  ;;  %v5291_v47 = vadd.f32 %v5290_v28, %v5248_v43 }
 0x368   : > { %5495 = vmatprep.subr.bf16.mxu1 %v7616_v50  ;;  %v5296_v50 = vpop.f32.mrf.mxu0 }
 0x36b   : > { %5496 = vmatpush2.bf16.msra.mxu1 %v7614_v51 }
 0x36c   : > { %5497 = vmatprep.subr.bf16.mxu1 %v7619_v10  ;;  %v7713_v10 = vld [vmem:[#allocation9 + $0x1a0] ss:$8 sps:$4 sm:$0xff]  }
 0x36f   : > { %5498 = vmatpush2.bf16.msra.mxu1 %v7617_v16  ;;  %v5254_v16 = vadd.f32 %v5253_v34, %v5211_v32 }
 0x370   : > { %5499 = vmatprep.subr.bf16.mxu1 %v7622_v7  ;;  %v5295_v7 = vadd.f32 %v5294_v37, %v5252_v42 }
 0x373   : > { %5500 = vmatpush2.bf16.msra.mxu1 %v7620_v52 }
 0x374   : > { %5501 = vmatprep.subr.bf16.mxu1 %v7625_v53 }
 0x377   : > { %5502 = vmatpush2.bf16.msra.mxu1 %v7623_v55 }
 0x378   : > { %5981 = vmatprep.subr.bf16.mxu1 %v7676_v60 }
 0x37a   : > { %5504 = vmatmul.mubr.bf16.vlgmr.msra.gmra.mxu1 %v8330_v2  ;;  %v7691_v2 = vld [vmem:[#allocation9 + $0x124] ss:$8 sps:$4 sm:$0xff]  }
 0x37b   : > { %5982 = vmatpush1.bf16.msra.mxu1 %v7674_v56  ;;  %v5297_v56 = vadd.f32 %v5296_v50, %v5254_v16 }
 0x37c   : > { %5983 = vmatprep.subr.bf16.mxu1 %v7679_v61  ;;  %v7718_v61 = vld [vmem:[#allocation9 + $0x194] ss:$8 sps:$4 sm:$0xff]  }
 0x37f   : > { %5984 = vmatpush1.bf16.msra.mxu1 %v7677_v62 }
 0x380   : > { %5985 = vmatprep.subr.bf16.mxu1 %v7682_v1  ;;  %v7716_v1 = vld [vmem:[#allocation9 + $0x190] ss:$8 sps:$4 sm:$0xff]  }
 0x383   : > { %5986 = vmatpush1.bf16.msra.mxu1 %v7680_v54 }
 0x384   : > { %5987 = vmatprep.subr.bf16.mxu1 %v7685_v3 }
 0x387   : > { %5988 = vmatpush1.bf16.msra.mxu1 %v7683_v6 }
 0x388   : > { %5989 = vmatprep.subr.bf16.mxu1 %v7688_v8 }
 0x38b   : > { %5990 = vmatpush1.bf16.msra.mxu1 %v7686_v9 }
 0x38c   : > { %5991 = vmatprep.subr.bf16.mxu1 %v7691_v2  ;;  %v7721_v2 = vld [vmem:[#allocation9 + $0x184] ss:$8 sps:$4 sm:$0xff]  }
 0x38f   : > { %5992 = vmatpush1.bf16.msra.mxu1 %v7689_v11 }
 0x390   : > { %5993 = vmatprep.subr.bf16.mxu1 %v7694_v13  ;;  %v7719_v13 = vld [vmem:[#allocation9 + $0x180] ss:$8 sps:$4 sm:$0xff]  }
 0x393   : > { %5994 = vmatpush1.bf16.msra.mxu1 %v7692_v15 }
 0x394   : > { %5995 = vmatprep.subr.bf16.mxu1 %v7697_v58 }
 0x397   : > { %5996 = vmatpush1.bf16.msra.mxu1 %v7695_v17 }
 0x398   : > { %5997 = vmatprep.subr.bf16.mxu1 %v7700_v14 }
 0x39b   : > { %5998 = vmatpush2.bf16.msra.mxu1 %v7698_v18 }
 0x39c   : > { %5999 = vmatprep.subr.bf16.mxu1 %v7703_v19  ;;  %v7722_v19 = vld [vmem:[#allocation12 + $0x78] sm:$0xff]  }
 0x39d   : > { %7121 = vmatprep.subr.bf16.mxu0 %v7722_v19  ;;  %v5606_v19 = vld [vmem:[#allocation10] sm:$0x3] }
 0x39f   : > { %6000 = vmatpush2.bf16.msra.mxu1 %v7701_v33  ;;  %v7724_v33 = vld [vmem:[#allocation12 + $0x70] sm:$0xff]  }
 0x3a0   : > { %6001 = vmatprep.subr.bf16.mxu1 %v7706_v21  ;;  %v7725_v21 = vld [vmem:[#allocation12 + $0x30] sm:$0xff]  }
 0x3a3   : > { %6002 = vmatpush2.bf16.msra.mxu1 %v7704_v23  ;;  %v7727_v23 = vld [vmem:[#allocation12 + $0x28] sm:$0xff]  }
 0x3a4   : > { %6003 = vmatprep.subr.bf16.mxu1 %v7709_v25  ;;  %v7728_v25 = vld [vmem:[#allocation12 + $0x60] sm:$0xff]  }
 0x3a7   : > { %6004 = vmatpush2.bf16.msra.mxu1 %v7707_v0  ;;  %v5376_v0 = vpop.f32.mrf.mxu0 }
 0x3a8   : > { %6005 = vmatprep.subr.bf16.mxu1 %v7712_v26  ;;  %v5377_v36 = vadd.f32 %v5376_v0, %v3881_v20 }
 0x3a9   : > { %v5378_v26 = vpop.f32.mrf.mxu0 }
 0x3aa   : > { %v5379_v35 = vadd.f32 %v5378_v26, %v3885_v57 }
 0x3ab   : > { %6006 = vmatpush2.bf16.msra.mxu1 %v7710_v4  ;;  %v5380_v48 = vpop.f32.mrf.mxu0 }
 0x3ac   : > { %6007 = vmatprep.subr.bf16.mxu1 %v7715_v45  ;;  %v5381_v37 = vadd.f32 %v5380_v48, %v3881_v20 }
 0x3ad   : > { %v5382_v28 = vpop.f32.mrf.mxu0 }
 0x3af   : > { %6008 = vmatpush2.bf16.msra.mxu1 %v7713_v10 }
 0x3b0   : > { %6009 = vmatprep.subr.bf16.mxu1 %v7718_v61 }
 0x3b3   : > { %6010 = vmatpush2.bf16.msra.mxu1 %v7716_v1 }
 0x3b4   : > { %6011 = vmatprep.subr.bf16.mxu1 %v7721_v2  ;;  %v7732_v2 = vld [vmem:[#allocation12 + $0x50] sm:$0xff]  }
 0x3b7   : > { %6012 = vmatpush2.bf16.msra.mxu1 %v7719_v13  ;;  %v7734_v13 = vld [vmem:[#allocation12 + $0x48] sm:$0xff]  }
 0x3ba   : > { %v5333_v41 = vpop.f32.mrf.mxu1 }
 0x3bb   : > { %v5334_v53 = vadd.f32 %v5333_v41, %v5291_v47  ;;  %v5383_v41 = vadd.f32 %v5382_v28, %v3885_v57 }
 0x3bc   : > { %v5335_v51 = vpop.f32.mrf.mxu1 }
 0x3bd   : > { %v5336_v52 = vadd.f32 %v5335_v51, %v5293_v44  ;;  %v5522_v8 = vmul.f32 0.2, %v5334_v53  ;;  %vm5514_vm3 = vcmp.gt.f32.partialorder %v5334_v53, 0.0 }
 0x3be   : > { %v5337_v55 = vpop.f32.mrf.mxu1 }
 0x3bf   : > { %v5338_v60 = vadd.f32 %v5337_v55, %v5295_v7  ;;  %v5523_v54 = vmul.f32 0.2, %v5336_v52  ;;  %vm5515_vm2 = vcmp.gt.f32.partialorder %v5336_v52, 0.0  ;;  %v5530_v17 = vsel %vm5514_vm3, %v5334_v53, %v5522_v8 }
 0x3c0   : > { %v5339_v62 = vpop.f32.mrf.mxu1 }
 0x3c1   : > { %vm5518_vm1 = vcmp.gt.f32.partialorder %v5338_v60, 0.0  ;;  %v5526_v3 = vmul.f32 0.2, %v5338_v60  ;;  %v5340_v6 = vadd.f32 %v5339_v62, %v5297_v56  ;;  %v5531_v15 = vsel %vm5515_vm2, %v5336_v52, %v5523_v54 }
 0x3c3   : > { %vm5519_vm4 = vcmp.gt.f32.partialorder %v5340_v6, 0.0  ;;  %v5527_v9 = vmul.f32 0.2, %v5340_v6  ;;  %v5534_v11 = vsel %vm5518_vm1, %v5338_v60, %v5526_v3 }
 0x3c4   : > { %v5538_v18 = vpack.c.bf16 %v5534_v11, %v5530_v17  ;;  %v7733_v11 = vld [vmem:[#allocation12 + $0x10] sm:$0xff]   ;;  %v7737_v17 = vld [vmem:[#allocation12] sm:$0xff]  }
 0x3c5   : > { %v5535_v58 = vsel %vm5519_vm4, %v5340_v6, %v5527_v9  ;;  %v7731_v9 = vld [vmem:[#allocation12 + $0x18] sm:$0xff]  }
 0x3c6   : > { %v5539_v14 = vpack.c.bf16 %v5535_v58, %v5531_v15  ;;  %v7735_v15 = vld [vmem:[#allocation12 + $0x8] sm:$0xff]   ;;  %v7736_v58 = vld [vmem:[#allocation12 + $0x40] sm:$0xff]  }
 0x3c8   : > { %5970 = vmatprep.mubr.bf16.mxu0 %v5539_v14 }
 0x3c9   : > { %5971 = vmatmul.mubr.bf16.vlgmr.msra.gmra.mxu0 %v5538_v18 }
 0x3ca   : > { %7122 = vmatpush3.bf16.msra.mxu0 %v7723_v40  ;;  %v5615_v40 = vrot.slane %v5606_v19, %v8273_v46 }
 0x3cb   : > { %7123 = vmatprep.subr.bf16.mxu0 %v7724_v33  ;;  %v5611_v33 = vrot.slane %v5606_v19, %v8235_v5 }
 0x3ce   : > { %7124 = vmatpush3.bf16.msra.mxu0 %v7725_v21 }
 0x3cf   : > { %7125 = vmatprep.subr.bf16.mxu0 %v7726_v63 }
 0x3d2   : > { %7126 = vmatpush3.bf16.msra.mxu0 %v7727_v23 }
 0x3d3   : > { %7127 = vmatprep.subr.bf16.mxu0 %v7728_v25 }
 0x3d6   : > { %7128 = vmatpush3.bf16.msra.mxu0 %v7729_v22 }
 0x3d7   : > { %7129 = vmatprep.subr.bf16.mxu0 %v7730_v29 }
 0x3da   : > { %7130 = vmatpush3.bf16.msra.mxu0 %v7731_v9 }
 0x3db   : > { %7131 = vmatprep.subr.bf16.mxu0 %v7732_v2 }
 0x3dd   : > { %v5462_v39 = vpop.f32.mrf.mxu0 }
 0x3de   : > { %7132 = vmatpush3.bf16.msra.mxu0 %v7733_v11 }
 0x3df   : > { %v5464_v34 = vpop.f32.mrf.mxu0  ;;  %7133 = vmatprep.subr.bf16.mxu0 %v7734_v13 }
 0x3e1   : > { %v5466_v42 = vpop.f32.mrf.mxu0 }
 0x3e2   : > { %7134 = vmatpush3.bf16.msra.mxu0 %v7735_v15 }
 0x3e3   : > { %v5468_v38 = vpop.f32.mrf.mxu0  ;;  %7135 = vmatprep.subr.bf16.mxu0 %v7736_v58 }
 0x3e6   : > { %7136 = vmatpush3.bf16.msra.mxu0 %v7737_v17 }
 0x3fa   : > { %v5419_v27 = vpop.f32.mrf.mxu1 }
 0x3fb   : > { %v5420_v12 = vadd.f32 %v5419_v27, %v5377_v36 }
 0x3fc   : > { %v5421_v4 = vpop.f32.mrf.mxu1 }
 0x3fd   : > { %v5422_v49 = vadd.f32 %v5421_v4, %v5379_v35  ;;  %v5463_v24 = vadd.f32 %v5462_v39, %v5420_v12 }
 0x3fe   : > { %v5423_v31 = vpop.f32.mrf.mxu1 }
 0x3ff   : > { %v5424_v32 = vadd.f32 %v5423_v31, %v5381_v37  ;;  %v5465_v47 = vadd.f32 %v5464_v34, %v5422_v49 }
 0x400   : > { %v5425_v43 = vpop.f32.mrf.mxu1 }
 0x401   : > { %v5426_v45 = vadd.f32 %v5425_v43, %v5383_v41  ;;  %v5467_v51 = vadd.f32 %v5466_v42, %v5424_v32  ;;  %v7102_v41 = vld [vmem:[#allocation13] ss:$0 sm:$0xff] }
 0x403   : > { %v5469_v7 = vadd.f32 %v5468_v38, %v5426_v45 }
 0x43a   : > { %v5505_v44 = vpop.f32.mrf.mxu1 }
 0x43b   : > { %v5506_v30 = vadd.f32 %v5505_v44, %v5463_v24 }
 0x43c   : > { %v5507_v50 = vpop.f32.mrf.mxu1 }
 0x43d   : > { %v5508_v59 = vadd.f32 %v5507_v50, %v5465_v47  ;;  %v5524_v60 = vmul.f32 0.2, %v5506_v30  ;;  %vm5516_vm7 = vcmp.gt.f32.partialorder %v5506_v30, 0.0 }
 0x43e   : > { %v5509_v10 = vpop.f32.mrf.mxu1 }
 0x43f   : > { %v5510_v16 = vadd.f32 %v5509_v10, %v5467_v51  ;;  %v5525_v53 = vmul.f32 0.2, %v5508_v59  ;;  %vm5517_vm6 = vcmp.gt.f32.partialorder %v5508_v59, 0.0  ;;  %v5532_v3 = vsel %vm5516_vm7, %v5506_v30, %v5524_v60 }
 0x440   : > { %v5511_v52 = vpop.f32.mrf.mxu1 }
 0x441   : > { %vm5520_vm5 = vcmp.gt.f32.partialorder %v5510_v16, 0.0  ;;  %v5528_v55 = vmul.f32 0.2, %v5510_v16  ;;  %v5512_v56 = vadd.f32 %v5511_v52, %v5469_v7  ;;  %v5533_v1 = vsel %vm5517_vm6, %v5508_v59, %v5525_v53 }
 0x443   : > { %vm5521_vm8 = vcmp.gt.f32.partialorder %v5512_v56, 0.0  ;;  %v5529_v61 = vmul.f32 0.2, %v5512_v56  ;;  %v5536_v62 = vsel %vm5520_vm5, %v5510_v16, %v5528_v55 }
 0x444   : > { %v5540_v8 = vpack.c.bf16 %v5536_v62, %v5532_v3 }
 0x445   : > { %v5537_v54 = vsel %vm5521_vm8, %v5512_v56, %v5529_v61 }
 0x446   : > { %v5541_v6 = vpack.c.bf16 %v5537_v54, %v5533_v1 }
 0x448   : > { %6013 = vmatprep.mubr.bf16.mxu1 %v5541_v6 }
 0x449   : > { %6014 = vmatmul.mubr.bf16.vlgmr.msra.gmra.mxu1 %v5540_v8 }
 0x489   : > { %v5972_v14 = vpop.f32.mrf.mxu0 }
 0x48a   : > { %v5973_v25 = vadd.f32 %v5972_v14, %v5611_v33 }
 0x48b   : > { %v5974_v18 = vpop.f32.mrf.mxu0 }
 0x48c   : > { %v5975_v23 = vadd.f32 %v5974_v18, %v5615_v40 }
 0x48d   : > { %v5976_v21 = vpop.f32.mrf.mxu0 }
 0x48e   : > { %v5977_v0 = vadd.f32 %v5976_v21, %v5611_v33 }
 0x48f   : > { %v5978_v22 = vpop.f32.mrf.mxu0 }
 0x490   : > { %v5979_v28 = vadd.f32 %v5978_v22, %v5615_v40 }
 0x509   : > { %v6015_v63 = vpop.f32.mrf.mxu1 }
 0x50a   : > { %v6016_v48 = vadd.f32 %v6015_v63, %v5973_v25 }
 0x50b   : > { %v6017_v29 = vpop.f32.mrf.mxu1 }
 0x50c   : > { %v6018_v26 = vadd.f32 %v6017_v29, %v5975_v23  ;;  %v6028_v46 = vmul.f32 0.2, %v6016_v48  ;;  %vm6024_vm11 = vcmp.gt.f32.partialorder %v6016_v48, 0.0 }
 0x50d   : > { %v6019_v27 = vpop.f32.mrf.mxu1 }
 0x50e   : > { %v6020_v4 = vadd.f32 %v6019_v27, %v5977_v0  ;;  %v6029_v20 = vmul.f32 0.2, %v6018_v26  ;;  %vm6025_vm10 = vcmp.gt.f32.partialorder %v6018_v26, 0.0  ;;  %v6032_v37 = vsel %vm6024_vm11, %v6016_v48, %v6028_v46 }
 0x50f   : > { %v6021_v57 = vpop.f32.mrf.mxu1 }
 0x510   : > { %vm6026_vm9 = vcmp.gt.f32.partialorder %v6020_v4, 0.0  ;;  %v6030_v39 = vmul.f32 0.2, %v6020_v4  ;;  %v6022_v31 = vadd.f32 %v6021_v57, %v5979_v28  ;;  %v6033_v36 = vsel %vm6025_vm10, %v6018_v26, %v6029_v20 }
 0x512   : > { %vm6027_vm12 = vcmp.gt.f32.partialorder %v6022_v31, 0.0  ;;  %v6031_v5 = vmul.f32 0.2, %v6022_v31  ;;  %v6034_v35 = vsel %vm6026_vm9, %v6020_v4, %v6030_v39 }
 0x513   : > { %v6036_v12 = vpack.c.bf16 %v6034_v35, %v6032_v37 }
 0x514   : > { %v6035_v34 = vsel %vm6027_vm12, %v6022_v31, %v6031_v5 }
 0x515   : > { %v6037_v49 = vpack.c.bf16 %v6035_v34, %v6033_v36 }
 0x517   : > { %6205 = vmatprep.mubr.bf16.mxu0 %v6037_v49 }
 0x518   : > { %6206 = vmatmul.mubr.bf16.vlgmr.msra.gmra.mxu0 %v6036_v12 }
 0x5d8   : > { %v7137_v43 = vpop.f32.mrf.mxu0 }
 0x5da   : > { %v7138_v32 = vpop.f32.mrf.mxu0 }
 0x5db   : > { %v7139_v42 = vadd.f32 %v7138_v32, %v7137_v43 }
 0x5dc   : > { %v7140_v44 = vpop.f32.mrf.mxu0 }
 0x5dd   : > { %v6208_v45 = vadd.f32 %v7139_v42, %v7102_v41 }
 0x5de   : > { %v7141_v47 = vpop.f32.mrf.mxu0 }
 0x5df   : > { %v6214_v24 = vsub.f32 0.0, %v6208_v45  ;;  %v7142_v50 = vadd.f32 %v7141_v47, %v7140_v44 }
 0x5e1   : > { %v6216_v59 = vmul.f32 1.442695, %v6214_v24  ;;  %v6211_v51 = vadd.f32 %v7142_v50, %v7102_v41 }
 0x5e3   : > { %7738 = vpow2.f32 %v6216_v59  ;;  %v6215_v38 = vsub.f32 0.0, %v6211_v51 }
 0x5e5   : > { %v6218_v30 = vmul.f32 1.442695, %v6215_v38 }
 0x5e7   : > { %7740 = vpow2.f32 %v6218_v30 }
 0x5f0   : > { %v7739_v10 = vpop.eup %7738 }
 0x5f1   : > { %v6220_v16 = vadd.f32 1.0, %v7739_v10 }
 0x5f3   : > { %7742 = vrcp.f32 %v6220_v16 }
 0x5f4   : > { %v7741_v7 = vpop.eup %7740 }
 0x5f5   : > { %v6221_v52 = vadd.f32 1.0, %v7741_v7 }
 0x5f7   : > { %7744 = vrcp.f32 %v6221_v52 }
 0x600   : > { %v7743_v53 = vpop.eup %7742 }
 0x601   : > { %6224 = vst [vmem:[%s446_s18] sm:$0xff] %v7743_v53 }
 0x604   : > { %v7745_v55 = vpop.eup %7744 }
 0x605   : > { %6225 = vst [vmem:[%s446_s18 + $0x8] sm:$0xff] %v7745_v55 }
 0x606 PF: > { %s24_s30 = sadd.s32 1, %s7981_s30  }
 0x607   : > { %p21_p6 = scmp.ge.s32.totalorder %s24_s30, 4  }
 0x609   :  { %23 = sbr.rel (!%p21_p6) target bundleno = 5 (0x5), region = 119 }
 0x60e   :  { %6248 = vsyncpa [#allocation3], 1 }
 0x60f   :  { %6250 = vsyncpa [#allocation3 + $0x1], 1 }
 0x610   :  { %6251 = vsyncpa [#allocation5], 1 }
 0x611   :  { %6252 = vsyncpa [#allocation8], 1 }
 0x612   :  { %6253 = vsyncpa [#allocation11], 1 }
 0x613   :  { %6254 = vsyncpa [#allocation14], 1 }

</bundles_post_ra>
